<compile_context>
chip_gen: v6e
topology: v6e:2x2x1
jax: 0.10.0
libtpu: 0.0.40
codegen_flags: <defaults>
</compile_context>

<pallas_src>
import functools

import jax
import jax.numpy as jnp
from jax.experimental import pallas as pl
from jax.experimental.pallas import tpu as pltpu


def _reconstruct_kernel(fea_ref, xc_ref,
                        w1_ref, b1_ref, w2_ref, b2_ref,
                        hrw_ref, hrb_ref, lw_ref, lb_ref,
                        out_ref, buf_a, buf_b, *, n_res):
    """Fused Reconstruct forward for one batch element.

    fea_ref : (1, H, W, C)        input features
    xc_ref  : (1, H, W, 128)      x_center zero-padded to 128 channels
    w*_ref  : (3, 3*C, Cout)      conv weights, [dy][(dx, cin)][cout]
    b*_ref  : (1, Cout)           biases
    out_ref : (1, H, W, 128)      lane-dense output slab (real Cout = 3)
    buf_a/b : (H+2, W+2, C) f32   zero-bordered resident activation buffers
    """
    H, W = fea_ref.shape[1], fea_ref.shape[2]

    def conv3x3(src_ref, w_ref, bias):
        """3x3 SAME conv over a zero-bordered padded VMEM buffer.

        Returns (H, W, Cout) f32 = conv(src) + bias.
        """
        x = src_ref[...]                                   # (H+2, W+2, C)
        # Three dx-shifted slabs, built once and reused for every dy tap;
        # concatenated along channels so each tap matmul has K = 3*C.
        xc = jnp.concatenate(
            [x[:, 0:W, :], x[:, 1:W + 1, :], x[:, 2:W + 2, :]], axis=-1)
        dims = (((2,), (0,)), ((), ()))
        acc = jax.lax.dot_general(xc[0:H], w_ref[0], dims,
                                  preferred_element_type=jnp.float32)
        acc = acc + jax.lax.dot_general(xc[1:H + 1], w_ref[1], dims,
                                        preferred_element_type=jnp.float32)
        acc = acc + jax.lax.dot_general(xc[2:H + 2], w_ref[2], dims,
                                        preferred_element_type=jnp.float32)
        return acc + bias                                  # (1,Cout) broadcasts

    # Hoist bias loads out of the trunk loop (f32 epilogue everywhere).
    b1 = b1_ref[...]
    b2 = b2_ref[...]

    # Zero once -> borders stay zero forever; only interiors are rewritten.
    buf_a[...] = jnp.zeros_like(buf_a)
    buf_b[...] = jnp.zeros_like(buf_b)
    buf_a[1:H + 1, 1:W + 1, :] = fea_ref[0]

    # recon_trunk: the SAME ResnetBlock applied n_res times (shared weights):
    #   out = out + conv2(relu(conv1(out)))
    def trunk_body(i, carry):
        h = jnp.maximum(conv3x3(buf_a, w1_ref, b1), 0.0)
        buf_b[1:H + 1, 1:W + 1, :] = h
        y = conv3x3(buf_b, w2_ref, b2)
        buf_a[1:H + 1, 1:W + 1, :] = buf_a[1:H + 1, 1:W + 1, :] + y
        return carry

    jax.lax.fori_loop(0, n_res, trunk_body, 0)

    # out = lrelu(HRconv(out))
    hr = conv3x3(buf_a, hrw_ref, hrb_ref[...])
    hr = jnp.where(hr > 0, hr, 0.1 * hr)                   # LeakyReLU(0.1)
    buf_b[1:H + 1, 1:W + 1, :] = hr

    # out = conv_last(out) + x_center   (padded 128-lane slab; caller slices)
    last = conv3x3(buf_b, lw_ref, lb_ref[...])
    out_ref[0] = (last + xc_ref[0]).astype(out_ref.dtype)


def _prep_conv_weight(w):
    """(3, 3, Cin, Cout) HWIO -> (3, 3*Cin, Cout), [dy][(dx, cin)][cout]."""
    kh, kw, cin, cout = w.shape
    return w.reshape(kh, kw * cin, cout)


def reconstruct_forward(params, fea, x_center, n_res=10):
    N, H, W, C = fea.shape
    CO_PAD = 128  # lane-dense output slab; real Cout = 3, sliced below

    w1 = _prep_conv_weight(params["res_w1"])
    w2 = _prep_conv_weight(params["res_w2"])
    hw = _prep_conv_weight(params["hr_w"])
    lw = _prep_conv_weight(params["last_w"])
    lw = jnp.pad(lw, ((0, 0), (0, 0), (0, CO_PAD - lw.shape[-1])))

    b1 = params["res_b1"].reshape(1, C)
    b2 = params["res_b2"].reshape(1, C)
    hb = params["hr_b"].reshape(1, C)
    lb = jnp.pad(params["last_b"],
                 (0, CO_PAD - params["last_b"].shape[0])).reshape(1, CO_PAD)

    xc = jnp.pad(x_center,
                 ((0, 0), (0, 0), (0, 0), (0, CO_PAD - x_center.shape[-1])))

    kern = functools.partial(_reconstruct_kernel, n_res=n_res)
    out = pl.pallas_call(
        kern,
        out_shape=jax.ShapeDtypeStruct((N, H, W, CO_PAD), jnp.float32),
        grid=(N,),
        in_specs=[
            pl.BlockSpec((1, H, W, C), lambda n: (n, 0, 0, 0)),        # fea
            pl.BlockSpec((1, H, W, CO_PAD), lambda n: (n, 0, 0, 0)),   # x_center
            pl.BlockSpec((3, 3 * C, C), lambda n: (0, 0, 0)),          # res_w1
            pl.BlockSpec((1, C), lambda n: (0, 0)),                    # res_b1
            pl.BlockSpec((3, 3 * C, C), lambda n: (0, 0, 0)),          # res_w2
            pl.BlockSpec((1, C), lambda n: (0, 0)),                    # res_b2
            pl.BlockSpec((3, 3 * C, C), lambda n: (0, 0, 0)),          # hr_w
            pl.BlockSpec((1, C), lambda n: (0, 0)),                    # hr_b
            pl.BlockSpec((3, 3 * C, CO_PAD), lambda n: (0, 0, 0)),     # last_w
            pl.BlockSpec((1, CO_PAD), lambda n: (0, 0)),               # last_b
        ],
        out_specs=pl.BlockSpec((1, H, W, CO_PAD), lambda n: (n, 0, 0, 0)),
        scratch_shapes=[pltpu.VMEM((H + 2, W + 2, C), jnp.float32),
                        pltpu.VMEM((H + 2, W + 2, C), jnp.float32)],
        compiler_params=pltpu.CompilerParams(
            dimension_semantics=("parallel",)),
    )(fea, xc, w1, b1, w2, b2, hw, hb, lw, lb)
    return out[..., :3]


# ----------------------------- params ---------------------------------------

def init_params(key, nf=64):
    def wconv(k, cin, cout, scale=0.05):
        return scale * jax.random.normal(k, (3, 3, cin, cout), jnp.float32)

    ks = jax.random.split(key, 8)
    return {
        # shared ResnetBlock weights (the Sequential repeats one instance)
        "res_w1": wconv(ks[0], nf, nf),
        "res_b1": 0.01 * jax.random.normal(ks[1], (nf,), jnp.float32),
        "res_w2": wconv(ks[2], nf, nf),
        "res_b2": 0.01 * jax.random.normal(ks[3], (nf,), jnp.float32),
        # HRconv: 64 -> 64
        "hr_w": wconv(ks[4], 64, 64),
        "hr_b": 0.01 * jax.random.normal(ks[5], (64,), jnp.float32),
        # conv_last: 64 -> 3
        "last_w": wconv(ks[6], 64, 3),
        "last_b": 0.01 * jax.random.normal(ks[7], (3,), jnp.float32),
    }


# ----------------------- pure-JAX reference ----------------------------------

def _conv_ref(x, w, b):
    y = jax.lax.conv_general_dilated(
        x, w, window_strides=(1, 1), padding="SAME",
        dimension_numbers=("NHWC", "HWIO", "NHWC"))
    return y + b


def reconstruct_ref(params, fea, x_center, n_res=10):
    out = fea
    for _ in range(n_res):
        h = jnp.maximum(_conv_ref(out, params["res_w1"], params["res_b1"]), 0.0)
        out = out + _conv_ref(h, params["res_w2"], params["res_b2"])
    h = _conv_ref(out, params["hr_w"], params["hr_b"])
    h = jnp.where(h > 0, h, 0.1 * h)
    return _conv_ref(h, params["last_w"], params["last_b"]) + x_center


if __name__ == "__main__":
    key = jax.random.PRNGKey(0)
    kp, kf, kx = jax.random.split(key, 3)

    N, H, W, nf = 2, 8, 8, 64   # nf must be 64 (HRconv is hardwired 64->64)
    n_res = 10

    params = init_params(kp, nf)
    fea = jax.random.normal(kf, (N, H, W, nf), jnp.float32)
    x_center = jax.random.normal(kx, (N, H, W, 3), jnp.float32)

    fwd = jax.jit(functools.partial(reconstruct_forward, n_res=n_res))
    out = jax.block_until_ready(fwd(params, fea, x_center))
    assert out.shape == (N, H, W, 3) and out.dtype == jnp.float32

    ref = reconstruct_ref(params, fea, x_center, n_res)
    max_err = float(jnp.max(jnp.abs(out - ref)))
    assert jnp.allclose(out, ref, atol=1e-3, rtol=1e-3), max_err

    print("KERNEL_OK")
</pallas_src>

<mosaic_0001>
module attributes {stable_mosaic.version = 11 : i64} {
  func.func @_reconstruct_kernel(%arg0: i32, %arg1: memref<1x8x8x64xf32, #tpu.memory_space<vmem>>, %arg2: memref<1x8x8x128xf32, #tpu.memory_space<vmem>>, %arg3: memref<3x192x64xf32, #tpu.memory_space<vmem>>, %arg4: memref<1x64xf32, #tpu.memory_space<vmem>>, %arg5: memref<3x192x64xf32, #tpu.memory_space<vmem>>, %arg6: memref<1x64xf32, #tpu.memory_space<vmem>>, %arg7: memref<3x192x64xf32, #tpu.memory_space<vmem>>, %arg8: memref<1x64xf32, #tpu.memory_space<vmem>>, %arg9: memref<3x192x128xf32, #tpu.memory_space<vmem>>, %arg10: memref<1x128xf32, #tpu.memory_space<vmem>>, %arg11: memref<1x8x8x128xf32, #tpu.memory_space<vmem>>, %arg12: memref<10x10x64xf32, #tpu.memory_space<vmem>>, %arg13: memref<10x10x64xf32, #tpu.memory_space<vmem>>) attributes {dimension_semantics = [#tpu.dimension_semantics<parallel>], iteration_bounds = array<i64: 2>, scalar_prefetch = 0 : i64, scratch_operands = 2 : i64, tpu.core_type = #tpu.core_type<tc>, window_params = [{transform_indices = @transform_0, window_bounds = array<i64: 1, 8, 8, 64>}, {transform_indices = @transform_1, window_bounds = array<i64: 1, 8, 8, 128>}, {pipeline_mode = #tpu.pipeline_mode<synchronous>, transform_indices = @transform_2, window_bounds = array<i64: 3, 192, 64>}, {pipeline_mode = #tpu.pipeline_mode<synchronous>, transform_indices = @transform_3, window_bounds = array<i64: 1, 64>}, {pipeline_mode = #tpu.pipeline_mode<synchronous>, transform_indices = @transform_4, window_bounds = array<i64: 3, 192, 64>}, {pipeline_mode = #tpu.pipeline_mode<synchronous>, transform_indices = @transform_5, window_bounds = array<i64: 1, 64>}, {pipeline_mode = #tpu.pipeline_mode<synchronous>, transform_indices = @transform_6, window_bounds = array<i64: 3, 192, 64>}, {pipeline_mode = #tpu.pipeline_mode<synchronous>, transform_indices = @transform_7, window_bounds = array<i64: 1, 64>}, {pipeline_mode = #tpu.pipeline_mode<synchronous>, transform_indices = @transform_8, window_bounds = array<i64: 3, 192, 128>}, {pipeline_mode = #tpu.pipeline_mode<synchronous>, transform_indices = @transform_9, window_bounds = array<i64: 1, 128>}, {transform_indices = @transform_10, window_bounds = array<i64: 1, 8, 8, 128>}]} {
    %c0 = arith.constant 0 : index
    %c0_0 = arith.constant 0 : index
    %0 = vector.load %arg4[%c0, %c0_0] : memref<1x64xf32, #tpu.memory_space<vmem>>, vector<1x64xf32>
    %c0_1 = arith.constant 0 : index
    %c0_2 = arith.constant 0 : index
    %1 = vector.load %arg6[%c0_1, %c0_2] : memref<1x64xf32, #tpu.memory_space<vmem>>, vector<1x64xf32>
    %cst = arith.constant 0.000000e+00 : f32
    %2 = vector.broadcast %cst : f32 to vector<10x10x64xf32>
    %c0_3 = arith.constant 0 : index
    %c0_4 = arith.constant 0 : index
    %c0_5 = arith.constant 0 : index
    %3 = vector.load %arg12[%c0_3, %c0_4, %c0_5] : memref<10x10x64xf32, #tpu.memory_space<vmem>>, vector<10x10x64xf32>
    tpu.vector_store %arg12[%c0_3, %c0_4, %c0_5], %2 {strides = array<i32>} : memref<10x10x64xf32, #tpu.memory_space<vmem>>, vector<10x10x64xf32>,
    %cst_6 = arith.constant 0.000000e+00 : f32
    %4 = vector.broadcast %cst_6 : f32 to vector<10x10x64xf32>
    %c0_7 = arith.constant 0 : index
    %c0_8 = arith.constant 0 : index
    %c0_9 = arith.constant 0 : index
    %5 = vector.load %arg13[%c0_7, %c0_8, %c0_9] : memref<10x10x64xf32, #tpu.memory_space<vmem>>, vector<10x10x64xf32>
    tpu.vector_store %arg13[%c0_7, %c0_8, %c0_9], %4 {strides = array<i32>} : memref<10x10x64xf32, #tpu.memory_space<vmem>>, vector<10x10x64xf32>,
    %c0_10 = arith.constant 0 : index
    %c0_11 = arith.constant 0 : index
    %c0_12 = arith.constant 0 : index
    %c0_13 = arith.constant 0 : index
    %6 = vector.load %arg1[%c0_10, %c0_11, %c0_12, %c0_13] : memref<1x8x8x64xf32, #tpu.memory_space<vmem>>, vector<1x8x8x64xf32>
    %7 = vector.shape_cast %6 : vector<1x8x8x64xf32> to vector<8x8x64xf32>
    %c1 = arith.constant 1 : index
    %c1_14 = arith.constant 1 : index
    %c0_15 = arith.constant 0 : index
    %8 = vector.load %arg12[%c1, %c1_14, %c0_15] : memref<10x10x64xf32, #tpu.memory_space<vmem>>, vector<8x8x64xf32>
    tpu.vector_store %arg12[%c1, %c1_14, %c0_15], %7 {strides = array<i32>} : memref<10x10x64xf32, #tpu.memory_space<vmem>>, vector<8x8x64xf32>,
    %c0_i32 = arith.constant 0 : i32
    %c10_i32 = arith.constant 10 : i32
    %9 = arith.addi %c0_i32, %c10_i32 : i32
    %c1_i32 = arith.constant 1 : i32
    scf.for %arg14 = %c0_i32 to %9 step %c1_i32  : i32 {
      %c0_62 = arith.constant 0 : index
      %c0_63 = arith.constant 0 : index
      %c0_64 = arith.constant 0 : index
      %68 = vector.load %arg12[%c0_62, %c0_63, %c0_64] : memref<10x10x64xf32, #tpu.memory_space<vmem>>, vector<10x10x64xf32>
      %69 = vector.extract_strided_slice %68 {offsets = [0, 0, 0], sizes = [10, 8, 64], strides = [1, 1, 1]} : vector<10x10x64xf32> to vector<10x8x64xf32>
      %70 = vector.extract_strided_slice %68 {offsets = [0, 1, 0], sizes = [10, 8, 64], strides = [1, 1, 1]} : vector<10x10x64xf32> to vector<10x8x64xf32>
      %71 = vector.extract_strided_slice %68 {offsets = [0, 2, 0], sizes = [10, 8, 64], strides = [1, 1, 1]} : vector<10x10x64xf32> to vector<10x8x64xf32>
      %72 = tpu.concatenate %69, %70, %71 in 2 : vector<10x8x64xf32>, vector<10x8x64xf32>, vector<10x8x64xf32> -> vector<10x8x192xf32>
      %73 = vector.extract_strided_slice %72 {offsets = [0, 0, 0], sizes = [8, 8, 192], strides = [1, 1, 1]} : vector<10x8x192xf32> to vector<8x8x192xf32>
      %c0_65 = arith.constant 0 : index
      %c0_66 = arith.constant 0 : index
      %c0_67 = arith.constant 0 : index
      %74 = vector.load %arg3[%c0_65, %c0_66, %c0_67] : memref<3x192x64xf32, #tpu.memory_space<vmem>>, vector<1x192x64xf32>
      %75 = vector.shape_cast %74 : vector<1x192x64xf32> to vector<192x64xf32>
      %cst_68 = arith.constant dense<0.000000e+00> : vector<8x8x64xf32>
      %76 = tpu.matmul %73, %75, %cst_68 {dimension_numbers = #tpu.dot_dimension_numbers<[2], [0], [0, 1], [1], [0, 0, 0, 1, 1, 1], [], []>} : vector<8x8x192xf32>, vector<192x64xf32>, vector<8x8x64xf32> -> vector<8x8x64xf32>
      %77 = vector.extract_strided_slice %72 {offsets = [1, 0, 0], sizes = [8, 8, 192], strides = [1, 1, 1]} : vector<10x8x192xf32> to vector<8x8x192xf32>
      %c1_69 = arith.constant 1 : index
      %c0_70 = arith.constant 0 : index
      %c0_71 = arith.constant 0 : index
      %78 = vector.load %arg3[%c1_69, %c0_70, %c0_71] : memref<3x192x64xf32, #tpu.memory_space<vmem>>, vector<1x192x64xf32>
      %79 = vector.shape_cast %78 : vector<1x192x64xf32> to vector<192x64xf32>
      %cst_72 = arith.constant dense<0.000000e+00> : vector<8x8x64xf32>
      %80 = tpu.matmul %77, %79, %cst_72 {dimension_numbers = #tpu.dot_dimension_numbers<[2], [0], [0, 1], [1], [0, 0, 0, 1, 1, 1], [], []>} : vector<8x8x192xf32>, vector<192x64xf32>, vector<8x8x64xf32> -> vector<8x8x64xf32>
      %81 = arith.addf %76, %80 : vector<8x8x64xf32>
      %82 = vector.extract_strided_slice %72 {offsets = [2, 0, 0], sizes = [8, 8, 192], strides = [1, 1, 1]} : vector<10x8x192xf32> to vector<8x8x192xf32>
      %c2_73 = arith.constant 2 : index
      %c0_74 = arith.constant 0 : index
      %c0_75 = arith.constant 0 : index
      %83 = vector.load %arg3[%c2_73, %c0_74, %c0_75] : memref<3x192x64xf32, #tpu.memory_space<vmem>>, vector<1x192x64xf32>
      %84 = vector.shape_cast %83 : vector<1x192x64xf32> to vector<192x64xf32>
      %cst_76 = arith.constant dense<0.000000e+00> : vector<8x8x64xf32>
      %85 = tpu.matmul %82, %84, %cst_76 {dimension_numbers = #tpu.dot_dimension_numbers<[2], [0], [0, 1], [1], [0, 0, 0, 1, 1, 1], [], []>} : vector<8x8x192xf32>, vector<192x64xf32>, vector<8x8x64xf32> -> vector<8x8x64xf32>
      %86 = arith.addf %81, %85 : vector<8x8x64xf32>
      %87 = vector.shape_cast %0 : vector<1x64xf32> to vector<1x1x64xf32>
      %88 = vector.broadcast %87 : vector<1x1x64xf32> to vector<8x8x64xf32>
      %89 = arith.addf %86, %88 : vector<8x8x64xf32>
      %cst_77 = arith.constant 0.000000e+00 : f32
      %90 = vector.broadcast %cst_77 : f32 to vector<8x8x64xf32>
      %91 = arith.maximumf %89, %90 : vector<8x8x64xf32>
      %c1_78 = arith.constant 1 : index
      %c1_79 = arith.constant 1 : index
      %c0_80 = arith.constant 0 : index
      %92 = vector.load %arg13[%c1_78, %c1_79, %c0_80] : memref<10x10x64xf32, #tpu.memory_space<vmem>>, vector<8x8x64xf32>
      tpu.vector_store %arg13[%c1_78, %c1_79, %c0_80], %91 {strides = array<i32>} : memref<10x10x64xf32, #tpu.memory_space<vmem>>, vector<8x8x64xf32>,
      %c0_81 = arith.constant 0 : index
      %c0_82 = arith.constant 0 : index
      %c0_83 = arith.constant 0 : index
      %93 = vector.load %arg13[%c0_81, %c0_82, %c0_83] : memref<10x10x64xf32, #tpu.memory_space<vmem>>, vector<10x10x64xf32>
      %94 = vector.extract_strided_slice %93 {offsets = [0, 0, 0], sizes = [10, 8, 64], strides = [1, 1, 1]} : vector<10x10x64xf32> to vector<10x8x64xf32>
      %95 = vector.extract_strided_slice %93 {offsets = [0, 1, 0], sizes = [10, 8, 64], strides = [1, 1, 1]} : vector<10x10x64xf32> to vector<10x8x64xf32>
      %96 = vector.extract_strided_slice %93 {offsets = [0, 2, 0], sizes = [10, 8, 64], strides = [1, 1, 1]} : vector<10x10x64xf32> to vector<10x8x64xf32>
      %97 = tpu.concatenate %94, %95, %96 in 2 : vector<10x8x64xf32>, vector<10x8x64xf32>, vector<10x8x64xf32> -> vector<10x8x192xf32>
      %98 = vector.extract_strided_slice %97 {offsets = [0, 0, 0], sizes = [8, 8, 192], strides = [1, 1, 1]} : vector<10x8x192xf32> to vector<8x8x192xf32>
      %c0_84 = arith.constant 0 : index
      %c0_85 = arith.constant 0 : index
      %c0_86 = arith.constant 0 : index
      %99 = vector.load %arg5[%c0_84, %c0_85, %c0_86] : memref<3x192x64xf32, #tpu.memory_space<vmem>>, vector<1x192x64xf32>
      %100 = vector.shape_cast %99 : vector<1x192x64xf32> to vector<192x64xf32>
      %cst_87 = arith.constant dense<0.000000e+00> : vector<8x8x64xf32>
      %101 = tpu.matmul %98, %100, %cst_87 {dimension_numbers = #tpu.dot_dimension_numbers<[2], [0], [0, 1], [1], [0, 0, 0, 1, 1, 1], [], []>} : vector<8x8x192xf32>, vector<192x64xf32>, vector<8x8x64xf32> -> vector<8x8x64xf32>
      %102 = vector.extract_strided_slice %97 {offsets = [1, 0, 0], sizes = [8, 8, 192], strides = [1, 1, 1]} : vector<10x8x192xf32> to vector<8x8x192xf32>
      %c1_88 = arith.constant 1 : index
      %c0_89 = arith.constant 0 : index
      %c0_90 = arith.constant 0 : index
      %103 = vector.load %arg5[%c1_88, %c0_89, %c0_90] : memref<3x192x64xf32, #tpu.memory_space<vmem>>, vector<1x192x64xf32>
      %104 = vector.shape_cast %103 : vector<1x192x64xf32> to vector<192x64xf32>
      %cst_91 = arith.constant dense<0.000000e+00> : vector<8x8x64xf32>
      %105 = tpu.matmul %102, %104, %cst_91 {dimension_numbers = #tpu.dot_dimension_numbers<[2], [0], [0, 1], [1], [0, 0, 0, 1, 1, 1], [], []>} : vector<8x8x192xf32>, vector<192x64xf32>, vector<8x8x64xf32> -> vector<8x8x64xf32>
      %106 = arith.addf %101, %105 : vector<8x8x64xf32>
      %107 = vector.extract_strided_slice %97 {offsets = [2, 0, 0], sizes = [8, 8, 192], strides = [1, 1, 1]} : vector<10x8x192xf32> to vector<8x8x192xf32>
      %c2_92 = arith.constant 2 : index
      %c0_93 = arith.constant 0 : index
      %c0_94 = arith.constant 0 : index
      %108 = vector.load %arg5[%c2_92, %c0_93, %c0_94] : memref<3x192x64xf32, #tpu.memory_space<vmem>>, vector<1x192x64xf32>
      %109 = vector.shape_cast %108 : vector<1x192x64xf32> to vector<192x64xf32>
      %cst_95 = arith.constant dense<0.000000e+00> : vector<8x8x64xf32>
      %110 = tpu.matmul %107, %109, %cst_95 {dimension_numbers = #tpu.dot_dimension_numbers<[2], [0], [0, 1], [1], [0, 0, 0, 1, 1, 1], [], []>} : vector<8x8x192xf32>, vector<192x64xf32>, vector<8x8x64xf32> -> vector<8x8x64xf32>
      %111 = arith.addf %106, %110 : vector<8x8x64xf32>
      %112 = vector.shape_cast %1 : vector<1x64xf32> to vector<1x1x64xf32>
      %113 = vector.broadcast %112 : vector<1x1x64xf32> to vector<8x8x64xf32>
      %114 = arith.addf %111, %113 : vector<8x8x64xf32>
      %c1_96 = arith.constant 1 : index
      %c1_97 = arith.constant 1 : index
      %c0_98 = arith.constant 0 : index
      %115 = vector.load %arg12[%c1_96, %c1_97, %c0_98] : memref<10x10x64xf32, #tpu.memory_space<vmem>>, vector<8x8x64xf32>
      %116 = arith.addf %115, %114 : vector<8x8x64xf32>
      %c1_99 = arith.constant 1 : index
      %c1_100 = arith.constant 1 : index
      %c0_101 = arith.constant 0 : index
      %117 = vector.load %arg12[%c1_99, %c1_100, %c0_101] : memref<10x10x64xf32, #tpu.memory_space<vmem>>, vector<8x8x64xf32>
      tpu.vector_store %arg12[%c1_99, %c1_100, %c0_101], %116 {strides = array<i32>} : memref<10x10x64xf32, #tpu.memory_space<vmem>>, vector<8x8x64xf32>,
    }
    %c0_16 = arith.constant 0 : index
    %c0_17 = arith.constant 0 : index
    %10 = vector.load %arg8[%c0_16, %c0_17] : memref<1x64xf32, #tpu.memory_space<vmem>>, vector<1x64xf32>
    %c0_18 = arith.constant 0 : index
    %c0_19 = arith.constant 0 : index
    %c0_20 = arith.constant 0 : index
    %11 = vector.load %arg12[%c0_18, %c0_19, %c0_20] : memref<10x10x64xf32, #tpu.memory_space<vmem>>, vector<10x10x64xf32>
    %12 = vector.extract_strided_slice %11 {offsets = [0, 0, 0], sizes = [10, 8, 64], strides = [1, 1, 1]} : vector<10x10x64xf32> to vector<10x8x64xf32>
    %13 = vector.extract_strided_slice %11 {offsets = [0, 1, 0], sizes = [10, 8, 64], strides = [1, 1, 1]} : vector<10x10x64xf32> to vector<10x8x64xf32>
    %14 = vector.extract_strided_slice %11 {offsets = [0, 2, 0], sizes = [10, 8, 64], strides = [1, 1, 1]} : vector<10x10x64xf32> to vector<10x8x64xf32>
    %15 = tpu.concatenate %12, %13, %14 in 2 : vector<10x8x64xf32>, vector<10x8x64xf32>, vector<10x8x64xf32> -> vector<10x8x192xf32>
    %16 = vector.extract_strided_slice %15 {offsets = [0, 0, 0], sizes = [8, 8, 192], strides = [1, 1, 1]} : vector<10x8x192xf32> to vector<8x8x192xf32>
    %c0_21 = arith.constant 0 : index
    %c0_22 = arith.constant 0 : index
    %c0_23 = arith.constant 0 : index
    %17 = vector.load %arg7[%c0_21, %c0_22, %c0_23] : memref<3x192x64xf32, #tpu.memory_space<vmem>>, vector<1x192x64xf32>
    %18 = vector.shape_cast %17 : vector<1x192x64xf32> to vector<192x64xf32>
    %cst_24 = arith.constant dense<0.000000e+00> : vector<8x8x64xf32>
    %19 = tpu.matmul %16, %18, %cst_24 {dimension_numbers = #tpu.dot_dimension_numbers<[2], [0], [0, 1], [1], [0, 0, 0, 1, 1, 1], [], []>} : vector<8x8x192xf32>, vector<192x64xf32>, vector<8x8x64xf32> -> vector<8x8x64xf32>
    %20 = vector.extract_strided_slice %15 {offsets = [1, 0, 0], sizes = [8, 8, 192], strides = [1, 1, 1]} : vector<10x8x192xf32> to vector<8x8x192xf32>
    %c1_25 = arith.constant 1 : index
    %c0_26 = arith.constant 0 : index
    %c0_27 = arith.constant 0 : index
    %21 = vector.load %arg7[%c1_25, %c0_26, %c0_27] : memref<3x192x64xf32, #tpu.memory_space<vmem>>, vector<1x192x64xf32>
    %22 = vector.shape_cast %21 : vector<1x192x64xf32> to vector<192x64xf32>
    %cst_28 = arith.constant dense<0.000000e+00> : vector<8x8x64xf32>
    %23 = tpu.matmul %20, %22, %cst_28 {dimension_numbers = #tpu.dot_dimension_numbers<[2], [0], [0, 1], [1], [0, 0, 0, 1, 1, 1], [], []>} : vector<8x8x192xf32>, vector<192x64xf32>, vector<8x8x64xf32> -> vector<8x8x64xf32>
    %24 = arith.addf %19, %23 : vector<8x8x64xf32>
    %25 = vector.extract_strided_slice %15 {offsets = [2, 0, 0], sizes = [8, 8, 192], strides = [1, 1, 1]} : vector<10x8x192xf32> to vector<8x8x192xf32>
    %c2 = arith.constant 2 : index
    %c0_29 = arith.constant 0 : index
    %c0_30 = arith.constant 0 : index
    %26 = vector.load %arg7[%c2, %c0_29, %c0_30] : memref<3x192x64xf32, #tpu.memory_space<vmem>>, vector<1x192x64xf32>
    %27 = vector.shape_cast %26 : vector<1x192x64xf32> to vector<192x64xf32>
    %cst_31 = arith.constant dense<0.000000e+00> : vector<8x8x64xf32>
    %28 = tpu.matmul %25, %27, %cst_31 {dimension_numbers = #tpu.dot_dimension_numbers<[2], [0], [0, 1], [1], [0, 0, 0, 1, 1, 1], [], []>} : vector<8x8x192xf32>, vector<192x64xf32>, vector<8x8x64xf32> -> vector<8x8x64xf32>
    %29 = arith.addf %24, %28 : vector<8x8x64xf32>
    %30 = vector.shape_cast %10 : vector<1x64xf32> to vector<1x1x64xf32>
    %31 = vector.broadcast %30 : vector<1x1x64xf32> to vector<8x8x64xf32>
    %32 = arith.addf %29, %31 : vector<8x8x64xf32>
    %cst_32 = arith.constant 0.000000e+00 : f32
    %33 = vector.broadcast %cst_32 : f32 to vector<8x8x64xf32>
    %34 = arith.cmpf ogt, %32, %33 : vector<8x8x64xf32>
    %cst_33 = arith.constant 1.000000e-01 : f32
    %35 = vector.broadcast %cst_33 : f32 to vector<8x8x64xf32>
    %36 = arith.mulf %35, %32 : vector<8x8x64xf32>
    %37 = arith.select %34, %32, %36 : vector<8x8x64xi1>, vector<8x8x64xf32>
    %c1_34 = arith.constant 1 : index
    %c1_35 = arith.constant 1 : index
    %c0_36 = arith.constant 0 : index
    %38 = vector.load %arg13[%c1_34, %c1_35, %c0_36] : memref<10x10x64xf32, #tpu.memory_space<vmem>>, vector<8x8x64xf32>
    tpu.vector_store %arg13[%c1_34, %c1_35, %c0_36], %37 {strides = array<i32>} : memref<10x10x64xf32, #tpu.memory_space<vmem>>, vector<8x8x64xf32>,
    %c0_37 = arith.constant 0 : index
    %c0_38 = arith.constant 0 : index
    %39 = vector.load %arg10[%c0_37, %c0_38] : memref<1x128xf32, #tpu.memory_space<vmem>>, vector<1x128xf32>
    %c0_39 = arith.constant 0 : index
    %c0_40 = arith.constant 0 : index
    %c0_41 = arith.constant 0 : index
    %40 = vector.load %arg13[%c0_39, %c0_40, %c0_41] : memref<10x10x64xf32, #tpu.memory_space<vmem>>, vector<10x10x64xf32>
    %41 = vector.extract_strided_slice %40 {offsets = [0, 0, 0], sizes = [10, 8, 64], strides = [1, 1, 1]} : vector<10x10x64xf32> to vector<10x8x64xf32>
    %42 = vector.extract_strided_slice %40 {offsets = [0, 1, 0], sizes = [10, 8, 64], strides = [1, 1, 1]} : vector<10x10x64xf32> to vector<10x8x64xf32>
    %43 = vector.extract_strided_slice %40 {offsets = [0, 2, 0], sizes = [10, 8, 64], strides = [1, 1, 1]} : vector<10x10x64xf32> to vector<10x8x64xf32>
    %44 = tpu.concatenate %41, %42, %43 in 2 : vector<10x8x64xf32>, vector<10x8x64xf32>, vector<10x8x64xf32> -> vector<10x8x192xf32>
    %45 = vector.extract_strided_slice %44 {offsets = [0, 0, 0], sizes = [8, 8, 192], strides = [1, 1, 1]} : vector<10x8x192xf32> to vector<8x8x192xf32>
    %c0_42 = arith.constant 0 : index
    %c0_43 = arith.constant 0 : index
    %c0_44 = arith.constant 0 : index
    %46 = vector.load %arg9[%c0_42, %c0_43, %c0_44] : memref<3x192x128xf32, #tpu.memory_space<vmem>>, vector<1x192x128xf32>
    %47 = vector.shape_cast %46 : vector<1x192x128xf32> to vector<192x128xf32>
    %cst_45 = arith.constant dense<0.000000e+00> : vector<8x8x128xf32>
    %48 = tpu.matmul %45, %47, %cst_45 {dimension_numbers = #tpu.dot_dimension_numbers<[2], [0], [0, 1], [1], [0, 0, 0, 1, 1, 1], [], []>} : vector<8x8x192xf32>, vector<192x128xf32>, vector<8x8x128xf32> -> vector<8x8x128xf32>
    %49 = vector.extract_strided_slice %44 {offsets = [1, 0, 0], sizes = [8, 8, 192], strides = [1, 1, 1]} : vector<10x8x192xf32> to vector<8x8x192xf32>
    %c1_46 = arith.constant 1 : index
    %c0_47 = arith.constant 0 : index
    %c0_48 = arith.constant 0 : index
    %50 = vector.load %arg9[%c1_46, %c0_47, %c0_48] : memref<3x192x128xf32, #tpu.memory_space<vmem>>, vector<1x192x128xf32>
    %51 = vector.shape_cast %50 : vector<1x192x128xf32> to vector<192x128xf32>
    %cst_49 = arith.constant dense<0.000000e+00> : vector<8x8x128xf32>
    %52 = tpu.matmul %49, %51, %cst_49 {dimension_numbers = #tpu.dot_dimension_numbers<[2], [0], [0, 1], [1], [0, 0, 0, 1, 1, 1], [], []>} : vector<8x8x192xf32>, vector<192x128xf32>, vector<8x8x128xf32> -> vector<8x8x128xf32>
    %53 = arith.addf %48, %52 : vector<8x8x128xf32>
    %54 = vector.extract_strided_slice %44 {offsets = [2, 0, 0], sizes = [8, 8, 192], strides = [1, 1, 1]} : vector<10x8x192xf32> to vector<8x8x192xf32>
    %c2_50 = arith.constant 2 : index
    %c0_51 = arith.constant 0 : index
    %c0_52 = arith.constant 0 : index
    %55 = vector.load %arg9[%c2_50, %c0_51, %c0_52] : memref<3x192x128xf32, #tpu.memory_space<vmem>>, vector<1x192x128xf32>
    %56 = vector.shape_cast %55 : vector<1x192x128xf32> to vector<192x128xf32>
    %cst_53 = arith.constant dense<0.000000e+00> : vector<8x8x128xf32>
    %57 = tpu.matmul %54, %56, %cst_53 {dimension_numbers = #tpu.dot_dimension_numbers<[2], [0], [0, 1], [1], [0, 0, 0, 1, 1, 1], [], []>} : vector<8x8x192xf32>, vector<192x128xf32>, vector<8x8x128xf32> -> vector<8x8x128xf32>
    %58 = arith.addf %53, %57 : vector<8x8x128xf32>
    %59 = vector.shape_cast %39 : vector<1x128xf32> to vector<1x1x128xf32>
    %60 = vector.broadcast %59 : vector<1x1x128xf32> to vector<8x8x128xf32>
    %61 = arith.addf %58, %60 : vector<8x8x128xf32>
    %c0_54 = arith.constant 0 : index
    %c0_55 = arith.constant 0 : index
    %c0_56 = arith.constant 0 : index
    %c0_57 = arith.constant 0 : index
    %62 = vector.load %arg2[%c0_54, %c0_55, %c0_56, %c0_57] : memref<1x8x8x128xf32, #tpu.memory_space<vmem>>, vector<1x8x8x128xf32>
    %63 = vector.shape_cast %62 : vector<1x8x8x128xf32> to vector<8x8x128xf32>
    %64 = arith.addf %61, %63 : vector<8x8x128xf32>
    %c0_58 = arith.constant 0 : index
    %c0_59 = arith.constant 0 : index
    %c0_60 = arith.constant 0 : index
    %c0_61 = arith.constant 0 : index
    %65 = vector.load %arg11[%c0_58, %c0_59, %c0_60, %c0_61] : memref<1x8x8x128xf32, #tpu.memory_space<vmem>>, vector<1x8x8x128xf32>
    %66 = vector.shape_cast %65 : vector<1x8x8x128xf32> to vector<8x8x128xf32>
    %67 = vector.shape_cast %64 : vector<8x8x128xf32> to vector<1x8x8x128xf32>
    tpu.vector_store %arg11[%c0_58, %c0_59, %c0_60, %c0_61], %67 {strides = array<i32>} : memref<1x8x8x128xf32, #tpu.memory_space<vmem>>, vector<1x8x8x128xf32>,
    return
  }
  func.func @transform_0(%arg0: i32) -> (i32, i32, i32, i32) {
    %c0_i32 = arith.constant 0 : i32
    %c0_i32_0 = arith.constant 0 : i32
    %c0_i32_1 = arith.constant 0 : i32
    %c0_i32_2 = arith.constant 0 : i32
    return %arg0, %c0_i32, %c0_i32_0, %c0_i32_1 : i32, i32, i32, i32
  }
  func.func @transform_1(%arg0: i32) -> (i32, i32, i32, i32) {
    %c0_i32 = arith.constant 0 : i32
    %c0_i32_0 = arith.constant 0 : i32
    %c0_i32_1 = arith.constant 0 : i32
    %c0_i32_2 = arith.constant 0 : i32
    return %arg0, %c0_i32, %c0_i32_0, %c0_i32_1 : i32, i32, i32, i32
  }
  func.func @transform_2(%arg0: i32) -> (i32, i32, i32) {
    %c0_i32 = arith.constant 0 : i32
    %c0_i32_0 = arith.constant 0 : i32
    %c0_i32_1 = arith.constant 0 : i32
    %c0_i32_2 = arith.constant 0 : i32
    return %c0_i32, %c0_i32_0, %c0_i32_1 : i32, i32, i32
  }
  func.func @transform_3(%arg0: i32) -> (i32, i32) {
    %c0_i32 = arith.constant 0 : i32
    %c0_i32_0 = arith.constant 0 : i32
    %c0_i32_1 = arith.constant 0 : i32
    return %c0_i32, %c0_i32_0 : i32, i32
  }
  func.func @transform_4(%arg0: i32) -> (i32, i32, i32) {
    %c0_i32 = arith.constant 0 : i32
    %c0_i32_0 = arith.constant 0 : i32
    %c0_i32_1 = arith.constant 0 : i32
    %c0_i32_2 = arith.constant 0 : i32
    return %c0_i32, %c0_i32_0, %c0_i32_1 : i32, i32, i32
  }
  func.func @transform_5(%arg0: i32) -> (i32, i32) {
    %c0_i32 = arith.constant 0 : i32
    %c0_i32_0 = arith.constant 0 : i32
    %c0_i32_1 = arith.constant 0 : i32
    return %c0_i32, %c0_i32_0 : i32, i32
  }
  func.func @transform_6(%arg0: i32) -> (i32, i32, i32) {
    %c0_i32 = arith.constant 0 : i32
    %c0_i32_0 = arith.constant 0 : i32
    %c0_i32_1 = arith.constant 0 : i32
    %c0_i32_2 = arith.constant 0 : i32
    return %c0_i32, %c0_i32_0, %c0_i32_1 : i32, i32, i32
  }
  func.func @transform_7(%arg0: i32) -> (i32, i32) {
    %c0_i32 = arith.constant 0 : i32
    %c0_i32_0 = arith.constant 0 : i32
    %c0_i32_1 = arith.constant 0 : i32
    return %c0_i32, %c0_i32_0 : i32, i32
  }
  func.func @transform_8(%arg0: i32) -> (i32, i32, i32) {
    %c0_i32 = arith.constant 0 : i32
    %c0_i32_0 = arith.constant 0 : i32
    %c0_i32_1 = arith.constant 0 : i32
    %c0_i32_2 = arith.constant 0 : i32
    return %c0_i32, %c0_i32_0, %c0_i32_1 : i32, i32, i32
  }
  func.func @transform_9(%arg0: i32) -> (i32, i32) {
    %c0_i32 = arith.constant 0 : i32
    %c0_i32_0 = arith.constant 0 : i32
    %c0_i32_1 = arith.constant 0 : i32
    return %c0_i32, %c0_i32_0 : i32, i32
  }
  func.func @transform_10(%arg0: i32) -> (i32, i32, i32, i32) {
    %c0_i32 = arith.constant 0 : i32
    %c0_i32_0 = arith.constant 0 : i32
    %c0_i32_1 = arith.constant 0 : i32
    %c0_i32_2 = arith.constant 0 : i32
    return %arg0, %c0_i32, %c0_i32_0, %c0_i32_1 : i32, i32, i32, i32
  }
}

</mosaic_0001>

<bundles_post_ra>
// kernel: reconstruct_forward.1
= control target key start
LH: loop header
LB: loop body
LE: loop exit
PB: predicated region body
PF: predicated region fallthrough
CT: control target
= control target key end

     0   :  { %s3310_s13 = smov 0   ;;  %s5627_s0 = inlined_call_operand.vmem [shape: f32[2,8,8,64], index: 0, kind: input, shape index: {}]   ;;  %s5628_s1 = inlined_call_operand.vmem [shape: f32[2,8,8,128], index: 1, kind: input, shape index: {}]   ;;  %s5629_s2 = inlined_call_operand.vmem [shape: f32[3,192,64], index: 2, kind: input, shape index: {}]   ;;  %s5630_s3 = inlined_call_operand.vmem [shape: f32[1,64], index: 3, kind: input, shape index: {}]   ;;  %s5631_s4 = inlined_call_operand.vmem [shape: f32[3,192,64], index: 4, kind: input, shape index: {}]   ;;  %s5632_s5 = inlined_call_operand.vmem [shape: f32[1,64], index: 5, kind: input, shape index: {}]   ;;  %s5633_s6 = inlined_call_operand.vmem [shape: f32[3,192,64], index: 6, kind: input, shape index: {}]   ;;  %s5634_s7 = inlined_call_operand.vmem [shape: f32[1,64], index: 7, kind: input, shape index: {}]   ;;  %s5635_s8 = inlined_call_operand.vmem [shape: f32[3,192,128], index: 8, kind: input, shape index: {}]   ;;  %s5636_s9 = inlined_call_operand.vmem [shape: f32[1,128], index: 9, kind: input, shape index: {}]   ;;  %s5637_s10 = inlined_call_operand.vmem [shape: f32[2,8,8,128], index: 10, kind: output, shape index: {}]  }
   0x1 LB: > { %s2907_s14 = sadd.s32 4294967295, %s3245_s13   ;;  %p2911_p0 = scmp.ge.s32.totalorder %s3245_s13, 1  ;;  %s3245_s13 = sphi %s3310_s13, %s20_s13  }
   0x2   : > { %p322_p1 = scmp.lt.s32.totalorder %s3245_s13, 3 }
   0x4   : > { %p323_p2 = pnand %p2911_p0, %p322_p1 }
   0x5   : > { %p3325_p3 = scmp.lt.s32.totalorder (!%p323_p2), %s2907_s14, 1  ;;  %s3439_s30 = smov (!%p323_p2), 0  }
   0x6   : > { %326 = sbr.rel (%p323_p2) target bundleno = 1573 (0x625), region = 60 }
   0xb   : > { %vm382_vm0 = vcmask 523264   ;;  %vm384_vm1 = vcmask 517120   ;;  %v3321_v0 = vld [vmem:[%s5630_s3] ss:$0 sm:$0xff]  ;;  %v3251_v1 = vmov 0.0   ;;  %s5640_s14 = smov (!%p3325_p3, %s2907_s14), 1 }
   0xc   : > { %386 = vst.msk [vmem:[#allocation2 + $0x10] sm:$0xff] %vm382_vm0, %v3251_v1  ;;  %383 = vst.msk [vmem:[#allocation2] sm:$0xff] %vm382_vm0, %v3251_v1  ;;  %v3412_v2 = vld [vmem:[%s5632_s5] ss:$0 sm:$0xff]  ;;  %s3212_s20 = sshll.u32 %s5640_s14, 6 }
   0xd   : > { %388 = vst.msk [vmem:[#allocation2 + $0x20] sm:$0xff] %vm382_vm0, %v3251_v1  ;;  %390 = vst.msk [vmem:[#allocation2 + $0x30] sm:$0xff] %vm382_vm0, %v3251_v1  ;;  %s369_s23 = scalar_lea.vmem %s5627_s0, %s3212_s20  ;;  %s3424_s26 = scalar_lea.vmem %s5628_s1, %s3212_s20 }
   0xe   : > { %392 = vst.msk [vmem:[#allocation2 + $0x40] sm:$0xff] %vm382_vm0, %v3251_v1  ;;  %394 = vst.msk [vmem:[#allocation2 + $0x50] sm:$0xff] %vm382_vm0, %v3251_v1  ;;  %s3429_s29 = scalar_lea.vmem %s5637_s10, %s3212_s20  ;;  %v424_v3 = vld [vmem:[%s369_s23] sm:$0xff]  ;;  %v425_v4 = vld [vmem:[%s369_s23 + $0x8] sm:$0xff] }
   0xf   : > { %396 = vst.msk [vmem:[#allocation2 + $0x60] sm:$0xff] %vm382_vm0, %v3251_v1  ;;  %398 = vst.msk [vmem:[#allocation2 + $0x70] sm:$0xff] %vm382_vm0, %v3251_v1  ;;  %v426_v5 = vld [vmem:[%s369_s23 + $0x10] sm:$0xff]  ;;  %v427_v6 = vld [vmem:[%s369_s23 + $0x18] sm:$0xff] }
  0x10   : > { %400 = vst.msk [vmem:[#allocation2 + $0x80] sm:$0xff] %vm382_vm0, %v3251_v1  ;;  %402 = vst.msk [vmem:[#allocation2 + $0x90] sm:$0xff] %vm382_vm0, %v3251_v1  ;;  %v428_v7 = vld [vmem:[%s369_s23 + $0x20] sm:$0xff]  ;;  %v429_v8 = vld [vmem:[%s369_s23 + $0x28] sm:$0xff] }
  0x11   : > { %404 = vst.msk [vmem:[#allocation3] sm:$0xff] %vm382_vm0, %v3251_v1  ;;  %406 = vst.msk [vmem:[#allocation3 + $0x10] sm:$0xff] %vm382_vm0, %v3251_v1  ;;  %v430_v9 = vld [vmem:[%s369_s23 + $0x30] sm:$0xff]  ;;  %v431_v10 = vld [vmem:[%s369_s23 + $0x38] sm:$0xff] }
  0x12   : > { %408 = vst.msk [vmem:[#allocation3 + $0x20] sm:$0xff] %vm382_vm0, %v3251_v1  ;;  %410 = vst.msk [vmem:[#allocation3 + $0x30] sm:$0xff] %vm382_vm0, %v3251_v1 }
  0x13   : > { %412 = vst.msk [vmem:[#allocation3 + $0x40] sm:$0xff] %vm382_vm0, %v3251_v1  ;;  %414 = vst.msk [vmem:[#allocation3 + $0x50] sm:$0xff] %vm382_vm0, %v3251_v1 }
  0x14   : > { %416 = vst.msk [vmem:[#allocation3 + $0x60] sm:$0xff] %vm382_vm0, %v3251_v1  ;;  %418 = vst.msk [vmem:[#allocation3 + $0x70] sm:$0xff] %vm382_vm0, %v3251_v1 }
  0x15   : > { %420 = vst.msk [vmem:[#allocation3 + $0x80] sm:$0xff] %vm382_vm0, %v3251_v1  ;;  %422 = vst.msk [vmem:[#allocation3 + $0x90] sm:$0xff] %vm382_vm0, %v3251_v1 }
  0x16   : > { %387 = vst.msk [vmem:[#allocation2 + $0x18] sm:$0x3] %vm384_vm1, %v3251_v1  ;;  %385 = vst.msk [vmem:[#allocation2 + $0x8] sm:$0x3] %vm384_vm1, %v3251_v1 }
  0x17   : > { %389 = vst.msk [vmem:[#allocation2 + $0x28] sm:$0x3] %vm384_vm1, %v3251_v1  ;;  %391 = vst.msk [vmem:[#allocation2 + $0x38] sm:$0x3] %vm384_vm1, %v3251_v1 }
  0x18   : > { %393 = vst.msk [vmem:[#allocation2 + $0x48] sm:$0x3] %vm384_vm1, %v3251_v1  ;;  %395 = vst.msk [vmem:[#allocation2 + $0x58] sm:$0x3] %vm384_vm1, %v3251_v1 }
  0x19   : > { %397 = vst.msk [vmem:[#allocation2 + $0x68] sm:$0x3] %vm384_vm1, %v3251_v1  ;;  %399 = vst.msk [vmem:[#allocation2 + $0x78] sm:$0x3] %vm384_vm1, %v3251_v1 }
  0x1a   : > { %401 = vst.msk [vmem:[#allocation2 + $0x88] sm:$0x3] %vm384_vm1, %v3251_v1  ;;  %403 = vst.msk [vmem:[#allocation2 + $0x98] sm:$0x3] %vm384_vm1, %v3251_v1 }
  0x1b   : > { %405 = vst.msk [vmem:[#allocation3 + $0x8] sm:$0x3] %vm384_vm1, %v3251_v1  ;;  %407 = vst.msk [vmem:[#allocation3 + $0x18] sm:$0x3] %vm384_vm1, %v3251_v1 }
  0x1c   : > { %409 = vst.msk [vmem:[#allocation3 + $0x28] sm:$0x3] %vm384_vm1, %v3251_v1  ;;  %411 = vst.msk [vmem:[#allocation3 + $0x38] sm:$0x3] %vm384_vm1, %v3251_v1 }
  0x1d   : > { %413 = vst.msk [vmem:[#allocation3 + $0x48] sm:$0x3] %vm384_vm1, %v3251_v1  ;;  %415 = vst.msk [vmem:[#allocation3 + $0x58] sm:$0x3] %vm384_vm1, %v3251_v1 }
  0x1e   : > { %417 = vst.msk [vmem:[#allocation3 + $0x68] sm:$0x3] %vm384_vm1, %v3251_v1  ;;  %419 = vst.msk [vmem:[#allocation3 + $0x78] sm:$0x3] %vm384_vm1, %v3251_v1 }
  0x1f   : > { %421 = vst.msk [vmem:[#allocation3 + $0x88] sm:$0x3] %vm384_vm1, %v3251_v1  ;;  %423 = vst.msk [vmem:[#allocation3 + $0x98] sm:$0x3] %vm384_vm1, %v3251_v1 }
  0x20   : > { %433 = vst.msk [vmem:[#allocation2 + $0x11] sm:$0xff] %vm382_vm0, %v424_v3  ;;  %434 = vst.msk [vmem:[#allocation2 + $0x21] sm:$0xff] %vm382_vm0, %v425_v4 }
  0x21   : > { %435 = vst.msk [vmem:[#allocation2 + $0x31] sm:$0xff] %vm382_vm0, %v426_v5  ;;  %436 = vst.msk [vmem:[#allocation2 + $0x41] sm:$0xff] %vm382_vm0, %v427_v6 }
  0x22   : > { %437 = vst.msk [vmem:[#allocation2 + $0x51] sm:$0xff] %vm382_vm0, %v428_v7  ;;  %438 = vst.msk [vmem:[#allocation2 + $0x61] sm:$0xff] %vm382_vm0, %v429_v8 }
  0x23   : > { %439 = vst.msk [vmem:[#allocation2 + $0x71] sm:$0xff] %vm382_vm0, %v430_v9  ;;  %440 = vst.msk [vmem:[#allocation2 + $0x81] sm:$0xff] %vm382_vm0, %v431_v10 }
  0x24 LB: >> { %vm487_vm2 = vcmask 1046528   ;;  %s3252_s11 = smov 64   ;;  %v2933_v38 = vld [vmem:[%s5629_s2 + $0x138] sm:$0xff]  ;;  %v3494_v42 = vld [vmem:[#allocation2] sm:$0xff]  ;;  %v3496_v43 = vld [vmem:[#allocation2 + $0x8] sm:$0x3]  ;;  %s3249_s30 = sphi %s3439_s30, %s446_s30  }
  0x25   : >> { %v3253_v47 = vmov 0.0   ;;  %v2932_v50 = vld [vmem:[%s5629_s2 + $0x130] sm:$0xff]  ;;  %v604_v51 = vld [vmem:[%s5629_s2 + $0x78] sm:$0xff]  ;;  %v488_v52 = vrot.slane %v3494_v42, 1  ;;  %v489_v53 = vrot.slane %v3496_v43, 1  ;;  %v2931_v54 = vld [vmem:[%s5629_s2 + $0x128] sm:$0xff] }
  0x26   : >> { %654 = vmatprep.subr.mxu0 %v3253_v47  ;;  %761 = vmatprep.subr.mxu1 %v3253_v47  ;;  %v603_v55 = vld [vmem:[%s5629_s2 + $0x70] sm:$0xff]  ;;  %v3531_v61 = vld [vmem:[#allocation2 + $0x98] sm:$0x3]  ;;  %v2930_v62 = vld [vmem:[%s5629_s2 + $0x120] sm:$0xff]  ;;  %vm548_vm3 = vcmask 1045504   ;;  %s446_s30 = sadd.s32 1, %s3249_s30  }
  0x27   : >> { %v3444_v11 = vld [vmem:[#allocation2 + $0x10] sm:$0xff]  ;;  %v3446_v12 = vld [vmem:[#allocation2 + $0x18] sm:$0x3]  ;;  %v3448_v13 = vld [vmem:[#allocation2 + $0x20] sm:$0xff]  ;;  %655 = vmatpush1.msra.mxu0 %v2933_v38  ;;  %762 = vmatpush1.msra.mxu1 %v604_v51  ;;  %v490_v3 = vsel %vm487_vm2, %v488_v52, %v489_v53  ;;  %v516_v6 = vrot.slane %v3531_v61, 1  ;;  %p443_p4 = scmp.ge.s32.totalorder %s446_s30, 10  }
  0x28   : >> { %v491_v14 = vrot.slane %v3444_v11, 1  ;;  %v492_v15 = vrot.slane %v3446_v12, 1  ;;  %v3452_v16 = vld [vmem:[#allocation2 + $0x28] sm:$0x3]  ;;  %v494_v17 = vrot.slane %v3448_v13, 1  ;;  %v3467_v25 = vld [vmem:[#allocation2 + $0x30] sm:$0xff]  ;;  %656 = vmatprep.subr.mxu0 %v3253_v47  ;;  %763 = vmatprep.subr.mxu1 %v3253_v47 }
  0x29   : >> { %v3455_v18 = vld [vmem:[#allocation2 + $0x50] sm:$0xff]  ;;  %v495_v19 = vrot.slane %v3452_v16, 1  ;;  %v3458_v20 = vld [vmem:[#allocation2 + $0x58] sm:$0x3]  ;;  %v497_v29 = vrot.slane %v3467_v25, 1  ;;  %v3475_v31 = vld [vmem:[#allocation2 + $0x40] sm:$0xff]  ;;  %657 = vmatpush1.msra.mxu0 %v2932_v50  ;;  %764 = vmatpush1.msra.mxu1 %v603_v55 }
  0x2a   : >> { %v493_v21 = vsel %vm487_vm2, %v491_v14, %v492_v15  ;;  %v3461_v22 = vld [vmem:[#allocation2 + $0x70] sm:$0xff]  ;;  %v503_v23 = vrot.slane %v3455_v18, 1  ;;  %v3465_v24 = vld [vmem:[#allocation2 + $0x78] sm:$0x3]  ;;  %v504_v28 = vrot.slane %v3458_v20, 1  ;;  %v500_v33 = vrot.slane %v3475_v31, 1  ;;  %658 = vmatprep.subr.mxu0 %v3253_v47  ;;  %765 = vmatprep.subr.mxu1 %v3253_v47 }
  0x2b   : >> { %520 = vrot.lane.b32.xlu0 %v493_v21, %s3252_s11  ;;  %v3469_v26 = vld [vmem:[#allocation2 + $0x38] sm:$0x3]  ;;  %v496_v27 = vsel %vm487_vm2, %v494_v17, %v495_v19  ;;  %v3477_v32 = vld [vmem:[#allocation2 + $0x48] sm:$0x3]  ;;  %v3481_v35 = vld [vmem:[#allocation2 + $0x60] sm:$0xff]  ;;  %v509_v39 = vrot.slane %v3461_v22, 1  ;;  %659 = vmatpush1.msra.mxu0 %v2931_v54 }
  0x2c   : >> { %v498_v30 = vrot.slane %v3469_v26, 1  ;;  %v501_v34 = vrot.slane %v3477_v32, 1  ;;  %v3483_v36 = vld [vmem:[#allocation2 + $0x68] sm:$0x3]  ;;  %v510_v40 = vrot.slane %v3465_v24, 1  ;;  %v505_v41 = vsel %vm487_vm2, %v503_v23, %v504_v28  ;;  %v3503_v48 = vld [vmem:[#allocation2 + $0x80] sm:$0xff]  ;;  %660 = vmatprep.subr.mxu0 %v3253_v47 }
  0x2d   : >> { %v506_v45 = vrot.slane %v3481_v35, 1  ;;  %v507_v46 = vrot.slane %v3483_v36, 1  ;;  %v3505_v49 = vld [vmem:[#allocation2 + $0x88] sm:$0x3]  ;;  %v512_v58 = vrot.slane %v3503_v48, 1  ;;  %v3529_v60 = vld [vmem:[#allocation2 + $0x90] sm:$0xff]  ;;  %661 = vmatpush1.msra.mxu0 %v2930_v62 }
  0x2e   : >> { %v499_v37 = vsel %vm487_vm2, %v497_v29, %v498_v30  ;;  %v502_v44 = vsel %vm487_vm2, %v500_v33, %v501_v34  ;;  %v511_v56 = vsel %vm487_vm2, %v509_v39, %v510_v40  ;;  %v513_v59 = vrot.slane %v3505_v49, 1  ;;  %v602_v63 = vld [vmem:[%s5629_s2 + $0x68] sm:$0xff]  ;;  %v2929_v7 = vld [vmem:[%s5629_s2 + $0x118] sm:$0xff]  ;;  %v601_v8 = vld [vmem:[%s5629_s2 + $0x60] sm:$0xff]  ;;  %662 = vmatprep.subr.mxu0 %v3253_v47  ;;  %s3254_s30 = smov (%p443_p4), 64  }
  0x2f   : >> { %522 = vrot.lane.b32.xlu0 %v496_v27, %s3252_s11  ;;  %524 = vrot.lane.b32.xlu1 %v499_v37, %s3252_s11  ;;  %v508_v57 = vsel %vm487_vm2, %v506_v45, %v507_v46  ;;  %v515_v5 = vrot.slane %v3529_v60, 1  ;;  %v2928_v9 = vld [vmem:[%s5629_s2 + $0x110] sm:$0xff]  ;;  %v600_v10 = vld [vmem:[%s5629_s2 + $0x58] sm:$0xff]  ;;  %v552_v46 = vrot.slane %v3444_v11, 2  ;;  %v553_v50 = vrot.slane %v3446_v12, 2 }
  0x30   : >> { %v514_v4 = vsel %vm487_vm2, %v512_v58, %v513_v59  ;;  %766 = vmatpush1.msra.mxu1 %v602_v63  ;;  %663 = vmatpush1.msra.mxu0 %v2929_v7  ;;  %v2927_v15 = vld [vmem:[%s5629_s2 + $0x108] sm:$0xff]  ;;  %v599_v17 = vld [vmem:[%s5629_s2 + $0x50] sm:$0xff]  ;;  %v2926_v19 = vld [vmem:[%s5629_s2 + $0x100] sm:$0xff]  ;;  %v549_v7 = vrot.slane %v3494_v42, 2 }
  0x31   : >> { %767 = vmatprep.subr.mxu1 %v3253_v47  ;;  %v517_v14 = vsel %vm487_vm2, %v515_v5, %v516_v6  ;;  %664 = vmatprep.subr.mxu0 %v3253_v47  ;;  %v598_v21 = vld [vmem:[%s5629_s2 + $0x48] sm:$0xff]  ;;  %v2925_v23 = vld [vmem:[%s5629_s2 + $0xf8] sm:$0xff]  ;;  %v597_v27 = vld [vmem:[%s5629_s2 + $0x40] sm:$0xff]  ;;  %v3654_v53 = vsel %vm548_vm3, %v552_v46, %v553_v50  ;;  %v564_v46 = vrot.slane %v3455_v18, 2  ;;  %v565_v50 = vrot.slane %v3458_v20, 2 }
  0x32   : >> { %768 = vmatpush1.msra.mxu1 %v601_v8  ;;  %665 = vmatpush1.msra.mxu0 %v2928_v9  ;;  %v2924_v28 = vld [vmem:[%s5629_s2 + $0xf0] sm:$0xff]  ;;  %v596_v29 = vld [vmem:[%s5629_s2 + $0x38] sm:$0xff]  ;;  %v2923_v30 = vld [vmem:[%s5629_s2 + $0xe8] sm:$0xff]  ;;  %v550_v8 = vrot.slane %v3496_v43, 2 }
  0x33   : >> { %528 = vrot.lane.b32.xlu0 %v505_v41, %s3252_s11  ;;  %526 = vrot.lane.b32.xlu1 %v502_v44, %s3252_s11  ;;  %v595_v33 = vld [vmem:[%s5629_s2 + $0x30] sm:$0xff]  ;;  %v2922_v34 = vld [vmem:[%s5629_s2 + $0xe0] sm:$0xff] }
  0x34   : >> { %769 = vmatprep.subr.mxu1 %v3253_v47  ;;  %666 = vmatprep.subr.mxu0 %v3253_v47  ;;  %v594_v37 = vld [vmem:[%s5629_s2 + $0x28] sm:$0xff]  ;;  %v2921_v38 = vld [vmem:[%s5629_s2 + $0xd8] sm:$0xff]  ;;  %v593_v39 = vld [vmem:[%s5629_s2 + $0x20] sm:$0xff] }
  0x35   : >> { %770 = vmatpush1.msra.mxu1 %v600_v10  ;;  %667 = vmatpush1.msra.mxu0 %v2927_v15  ;;  %v2920_v40 = vld [vmem:[%s5629_s2 + $0xd0] sm:$0xff]  ;;  %v592_v41 = vld [vmem:[%s5629_s2 + $0x18] sm:$0xff]  ;;  %v2919_v44 = vld [vmem:[%s5629_s2 + $0xc8] sm:$0xff] }
  0x36   : >> { %771 = vmatprep.subr.mxu1 %v3253_v47  ;;  %668 = vmatprep.subr.mxu0 %v3253_v47  ;;  %v591_v45 = vld [vmem:[%s5629_s2 + $0x10] sm:$0xff]  ;;  %v2918_v51 = vld [vmem:[%s5629_s2 + $0xc0] sm:$0xff]  ;;  %v590_v52 = vld [vmem:[%s5629_s2 + $0x8] sm:$0xff] }
  0x37   : >> { %532 = vrot.lane.b32.xlu0 %v511_v56, %s3252_s11  ;;  %530 = vrot.lane.b32.xlu1 %v508_v57, %s3252_s11  ;;  %v2941_v12 = vld [vmem:[%s5629_s2 + $0x178] sm:$0xff]  ;;  %v2940_v54 = vld [vmem:[%s5629_s2 + $0x170] sm:$0xff] }
  0x38   : >> { %772 = vmatpush1.msra.mxu1 %v599_v17  ;;  %669 = vmatpush1.msra.mxu0 %v2926_v19  ;;  %v589_v55 = vld [vmem:[%s5629_s2] sm:$0xff]  ;;  %v2939_v56 = vld [vmem:[%s5629_s2 + $0x168] sm:$0xff]  ;;  %v612_v57 = vld [vmem:[%s5629_s2 + $0xb8] sm:$0xff]  ;;  %v555_v17 = vrot.slane %v3448_v13, 2  ;;  %v556_v19 = vrot.slane %v3452_v16, 2 }
  0x39   : >> { %773 = vmatprep.subr.mxu1 %v3253_v47  ;;  %670 = vmatprep.subr.mxu0 %v3253_v47  ;;  %v2938_v58 = vld [vmem:[%s5629_s2 + $0x160] sm:$0xff]  ;;  %v611_v59 = vld [vmem:[%s5629_s2 + $0xb0] sm:$0xff]  ;;  %v2937_v62 = vld [vmem:[%s5629_s2 + $0x158] sm:$0xff] }
  0x3a   : >> { %774 = vmatpush1.msra.mxu1 %v598_v21  ;;  %671 = vmatpush1.msra.mxu0 %v2925_v23  ;;  %v610_v63 = vld [vmem:[%s5629_s2 + $0xa8] sm:$0xff]  ;;  %v608_v6 = vld [vmem:[%s5629_s2 + $0x98] sm:$0xff]  ;;  %v2934_v9 = vld [vmem:[%s5629_s2 + $0x140] sm:$0xff] }
  0x3b   : >> { %518 = vrot.lane.b32.xlu0 %v490_v3, %s3252_s11  ;;  %534 = vrot.lane.b32.xlu1 %v514_v4, %s3252_s11  ;;  %v2936_v3 = vld [vmem:[%s5629_s2 + $0x150] sm:$0xff]  ;;  %v609_v4 = vld [vmem:[%s5629_s2 + $0xa0] sm:$0xff] }
  0x3c   : >> { %775 = vmatprep.subr.mxu1 %v3253_v47  ;;  %672 = vmatprep.subr.mxu0 %v3253_v47  ;;  %v2935_v5 = vld [vmem:[%s5629_s2 + $0x148] sm:$0xff]  ;;  %v607_v10 = vld [vmem:[%s5629_s2 + $0x90] sm:$0xff]  ;;  %v605_v15 = vld [vmem:[%s5629_s2 + $0x80] sm:$0xff] }
  0x3d   : >> { %776 = vmatpush1.msra.mxu1 %v597_v27  ;;  %673 = vmatpush1.msra.mxu0 %v2924_v28  ;;  %v606_v43 = vld [vmem:[%s5629_s2 + $0x88] sm:$0xff]  ;;  %v2973_v23 = vld [vmem:[%s5629_s2 + $0x1f8] sm:$0xff]  ;;  %v3735_v27 = vsel %vm548_vm3, %v555_v17, %v556_v19  ;;  %v558_v28 = vrot.slane %v3467_v25, 2  ;;  %v2972_v16 = vld [vmem:[%s5629_s2 + $0x1f0] sm:$0xff] }
  0x3e   : >> { %777 = vmatprep.subr.mxu1 %v3253_v47  ;;  %674 = vmatprep.subr.mxu0 %v3253_v47  ;;  %v2978_v17 = vld [vmem:[%s5629_s2 + $0x220] sm:$0xff]  ;;  %v2977_v19 = vld [vmem:[%s5629_s2 + $0x218] sm:$0xff] }
  0x3f   : >> { %536 = vrot.lane.b32.xlu1 %v517_v14, %s3252_s11  ;;  %778 = vmatpush1.msra.mxu1 %v596_v29  ;;  %v551_v14 = vsel %vm548_vm3, %v549_v7, %v550_v8  ;;  %v559_v29 = vrot.slane %v3469_v26, 2  ;;  %v2971_v26 = vld [vmem:[%s5629_s2 + $0x1e8] sm:$0xff] }
  0x40   : >> { %675 = vmatpush1.msra.mxu0 %v2923_v30  ;;  %779 = vmatprep.subr.mxu1 %v3253_v47 }
  0x41   : >> { %676 = vmatprep.subr.mxu0 %v3253_v47  ;;  %780 = vmatpush1.msra.mxu1 %v595_v33 }
  0x42   : >> { %677 = vmatpush1.msra.mxu0 %v2922_v34  ;;  %781 = vmatprep.subr.mxu1 %v3253_v47 }
  0x43   : >> { %678 = vmatprep.subr.mxu0 %v3253_v47  ;;  %782 = vmatpush1.msra.mxu1 %v594_v37  ;;  %v561_v37 = vrot.slane %v3475_v31, 2 }
  0x44   : >> { %679 = vmatpush1.msra.mxu0 %v2921_v38  ;;  %783 = vmatprep.subr.mxu1 %v3253_v47  ;;  %v562_v38 = vrot.slane %v3477_v32, 2  ;;  %v2969_v32 = vld [vmem:[%s5629_s2 + $0x1d8] sm:$0xff] }
  0x45   : >> { %680 = vmatprep.subr.mxu0 %v3253_v47  ;;  %784 = vmatpush1.msra.mxu1 %v593_v39 }
  0x46   : >> { %681 = vmatpush1.msra.mxu0 %v2920_v40  ;;  %785 = vmatprep.subr.mxu1 %v3253_v47  ;;  %v2970_v40 = vld [vmem:[%s5629_s2 + $0x1e0] sm:$0xff] }
  0x47   : >> { %682 = vmatprep.subr.mxu0 %v3253_v47  ;;  %786 = vmatpush1.msra.mxu1 %v592_v41 }
  0x48   : >> { %683 = vmatpush1.msra.mxu0 %v2919_v44  ;;  %787 = vmatprep.subr.mxu1 %v3253_v47 }
  0x49   : >> { %684 = vmatprep.subr.mxu0 %v3253_v47  ;;  %788 = vmatpush1.msra.mxu1 %v591_v45  ;;  %v3778_v45 = vsel %vm548_vm3, %v561_v37, %v562_v38  ;;  %v1192_v37 = vld [vmem:[%s5631_s4 + $0x78] sm:$0xff]  ;;  %v3001_v38 = vld [vmem:[%s5631_s4 + $0x110] sm:$0xff] }
  0x4a   : >> { %685 = vmatpush1.msra.mxu0 %v2918_v51  ;;  %789 = vmatprep.subr.mxu1 %v3253_v47 }
  0x4b   : >> { %702 = vmatprep.subr.mxu0 %v3253_v47  ;;  %790 = vmatpush1.msra.mxu1 %v590_v52  ;;  %v2967_v52 = vld [vmem:[%s5629_s2 + $0x1c8] sm:$0xff] }
  0x4c   : >> { %703 = vmatpush2.msra.mxu0 %v2941_v12  ;;  %791 = vmatprep.subr.mxu1 %v3253_v47  ;;  %v3798_v12 = vsel %vm548_vm3, %v564_v46, %v565_v50  ;;  %v1187_v46 = vld [vmem:[%s5631_s4 + $0x50] sm:$0xff] }
  0x4d   : >> { %704 = vmatprep.subr.mxu0 %v3253_v47  ;;  %2942 = vmatprep.mubr.msk.f32.mxu0 %vm382_vm0, %v3654_v53  ;;  %v2997_v50 = vld [vmem:[%s5631_s4 + $0xf0] sm:$0xff] }
  0x4e   : >> { %705 = vmatpush2.msra.mxu0 %v2940_v54  ;;  %792 = vmatpush1.msra.mxu1 %v589_v55  ;;  %v567_v54 = vrot.slane %v3481_v35, 2  ;;  %v568_v55 = vrot.slane %v3483_v36, 2  ;;  %v2964_v36 = vld [vmem:[%s5629_s2 + $0x1b0] sm:$0xff] }
  0x4f   : >> { %706 = vmatprep.subr.mxu0 %v3253_v47  ;;  %809 = vmatprep.subr.mxu1 %v3253_v47 }
  0x50   : >> { %707 = vmatpush2.msra.mxu0 %v2939_v56  ;;  %810 = vmatpush2.msra.mxu1 %v612_v57  ;;  %v2965_v57 = vld [vmem:[%s5629_s2 + $0x1b8] sm:$0xff] }
  0x51   : >> { %708 = vmatprep.subr.mxu0 %v3253_v47  ;;  %811 = vmatprep.subr.mxu1 %v3253_v47 }
  0x52   : >> { %709 = vmatpush2.msra.mxu0 %v2938_v58  ;;  %812 = vmatpush2.msra.mxu1 %v611_v59 }
  0x53   : >> { %710 = vmatprep.subr.mxu0 %v3253_v47  ;;  %813 = vmatprep.subr.mxu1 %v3253_v47 }
  0x54   : >> { %711 = vmatpush2.msra.mxu0 %v2937_v62  ;;  %814 = vmatpush2.msra.mxu1 %v610_v63  ;;  %v3824_v63 = vsel %vm548_vm3, %v567_v54, %v568_v55  ;;  %v2993_v54 = vld [vmem:[%s5631_s4 + $0xd0] sm:$0xff]  ;;  %v2992_v55 = vld [vmem:[%s5631_s4 + $0xc8] sm:$0xff] }
  0x55   : >> { %712 = vmatprep.subr.mxu0 %v3253_v47  ;;  %815 = vmatprep.subr.mxu1 %v3253_v47 }
  0x56   : >> { %713 = vmatpush2.msra.mxu0 %v2936_v3  ;;  %816 = vmatpush2.msra.mxu1 %v609_v4  ;;  %v570_v3 = vrot.slane %v3461_v22, 2 }
  0x57   : >> { %714 = vmatprep.subr.mxu0 %v3253_v47  ;;  %817 = vmatprep.subr.mxu1 %v3253_v47 }
  0x58   : >> { %715 = vmatpush2.msra.mxu0 %v2935_v5  ;;  %818 = vmatpush2.msra.mxu1 %v608_v6  ;;  %v573_v5 = vrot.slane %v3503_v48, 2  ;;  %v574_v6 = vrot.slane %v3505_v49, 2  ;;  %v2960_v49 = vld [vmem:[%s5629_s2 + $0x190] sm:$0xff] }
  0x59   : >> { %716 = vmatprep.subr.mxu0 %v3253_v47  ;;  %819 = vmatprep.subr.mxu1 %v3253_v47 }
  0x5a   : >> { %717 = vmatpush2.msra.mxu0 %v2934_v9  ;;  %820 = vmatpush2.msra.mxu1 %v607_v10  ;;  %v3870_v9 = vsel %vm548_vm3, %v573_v5, %v574_v6  ;;  %v3007_v6 = vld [vmem:[%s5631_s4 + $0x140] sm:$0xff] }
  0x5b   : >> { %893 = vmatprep.subr.mxu0 %v3253_v47  ;;  %821 = vmatprep.subr.mxu1 %v3253_v47 }
  0x5c   : >> { %822 = vmatpush2.msra.mxu1 %v606_v43  ;;  %2950 = vmatprep.mubr.msk.f32.mxu1 %vm382_vm0, %v551_v14  ;;  %v2958_v43 = vld [vmem:[%s5629_s2 + $0x180] sm:$0xff]  ;;  %v2980_v14 = vld [vmem:[%s5629_s2 + $0x230] sm:$0xff] }
  0x5d   : >> { %823 = vmatprep.subr.mxu1 %v3253_v47 }
  0x5e   : >> { %824 = vmatpush2.msra.mxu1 %v605_v15  ;;  %v2979_v15 = vld [vmem:[%s5629_s2 + $0x228] sm:$0xff] }
  0x5f   : >> { %1242 = vmatprep.subr.mxu1 %v3253_v47 }
  0x9d   : >> { %v521_v21 = vpop.permute.xlu0 %520 }
  0x9e   : >> { %v3741_v30 = vsel %vm382_vm0, %v3444_v11, %v521_v21  ;;  %v3754_v11 = vsel %vm548_vm3, %v558_v28, %v559_v29  ;;  %v2976_v21 = vld [vmem:[%s5629_s2 + $0x210] sm:$0xff]  ;;  %v576_v28 = vrot.slane %v3529_v60, 2  ;;  %v577_v29 = vrot.slane %v3531_v61, 2 }
  0x9f   : >> { %719 = vmatmul.mubr.f32.vlgmr.msra.gmra.mxu0 %v3741_v30  ;;  %v3005_v61 = vld [vmem:[%s5631_s4 + $0x130] sm:$0xff] }
  0xa0   : >> { %894 = vmatpush1.msra.mxu0 %v2973_v23  ;;  %2943 = vmatprep.mubr.msk.f32.mxu0 %vm382_vm0, %v3735_v27  ;;  %v2975_v23 = vld [vmem:[%s5629_s2 + $0x208] sm:$0xff] }
  0xa1   : >> { %895 = vmatprep.subr.mxu0 %v3253_v47  ;;  %v523_v33 = vpop.permute.xlu0 %522  ;;  %v525_v34 = vpop.permute.xlu1 %524 }
  0xa2   : >> { %896 = vmatpush1.msra.mxu0 %v2972_v16  ;;  %v3760_v39 = vsel %vm382_vm0, %v3448_v13, %v523_v33  ;;  %v3769_v41 = vsel %vm382_vm0, %v3467_v25, %v525_v34  ;;  %v2968_v25 = vld [vmem:[%s5629_s2 + $0x1d0] sm:$0xff]  ;;  %v578_v16 = vsel %vm548_vm3, %v576_v28, %v577_v29  ;;  %v3004_v34 = vld [vmem:[%s5631_s4 + $0x128] sm:$0xff] }
  0xa3   : >> { %897 = vmatprep.subr.mxu0 %v3253_v47  ;;  %724 = vmatmul.mubr.f32.gmra.mxu0 %v3760_v39 }
  0xa4   : >> { %898 = vmatpush1.msra.mxu0 %v2971_v26  ;;  %2944 = vmatprep.mubr.msk.f32.mxu0 %vm382_vm0, %v3754_v11  ;;  %v3006_v26 = vld [vmem:[%s5631_s4 + $0x138] sm:$0xff] }
  0xa5   : >> { %899 = vmatprep.subr.mxu0 %v3253_v47  ;;  %v529_v13 = vpop.permute.xlu0 %528  ;;  %v527_v44 = vpop.permute.xlu1 %526 }
  0xa6   : >> { %900 = vmatpush1.msra.mxu0 %v2970_v40  ;;  %v3789_v51 = vsel %vm382_vm0, %v3475_v31, %v527_v44  ;;  %v2966_v31 = vld [vmem:[%s5629_s2 + $0x1c0] sm:$0xff]  ;;  %v3815_v58 = vsel %vm382_vm0, %v3455_v18, %v529_v13  ;;  %v571_v18 = vrot.slane %v3465_v24, 2  ;;  %v1190_v40 = vld [vmem:[%s5631_s4 + $0x68] sm:$0xff]  ;;  %v1188_v44 = vld [vmem:[%s5631_s4 + $0x58] sm:$0xff] }
  0xa7   : >> { %901 = vmatprep.subr.mxu0 %v3253_v47  ;;  %729 = vmatmul.mubr.f32.gmra.mxu0 %v3769_v41  ;;  %v2962_v24 = vld [vmem:[%s5629_s2 + $0x1a0] sm:$0xff] }
  0xa8   : >> { %902 = vmatpush1.msra.mxu0 %v2969_v32  ;;  %2945 = vmatprep.mubr.msk.f32.mxu0 %vm382_vm0, %v3778_v45  ;;  %v1189_v13 = vld [vmem:[%s5631_s4 + $0x60] sm:$0xff] }
  0xa9   : >> { %903 = vmatprep.subr.mxu0 %v3253_v47  ;;  %v533_v20 = vpop.permute.xlu0 %532  ;;  %v531_v62 = vpop.permute.xlu1 %530  ;;  %v2999_v32 = vld [vmem:[%s5631_s4 + $0x100] sm:$0xff] }
  0xaa   : >> { %904 = vmatpush1.msra.mxu0 %v2968_v25  ;;  %v3837_v4 = vsel %vm382_vm0, %v3481_v35, %v531_v62  ;;  %v2961_v35 = vld [vmem:[%s5629_s2 + $0x198] sm:$0xff]  ;;  %v3860_v7 = vsel %vm382_vm0, %v3461_v22, %v533_v20  ;;  %v2959_v22 = vld [vmem:[%s5629_s2 + $0x188] sm:$0xff]  ;;  %v1185_v20 = vld [vmem:[%s5631_s4 + $0x40] sm:$0xff] }
  0xab   : >> { %905 = vmatprep.subr.mxu0 %v3253_v47  ;;  %734 = vmatmul.mubr.f32.gmra.mxu0 %v3789_v51  ;;  %v1186_v25 = vld [vmem:[%s5631_s4 + $0x48] sm:$0xff] }
  0xac   : >> { %906 = vmatpush1.msra.mxu0 %v2967_v52  ;;  %2946 = vmatprep.mubr.msk.f32.mxu0 %vm382_vm0, %v3798_v12  ;;  %v2995_v52 = vld [vmem:[%s5631_s4 + $0xe0] sm:$0xff] }
  0xad   : >> { %907 = vmatprep.subr.mxu0 %v3253_v47  ;;  %v519_v56 = vpop.permute.xlu0 %518  ;;  %v535_v8 = vpop.permute.xlu1 %534 }
  0xae   : >> { %908 = vmatpush1.msra.mxu0 %v2966_v31  ;;  %v579_v59 = vsel %vm382_vm0, %v3494_v42, %v519_v56  ;;  %v2963_v42 = vld [vmem:[%s5629_s2 + $0x1a8] sm:$0xff]  ;;  %v587_v10 = vsel %vm382_vm0, %v3503_v48, %v535_v8  ;;  %v2981_v48 = vld [vmem:[%s5629_s2 + $0x238] sm:$0xff]  ;;  %v2991_v56 = vld [vmem:[%s5631_s4 + $0xc0] sm:$0xff] }
  0xaf   : >> { %909 = vmatprep.subr.mxu0 %v3253_v47  ;;  %826 = vmatmul.mubr.f32.vlgmr.msra.gmra.mxu1 %v579_v59  ;;  %v2994_v31 = vld [vmem:[%s5631_s4 + $0xd8] sm:$0xff] }
  0xb0   : >> { %910 = vmatpush1.msra.mxu0 %v2965_v57  ;;  %2951 = vmatprep.mubr.msk.f32.mxu1 %vm382_vm0, %v3654_v53  ;;  %v3847_v53 = vsel %vm548_vm3, %v570_v3, %v571_v18  ;;  %v3014_v57 = vld [vmem:[%s5631_s4 + $0x178] sm:$0xff] }
  0xb1   : >> { %911 = vmatprep.subr.mxu0 %v3253_v47  ;;  %739 = vmatmul.mubr.f32.gmra.mxu0 %v3815_v58  ;;  %v3010_v18 = vld [vmem:[%s5631_s4 + $0x158] sm:$0xff] }
  0xb2   : >> { %912 = vmatpush1.msra.mxu0 %v2964_v36  ;;  %2947 = vmatprep.mubr.msk.f32.mxu0 %vm382_vm0, %v3824_v63  ;;  %v3012_v36 = vld [vmem:[%s5631_s4 + $0x168] sm:$0xff] }
  0xb3   : >> { %913 = vmatprep.subr.mxu0 %v3253_v47  ;;  %831 = vmatmul.mubr.f32.gmra.mxu1 %v3741_v30  ;;  %v537_v30 = vpop.permute.xlu1 %536 }
  0xb4   : >> { %914 = vmatpush1.msra.mxu0 %v2963_v42  ;;  %2952 = vmatprep.mubr.msk.f32.mxu1 %vm382_vm0, %v3735_v27  ;;  %v588_v33 = vsel %vm382_vm0, %v3529_v60, %v537_v30  ;;  %v3003_v60 = vld [vmem:[%s5631_s4 + $0x120] sm:$0xff] }
  0xb5   : >> { %915 = vmatprep.subr.mxu0 %v3253_v47  ;;  %744 = vmatmul.mubr.f32.gmra.mxu0 %v3837_v4 }
  0xb6   : >> { %916 = vmatpush1.msra.mxu0 %v2962_v24  ;;  %2948 = vmatprep.mubr.msk.f32.mxu0 %vm382_vm0, %v3847_v53 }
  0xb7   : >> { %917 = vmatprep.subr.mxu0 %v3253_v47  ;;  %836 = vmatmul.mubr.f32.gmra.mxu1 %v3760_v39 }
  0xb8   : >> { %918 = vmatpush1.msra.mxu0 %v2961_v35  ;;  %2953 = vmatprep.mubr.msk.f32.mxu1 %vm382_vm0, %v3754_v11 }
  0xb9   : >> { %919 = vmatprep.subr.mxu0 %v3253_v47  ;;  %749 = vmatmul.mubr.f32.gmra.mxu0 %v3860_v7 }
  0xba   : >> { %920 = vmatpush1.msra.mxu0 %v2960_v49  ;;  %2949 = vmatprep.mubr.msk.f32.mxu0 %vm382_vm0, %v3870_v9 }
  0xbb   : >> { %921 = vmatprep.subr.mxu0 %v3253_v47  ;;  %841 = vmatmul.mubr.f32.gmra.mxu1 %v3769_v41 }
  0xbc   : >> { %922 = vmatpush1.msra.mxu0 %v2959_v22  ;;  %2954 = vmatprep.mubr.msk.f32.mxu1 %vm382_vm0, %v3778_v45 }
  0xbd   : >> { %923 = vmatprep.subr.mxu0 %v3253_v47  ;;  %754 = vmatmul.mubr.f32.gmra.mxu0 %v587_v10 }
  0xbe   : >> { %924 = vmatpush1.msra.mxu0 %v2958_v43  ;;  %2982 = vmatprep.mubr.msk.f32.mxu0 %vm382_vm0, %v3735_v27  ;;  %v2974_v27 = vld [vmem:[%s5629_s2 + $0x200] sm:$0xff] }
  0xbf   : >> { %941 = vmatprep.subr.mxu0 %v3253_v47  ;;  %846 = vmatmul.mubr.f32.gmra.mxu1 %v3789_v51 }
  0xc0   : >> { %942 = vmatpush2.msra.mxu0 %v2981_v48  ;;  %2955 = vmatprep.mubr.msk.f32.mxu1 %vm382_vm0, %v3798_v12 }
  0xc1   : >> { %943 = vmatprep.subr.mxu0 %v3253_v47  ;;  %1243 = vmatpush1.msra.mxu1 %v3006_v26 }
  0xc2   : >> { %944 = vmatpush2.msra.mxu0 %v2980_v14  ;;  %1244 = vmatprep.subr.mxu1 %v3253_v47 }
  0xc3   : >> { %945 = vmatprep.subr.mxu0 %v3253_v47  ;;  %851 = vmatmul.mubr.f32.gmra.mxu1 %v3815_v58 }
  0xc4   : >> { %946 = vmatpush2.msra.mxu0 %v2979_v15  ;;  %2956 = vmatprep.mubr.msk.f32.mxu1 %vm382_vm0, %v3824_v63 }
  0xc5   : >> { %947 = vmatprep.subr.mxu0 %v3253_v47  ;;  %1245 = vmatpush1.msra.mxu1 %v3005_v61 }
  0xc6   : >> { %948 = vmatpush2.msra.mxu0 %v2978_v17  ;;  %1246 = vmatprep.subr.mxu1 %v3253_v47 }
  0xc7   : >> { %949 = vmatprep.subr.mxu0 %v3253_v47  ;;  %856 = vmatmul.mubr.f32.gmra.mxu1 %v3837_v4 }
  0xc8   : >> { %950 = vmatpush2.msra.mxu0 %v2977_v19  ;;  %2957 = vmatprep.mubr.msk.f32.mxu1 %vm382_vm0, %v3847_v53 }
  0xc9   : >> { %951 = vmatprep.subr.mxu0 %v3253_v47  ;;  %1247 = vmatpush1.msra.mxu1 %v3004_v34 }
  0xca   : >> { %952 = vmatpush2.msra.mxu0 %v2976_v21  ;;  %1248 = vmatprep.subr.mxu1 %v3253_v47 }
  0xcb   : >> { %953 = vmatprep.subr.mxu0 %v3253_v47  ;;  %861 = vmatmul.mubr.f32.gmra.mxu1 %v3860_v7 }
  0xcc   : >> { %954 = vmatpush2.msra.mxu0 %v2975_v23  ;;  %1249 = vmatpush1.msra.mxu1 %v3003_v60 }
  0xcd   : >> { %955 = vmatprep.subr.mxu0 %v3253_v47  ;;  %1250 = vmatprep.subr.mxu1 %v3253_v47 }
  0xce   : >> { %956 = vmatpush2.msra.mxu0 %v2974_v27 }
  0xcf   : >> { %958 = vmatmul.mubr.f32.vlgmr.msra.gmra.mxu0 %v3760_v39  ;;  %1349 = vmatprep.subr.mxu0 %v3253_v47  ;;  %v1191_v39 = vld [vmem:[%s5631_s4 + $0x70] sm:$0xff] }
  0xd0   : >> { %2983 = vmatprep.mubr.msk.f32.mxu0 %vm382_vm0, %v3754_v11  ;;  %v3002_v11 = vld [vmem:[%s5631_s4 + $0x118] sm:$0xff]  ;;  %1350 = vmatpush1.msra.mxu0 %v1192_v37 }
  0xd1   : >> { %1251 = vmatpush1.msra.mxu1 %v3002_v11  ;;  %1351 = vmatprep.subr.mxu0 %v3253_v47 }
  0xd2   : >> { %1252 = vmatprep.subr.mxu1 %v3253_v47  ;;  %1352 = vmatpush1.msra.mxu0 %v1191_v39 }
  0xd3   : >> { %963 = vmatmul.mubr.f32.gmra.mxu0 %v3769_v41  ;;  %v3000_v41 = vld [vmem:[%s5631_s4 + $0x108] sm:$0xff]  ;;  %1253 = vmatpush1.msra.mxu1 %v3001_v38 }
  0xd4   : >> { %2984 = vmatprep.mubr.msk.f32.mxu0 %vm382_vm0, %v3778_v45  ;;  %1353 = vmatprep.subr.mxu0 %v3253_v47  ;;  %v2998_v45 = vld [vmem:[%s5631_s4 + $0xf8] sm:$0xff] }
  0xd5   : >> { %1254 = vmatprep.subr.mxu1 %v3253_v47  ;;  %1354 = vmatpush1.msra.mxu0 %v1190_v40 }
  0xd6   : >> { %1255 = vmatpush1.msra.mxu1 %v3000_v41  ;;  %1355 = vmatprep.subr.mxu0 %v3253_v47 }
  0xd7   : >> { %968 = vmatmul.mubr.f32.gmra.mxu0 %v3789_v51  ;;  %1256 = vmatprep.subr.mxu1 %v3253_v47  ;;  %v2996_v51 = vld [vmem:[%s5631_s4 + $0xe8] sm:$0xff] }
  0xd8   : >> { %2985 = vmatprep.mubr.msk.f32.mxu0 %vm382_vm0, %v3798_v12  ;;  %1356 = vmatpush1.msra.mxu0 %v1189_v13  ;;  %v1184_v12 = vld [vmem:[%s5631_s4 + $0x38] sm:$0xff] }
  0xd9   : >> { %1257 = vmatpush1.msra.mxu1 %v2999_v32  ;;  %1357 = vmatprep.subr.mxu0 %v3253_v47 }
  0xda   : >> { %1258 = vmatprep.subr.mxu1 %v3253_v47  ;;  %1358 = vmatpush1.msra.mxu0 %v1188_v44 }
  0xdb   : >> { %973 = vmatmul.mubr.f32.gmra.mxu0 %v3815_v58  ;;  %1259 = vmatpush1.msra.mxu1 %v2998_v45  ;;  %v3013_v58 = vld [vmem:[%s5631_s4 + $0x170] sm:$0xff] }
  0xdc   : >> { %2986 = vmatprep.mubr.msk.f32.mxu0 %vm382_vm0, %v3824_v63  ;;  %1359 = vmatprep.subr.mxu0 %v3253_v47  ;;  %v3011_v63 = vld [vmem:[%s5631_s4 + $0x160] sm:$0xff] }
  0xdd   : >> { %1260 = vmatprep.subr.mxu1 %v3253_v47  ;;  %1360 = vmatpush1.msra.mxu0 %v1187_v46  ;;  %v1183_v46 = vld [vmem:[%s5631_s4 + $0x30] sm:$0xff] }
  0xde   : >> { %1261 = vmatpush1.msra.mxu1 %v2997_v50  ;;  %1361 = vmatprep.subr.mxu0 %v3253_v47 }
  0xdf   : >> { %978 = vmatmul.mubr.f32.gmra.mxu0 %v3837_v4  ;;  %1262 = vmatprep.subr.mxu1 %v3253_v47  ;;  %v3009_v4 = vld [vmem:[%s5631_s4 + $0x150] sm:$0xff] }
  0xe0   : >> { %2987 = vmatprep.mubr.msk.f32.mxu0 %vm382_vm0, %v3847_v53  ;;  %1362 = vmatpush1.msra.mxu0 %v1186_v25  ;;  %v3008_v53 = vld [vmem:[%s5631_s4 + $0x148] sm:$0xff] }
  0xe1   : >> { %1263 = vmatpush1.msra.mxu1 %v2996_v51  ;;  %1363 = vmatprep.subr.mxu0 %v3253_v47 }
  0xe2   : >> { %1264 = vmatprep.subr.mxu1 %v3253_v47  ;;  %1364 = vmatpush1.msra.mxu0 %v1185_v20 }
  0xe3   : >> { %983 = vmatmul.mubr.f32.gmra.mxu0 %v3860_v7  ;;  %1265 = vmatpush1.msra.mxu1 %v2995_v52  ;;  %v1182_v52 = vld [vmem:[%s5631_s4 + $0x28] sm:$0xff] }
  0xe4   : >> { %2988 = vmatprep.mubr.msk.f32.mxu0 %vm382_vm0, %v3870_v9  ;;  %1365 = vmatprep.subr.mxu0 %v3253_v47 }
  0xe5   : >> { %1266 = vmatprep.subr.mxu1 %v3253_v47  ;;  %1366 = vmatpush1.msra.mxu0 %v1184_v12 }
  0xe6   : >> { %1267 = vmatpush1.msra.mxu1 %v2994_v31  ;;  %1367 = vmatprep.subr.mxu0 %v3253_v47 }
  0xe7   : >> { %988 = vmatmul.mubr.f32.gmra.mxu0 %v587_v10  ;;  %1268 = vmatprep.subr.mxu1 %v3253_v47 }
  0xe8   : >> { %2989 = vmatprep.mubr.msk.f32.mxu0 %vm382_vm0, %v578_v16  ;;  %1269 = vmatpush1.msra.mxu1 %v2993_v54 }
  0xe9   : >> { %1270 = vmatprep.subr.mxu1 %v3253_v47  ;;  %1368 = vmatpush1.msra.mxu0 %v1183_v46 }
  0xea   : >> { %1271 = vmatpush1.msra.mxu1 %v2992_v55  ;;  %1369 = vmatprep.subr.mxu0 %v3253_v47  ;;  %v1181_v55 = vld [vmem:[%s5631_s4 + $0x20] sm:$0xff] }
  0xeb   : >> { %993 = vmatmul.mubr.f32.gmra.mxu0 %v588_v33  ;;  %1272 = vmatprep.subr.mxu1 %v3253_v47 }
  0xec   : >> { %1273 = vmatpush1.msra.mxu1 %v2991_v56  ;;  %1370 = vmatpush1.msra.mxu0 %v1182_v52 }
  0xed   : >> { %1290 = vmatprep.subr.mxu1 %v3253_v47  ;;  %1371 = vmatprep.subr.mxu0 %v3253_v47 }
  0xee   : >> { %1291 = vmatpush2.msra.mxu1 %v3014_v57  ;;  %1372 = vmatpush1.msra.mxu0 %v1181_v55  ;;  %v1196_v55 = vld [vmem:[%s5631_s4 + $0x98] sm:$0xff] }
  0xef   : >> { %1292 = vmatprep.subr.mxu1 %v3253_v47  ;;  %1373 = vmatprep.subr.mxu0 %v3253_v47 }
  0xf0   : >> { %1293 = vmatpush2.msra.mxu1 %v3013_v58 }
  0xf1   : >> { %1294 = vmatprep.subr.mxu1 %v3253_v47 }
  0xf2   : >> { %1295 = vmatpush2.msra.mxu1 %v3012_v36 }
  0xf3   : >> { %1296 = vmatprep.subr.mxu1 %v3253_v47 }
  0xf4   : >> { %1297 = vmatpush2.msra.mxu1 %v3011_v63 }
  0xf5   : >> { %1298 = vmatprep.subr.mxu1 %v3253_v47 }
  0xf6   : >> { %1299 = vmatpush2.msra.mxu1 %v3010_v18 }
  0xf7   : >> { %1300 = vmatprep.subr.mxu1 %v3253_v47 }
  0xf8   : >> { %1301 = vmatpush2.msra.mxu1 %v3009_v4  ;;  %v1179_v4 = vld [vmem:[%s5631_s4 + $0x10] sm:$0xff] }
  0xf9   : >> { %1302 = vmatprep.subr.mxu1 %v3253_v47 }
  0xfa   : >> { %1303 = vmatpush2.msra.mxu1 %v3008_v53 }
  0xfb   : >> { %1304 = vmatprep.subr.mxu1 %v3253_v47 }
  0xfc   : >> { %1305 = vmatpush2.msra.mxu1 %v3007_v6 }
  0xfd   : >> { %1481 = vmatprep.subr.mxu1 %v3253_v47 }
 0x15f   : >> { %v720_v59 = vpop.f32.mrf.mxu0 }
 0x161   : >> { %v722_v62 = vpop.f32.mrf.mxu0 }
 0x163   : >> { %v725_v3 = vpop.f32.mrf.mxu0 }
 0x165   : >> { %v727_v42 = vpop.f32.mrf.mxu0 }
 0x167   : >> { %v730_v24 = vpop.f32.mrf.mxu0 }
 0x169   : >> { %v732_v5 = vpop.f32.mrf.mxu0 }
 0x16b   : >> { %v735_v35 = vpop.f32.mrf.mxu0 }
 0x16d   : >> { %v737_v7 = vpop.f32.mrf.mxu0 }
 0x16f   : >> { %v827_v49 = vpop.f32.mrf.mxu1 }
 0x170   : >> { %v828_v37 = vadd.f32 %v827_v49, %v720_v59  ;;  %v1180_v59 = vld [vmem:[%s5631_s4 + $0x18] sm:$0xff]  ;;  %v1178_v49 = vld [vmem:[%s5631_s4 + $0x8] sm:$0xff] }
 0x171   : >> { %v829_v8 = vpop.f32.mrf.mxu1  ;;  %v740_v9 = vpop.f32.mrf.mxu0  ;;  %1374 = vmatpush1.msra.mxu0 %v1180_v59 }
 0x172   : >> { %1375 = vmatprep.subr.mxu0 %v3253_v47 }
 0x173   : >> { %v832_v22 = vpop.f32.mrf.mxu1  ;;  %v742_v10 = vpop.f32.mrf.mxu0  ;;  %1376 = vmatpush1.msra.mxu0 %v1179_v4  ;;  %v1038_v4 = vld [vmem:[#allocation3 + $0x8] sm:$0x3] }
 0x174   : >> { %v833_v41 = vadd.f32 %v832_v22, %v725_v3  ;;  %1377 = vmatprep.subr.mxu0 %v3253_v47 }
 0x175   : >> { %v834_v43 = vpop.f32.mrf.mxu1  ;;  %v4092_v48 = vpop.f32.mrf.mxu0  ;;  %1378 = vmatpush1.msra.mxu0 %v1178_v49 }
 0x176   : >> { %1379 = vmatprep.subr.mxu0 %v3253_v47 }
 0x177   : >> { %v837_v14 = vpop.f32.mrf.mxu1  ;;  %v747_v15 = vpop.f32.mrf.mxu0 }
 0x178   : >> { %v838_v25 = vadd.f32 %v837_v14, %v730_v24 }
 0x179   : >> { %v839_v17 = vpop.f32.mrf.mxu1  ;;  %v4094_v19 = vpop.f32.mrf.mxu0 }
 0x17a   : >> { %v1177_v17 = vld [vmem:[%s5631_s4] sm:$0xff] }
 0x17b   : >> { %v842_v21 = vpop.f32.mrf.mxu1  ;;  %v752_v23 = vpop.f32.mrf.mxu0  ;;  %1380 = vmatpush1.msra.mxu0 %v1177_v17 }
 0x17c   : >> { %v843_v56 = vadd.f32 %v842_v21, %v735_v35  ;;  %1397 = vmatprep.subr.mxu0 %v3253_v47 }
 0x17d   : >> { %v844_v27 = vpop.f32.mrf.mxu1  ;;  %v4096_v28 = vpop.f32.mrf.mxu0 }
 0x17f   : >> { %v847_v29 = vpop.f32.mrf.mxu1  ;;  %v757_v30 = vpop.f32.mrf.mxu0 }
 0x180   : >> { %v848_v63 = vadd.f32 %v847_v29, %v740_v9 }
 0x181   : >> { %v849_v16 = vpop.f32.mrf.mxu1 }
 0x182   : >> { %v1200_v16 = vld [vmem:[%s5631_s4 + $0xb8] sm:$0xff] }
 0x183   : >> { %v4098_v33 = vpop.f32.mrf.mxu1  ;;  %1398 = vmatpush2.msra.mxu0 %v1200_v16 }
 0x184   : >> { %v853_v21 = vadd.f32 %v4098_v33, %v4092_v48  ;;  %1399 = vmatprep.subr.mxu0 %v3253_v47 }
 0x185   : >> { %v854_v26 = vpop.f32.mrf.mxu1 }
 0x187   : >> { %v4100_v61 = vpop.f32.mrf.mxu1 }
 0x189   : >> { %v859_v34 = vpop.f32.mrf.mxu1 }
 0x18b   : >> { %v4102_v60 = vpop.f32.mrf.mxu1 }
 0x18d   : >> { %v864_v11 = vpop.f32.mrf.mxu1 }
 0x18f   : >> { %v959_v38 = vpop.f32.mrf.mxu0 }
 0x190   : >> { %v998_v39 = vadd.f32 %v959_v38, %v828_v37  ;;  %v1199_v38 = vld [vmem:[%s5631_s4 + $0xb0] sm:$0xff] }
 0x191   : >> { %v961_v40 = vpop.f32.mrf.mxu0  ;;  %1400 = vmatpush2.msra.mxu0 %v1199_v38 }
 0x192   : >> { %v1012_v13 = vadd.f32 %v3321_v0, %v998_v39  ;;  %v858_v39 = vadd.f32 %v4100_v61, %v4094_v19  ;;  %1401 = vmatprep.subr.mxu0 %v3253_v47 }
 0x193   : >> { %v964_v32 = vpop.f32.mrf.mxu0 }
 0x194   : >> { %v1020_v44 = vmax.f32 %v1012_v13, 0.0  ;;  %v999_v45 = vadd.f32 %v964_v32, %v833_v41 }
 0x195   : >> { %v966_v50 = vpop.f32.mrf.mxu0 }
 0x196   : >> { %1029 = vst.msk [vmem:[#allocation3 + $0x11] sm:$0xff] %vm382_vm0, %v1020_v44  ;;  %v1013_v51 = vadd.f32 %v3321_v0, %v999_v45  ;;  %v1198_v44 = vld [vmem:[%s5631_s4 + $0xa8] sm:$0xff] }
 0x197   : >> { %v969_v20 = vpop.f32.mrf.mxu0  ;;  %1402 = vmatpush2.msra.mxu0 %v1198_v44 }
 0x198   : >> { %v1021_v12 = vmax.f32 %v1013_v51, 0.0  ;;  %v1000_v31 = vadd.f32 %v969_v20, %v838_v25  ;;  %1403 = vmatprep.subr.mxu0 %v3253_v47  ;;  %v1197_v51 = vld [vmem:[%s5631_s4 + $0xa0] sm:$0xff]  ;;  %v863_v20 = vadd.f32 %v4102_v60, %v4096_v28 }
 0x199   : >> { %v971_v54 = vpop.f32.mrf.mxu0  ;;  %1404 = vmatpush2.msra.mxu0 %v1197_v51  ;;  %v3046_v51 = vld [vmem:[%s5631_s4 + $0x1f8] sm:$0xff] }
 0x19a   : >> { %1030 = vst.msk [vmem:[#allocation3 + $0x21] sm:$0xff] %vm382_vm0, %v1021_v12  ;;  %v1014_v57 = vadd.f32 %v3321_v0, %v1000_v31  ;;  %1405 = vmatprep.subr.mxu0 %v3253_v47 }
 0x19b   : >> { %v974_v58 = vpop.f32.mrf.mxu0  ;;  %1406 = vmatpush2.msra.mxu0 %v1196_v55  ;;  %v3044_v55 = vld [vmem:[%s5631_s4 + $0x1e8] sm:$0xff] }
 0x19c   : >> { %v1022_v36 = vmax.f32 %v1014_v57, 0.0  ;;  %v1001_v62 = vadd.f32 %v974_v58, %v843_v56  ;;  %1407 = vmatprep.subr.mxu0 %v3253_v47 }
 0x19d   : >> { %v976_v3 = vpop.f32.mrf.mxu0  ;;  %v4124_v18 = vld [vmem:[#allocation3 + $0x10] sm:$0xff]  ;;  %v1040_v42 = vld [vmem:[#allocation3 + $0x18] sm:$0x3] }
 0x19e   : >> { %1031 = vst.msk [vmem:[#allocation3 + $0x31] sm:$0xff] %vm382_vm0, %v1022_v36  ;;  %v1015_v24 = vadd.f32 %v3321_v0, %v1001_v62  ;;  %v1140_v53 = vrot.slane %v4124_v18, 2  ;;  %v1141_v5 = vrot.slane %v1040_v42, 2  ;;  %v1080_v6 = vrot.slane %v4124_v18, 1  ;;  %v1195_v36 = vld [vmem:[%s5631_s4 + $0x90] sm:$0xff] }
 0x19f   : >> { %v979_v35 = vpop.f32.mrf.mxu0  ;;  %v1081_v7 = vrot.slane %v1040_v42, 1  ;;  %v4217_v42 = vld [vmem:[#allocation3] sm:$0xff]  ;;  %1408 = vmatpush2.msra.mxu0 %v1195_v36  ;;  %v3042_v36 = vld [vmem:[%s5631_s4 + $0x1d8] sm:$0xff] }
 0x1a0   : >> { %v1023_v8 = vmax.f32 %v1015_v24, 0.0  ;;  %v1002_v9 = vadd.f32 %v979_v35, %v848_v63  ;;  %v4139_v22 = vsel %vm548_vm3, %v1140_v53, %v1141_v5  ;;  %1409 = vmatprep.subr.mxu0 %v3253_v47  ;;  %v1194_v24 = vld [vmem:[%s5631_s4 + $0x88] sm:$0xff]  ;;  %v1137_v53 = vrot.slane %v4217_v42, 2 }
 0x1a1   : >> { %v981_v10 = vpop.f32.mrf.mxu0  ;;  %3015 = vmatprep.mubr.msk.f32.mxu1 %vm382_vm0, %v4139_v22  ;;  %v1082_v43 = vsel %vm487_vm2, %v1080_v6, %v1081_v7  ;;  %v4144_v14 = vld [vmem:[#allocation3 + $0x20] sm:$0xff]  ;;  %v4146_v15 = vld [vmem:[#allocation3 + $0x28] sm:$0x3]  ;;  %v1138_v5 = vrot.slane %v1038_v4, 2  ;;  %1410 = vmatpush2.msra.mxu0 %v1194_v24 }
 0x1a2   : >> { %1032 = vst.msk [vmem:[#allocation3 + $0x41] sm:$0xff] %vm382_vm0, %v1023_v8  ;;  %v1016_v23 = vadd.f32 %v3321_v0, %v1002_v9  ;;  %1109 = vrot.lane.b32.xlu0 %v1082_v43, %s3252_s11  ;;  %v1083_v27 = vrot.slane %v4144_v14, 1  ;;  %v1084_v29 = vrot.slane %v4146_v15, 1  ;;  %1411 = vmatprep.subr.mxu0 %v3253_v47  ;;  %v1193_v8 = vld [vmem:[%s5631_s4 + $0x80] sm:$0xff]  ;;  %v3040_v24 = vld [vmem:[%s5631_s4 + $0x1c8] sm:$0xff] }
 0x1a3   : >> { %v984_v30 = vpop.f32.mrf.mxu0  ;;  %v1139_v9 = vsel %vm548_vm3, %v1137_v53, %v1138_v5  ;;  %1412 = vmatpush2.msra.mxu0 %v1193_v8  ;;  %v3039_v53 = vld [vmem:[%s5631_s4 + $0x1c0] sm:$0xff]  ;;  %v3038_v8 = vld [vmem:[%s5631_s4 + $0x1b8] sm:$0xff] }
 0x1a4   : >> { %v1024_v26 = vmax.f32 %v1016_v23, 0.0  ;;  %v1003_v48 = vadd.f32 %v984_v30, %v853_v21  ;;  %v1085_v33 = vsel %vm487_vm2, %v1083_v27, %v1084_v29  ;;  %3023 = vmatprep.mubr.msk.f32.mxu0 %vm382_vm0, %v1139_v9  ;;  %v1077_v27 = vrot.slane %v4217_v42, 1  ;;  %v3037_v9 = vld [vmem:[%s5631_s4 + $0x1b0] sm:$0xff]  ;;  %1840 = vmatprep.subr.mxu0 (%p443_p4), %v3251_v1 }
 0x1a5   : >> { %v986_v34 = vpop.f32.mrf.mxu0  ;;  %1111 = vrot.lane.b32.xlu1 %v1085_v33, %s3252_s11  ;;  %v4165_v11 = vld [vmem:[#allocation3 + $0x30] sm:$0xff]  ;;  %v4167_v37 = vld [vmem:[#allocation3 + $0x38] sm:$0x3]  ;;  %v1078_v29 = vrot.slane %v1038_v4, 1 }
 0x1a6   : >> { %1033 = vst.msk [vmem:[#allocation3 + $0x51] sm:$0xff] %vm382_vm0, %v1024_v26  ;;  %v1017_v40 = vadd.f32 %v3321_v0, %v1003_v48  ;;  %v1086_v41 = vrot.slane %v4165_v11, 1  ;;  %v1087_v13 = vrot.slane %v4167_v37, 1  ;;  %v4248_v26 = vld [vmem:[#allocation3 + $0x90] sm:$0xff]  ;;  %v4250_v48 = vld [vmem:[#allocation3 + $0x98] sm:$0x3] }
 0x1a7   : >> { %v989_v32 = vpop.f32.mrf.mxu0 }
 0x1a8   : >> { %v1025_v45 = vmax.f32 %v1017_v40, 0.0  ;;  %v1004_v46 = vadd.f32 %v989_v32, %v858_v39  ;;  %v1088_v19 = vsel %vm487_vm2, %v1086_v41, %v1087_v13  ;;  %v1079_v39 = vsel %vm487_vm2, %v1077_v27, %v1078_v29  ;;  %v3036_v27 = vld [vmem:[%s5631_s4 + $0x1a8] sm:$0xff]  ;;  %v3035_v29 = vld [vmem:[%s5631_s4 + $0x1a0] sm:$0xff] }
 0x1a9   : >> { %v991_v61 = vpop.f32.mrf.mxu0  ;;  %1113 = vrot.lane.b32.xlu0 %v1088_v19, %s3252_s11  ;;  %v4185_v50 = vld [vmem:[#allocation3 + $0x40] sm:$0xff]  ;;  %v4187_v25 = vld [vmem:[#allocation3 + $0x48] sm:$0x3]  ;;  %v1104_v13 = vrot.slane %v4248_v26, 1  ;;  %v1105_v32 = vrot.slane %v4250_v48, 1  ;;  %v1144_v19 = vrot.slane %v4146_v15, 2 }
 0x1aa   : >> { %1034 = vst.msk [vmem:[#allocation3 + $0x61] sm:$0xff] %vm382_vm0, %v1025_v45  ;;  %v1018_v52 = vadd.f32 %v3321_v0, %v1004_v46  ;;  %v1089_v12 = vrot.slane %v4185_v50, 1  ;;  %v1090_v31 = vrot.slane %v4187_v25, 1  ;;  %v1143_v46 = vrot.slane %v4144_v14, 2 }
 0x1ab   : >> { %v994_v54 = vpop.f32.mrf.mxu0  ;;  %v1106_v45 = vsel %vm487_vm2, %v1104_v13, %v1105_v32  ;;  %v1146_v15 = vrot.slane %v4165_v11, 2 }
 0x1ac   : >> { %v1026_v56 = vmax.f32 %v1018_v52, 0.0  ;;  %v1005_v57 = vadd.f32 %v994_v54, %v863_v20  ;;  %v1091_v28 = vsel %vm487_vm2, %v1089_v12, %v1090_v31  ;;  %v4279_v52 = vsel %vm548_vm3, %v1143_v46, %v1144_v19  ;;  %v3045_v12 = vld [vmem:[%s5631_s4 + $0x1f0] sm:$0xff]  ;;  %v3051_v46 = vld [vmem:[%s5631_s4 + $0x220] sm:$0xff]  ;;  %v3050_v19 = vld [vmem:[%s5631_s4 + $0x218] sm:$0xff] }
 0x1ad   : >> { %1115 = vrot.lane.b32.xlu1 %v1091_v28, %s3252_s11  ;;  %v4205_v60 = vld [vmem:[#allocation3 + $0x50] sm:$0xff]  ;;  %v4207_v58 = vld [vmem:[#allocation3 + $0x58] sm:$0x3]  ;;  %v996_v59 = vpop.f32.mrf.mxu0  ;;  %v1147_v31 = vrot.slane %v4167_v37, 2 }
 0x1ae   : >> { %1035 = vst.msk [vmem:[#allocation3 + $0x71] sm:$0xff] %vm382_vm0, %v1026_v56  ;;  %v1019_v62 = vadd.f32 %v3321_v0, %v1005_v57  ;;  %v1092_v63 = vrot.slane %v4205_v60, 1  ;;  %v1093_v3 = vrot.slane %v4207_v58, 1  ;;  %v3043_v56 = vld [vmem:[%s5631_s4 + $0x1e0] sm:$0xff]  ;;  %v1149_v57 = vrot.slane %v4185_v50, 2 }
 0x1af   : >> { %v4299_v37 = vsel %vm548_vm3, %v1146_v15, %v1147_v31 }
 0x1b0   : >> { %v1027_v6 = vmax.f32 %v1019_v62, 0.0  ;;  %v1094_v35 = vsel %vm487_vm2, %v1092_v63, %v1093_v3  ;;  %v3041_v62 = vld [vmem:[%s5631_s4 + $0x1d0] sm:$0xff]  ;;  %v1152_v63 = vrot.slane %v4205_v60, 2 }
 0x1b1   : >> { %1117 = vrot.lane.b32.xlu0 %v1094_v35, %s3252_s11  ;;  %v4226_v7 = vld [vmem:[#allocation3 + $0x60] sm:$0xff]  ;;  %v4228_v49 = vld [vmem:[#allocation3 + $0x68] sm:$0x3] }
 0x1b2   : >> { %1036 = vst.msk [vmem:[#allocation3 + $0x81] sm:$0xff] %vm382_vm0, %v1027_v6  ;;  %v1095_v10 = vrot.slane %v4226_v7, 1  ;;  %v1096_v43 = vrot.slane %v4228_v49, 1  ;;  %v1155_v5 = vrot.slane %v4226_v7, 2 }
 0x1b4   : >> { %v1097_v17 = vsel %vm487_vm2, %v1095_v10, %v1096_v43 }
 0x1b5   : >> { %1119 = vrot.lane.b32.xlu1 %v1097_v17, %s3252_s11  ;;  %v4241_v21 = vld [vmem:[#allocation3 + $0x70] sm:$0xff]  ;;  %v4243_v23 = vld [vmem:[#allocation3 + $0x78] sm:$0x3] }
 0x1b6   : >> { %v1098_v30 = vrot.slane %v4241_v21, 1  ;;  %v1099_v16 = vrot.slane %v4243_v23, 1  ;;  %v1158_v10 = vrot.slane %v4241_v21, 2 }
 0x1b8   : >> { %v1100_v33 = vsel %vm487_vm2, %v1098_v30, %v1099_v16 }
 0x1b9   : >> { %1121 = vrot.lane.b32.xlu0 %v1100_v33, %s3252_s11  ;;  %v4254_v34 = vld [vmem:[#allocation3 + $0x80] sm:$0xff]  ;;  %v4256_v38 = vld [vmem:[#allocation3 + $0x88] sm:$0x3] }
 0x1ba   : >> { %v1101_v40 = vrot.slane %v4254_v34, 1  ;;  %v1102_v41 = vrot.slane %v4256_v38, 1  ;;  %v1161_v30 = vrot.slane %v4254_v34, 2 }
 0x1bc   : >> { %v1103_v44 = vsel %vm487_vm2, %v1101_v40, %v1102_v41  ;;  %v3033_v40 = vld [vmem:[%s5631_s4 + $0x190] sm:$0xff] }
 0x1bd   : >> { %1123 = vrot.lane.b32.xlu1 %v1103_v44, %s3252_s11  ;;  %1107 = vrot.lane.b32.xlu0 %v1079_v39, %s3252_s11  ;;  %v3034_v39 = vld [vmem:[%s5631_s4 + $0x198] sm:$0xff]  ;;  %v3032_v44 = vld [vmem:[%s5631_s4 + $0x188] sm:$0xff] }
 0x1c1   : >> { %1125 = vrot.lane.b32.xlu1 %v1106_v45, %s3252_s11  ;;  %v3031_v45 = vld [vmem:[%s5631_s4 + $0x180] sm:$0xff] }
 0x214   : >> { %v1110_v61 = vpop.permute.xlu0 %1109 }
 0x215   : >> { %v4275_v20 = vsel %vm382_vm0, %v4124_v18, %v1110_v61  ;;  %v3049_v61 = vld [vmem:[%s5631_s4 + $0x210] sm:$0xff] }
 0x216   : >> { %1307 = vmatmul.mubr.f32.vlgmr.msra.gmra.mxu1 %v4275_v20 }
 0x217   : >> { %1482 = vmatpush1.msra.mxu1 %v3046_v51  ;;  %3016 = vmatprep.mubr.msk.f32.mxu1 %vm382_vm0, %v4279_v52  ;;  %v1112_v54 = vpop.permute.xlu1 %1111  ;;  %v3048_v51 = vld [vmem:[%s5631_s4 + $0x208] sm:$0xff] }
 0x218   : >> { %1483 = vmatprep.subr.mxu1 %v3253_v47  ;;  %v4291_v18 = vsel %vm382_vm0, %v4144_v14, %v1112_v54  ;;  %v1150_v14 = vrot.slane %v4187_v25, 2 }
 0x219   : >> { %1484 = vmatpush1.msra.mxu1 %v3045_v12 }
 0x21a   : >> { %1485 = vmatprep.subr.mxu1 %v3253_v47  ;;  %1312 = vmatmul.mubr.f32.gmra.mxu1 %v4291_v18  ;;  %v4319_v25 = vsel %vm548_vm3, %v1149_v57, %v1150_v14 }
 0x21b   : >> { %1486 = vmatpush1.msra.mxu1 %v3044_v55  ;;  %3017 = vmatprep.mubr.msk.f32.mxu1 %vm382_vm0, %v4299_v37  ;;  %v1114_v28 = vpop.permute.xlu0 %1113 }
 0x21c   : >> { %1487 = vmatprep.subr.mxu1 %v3253_v47  ;;  %v4311_v59 = vsel %vm382_vm0, %v4165_v11, %v1114_v28  ;;  %v1153_v11 = vrot.slane %v4207_v58, 2 }
 0x21d   : >> { %1488 = vmatpush1.msra.mxu1 %v3043_v56 }
 0x21e   : >> { %1489 = vmatprep.subr.mxu1 %v3253_v47  ;;  %1317 = vmatmul.mubr.f32.gmra.mxu1 %v4311_v59  ;;  %v4339_v58 = vsel %vm548_vm3, %v1152_v63, %v1153_v11 }
 0x21f   : >> { %1490 = vmatpush1.msra.mxu1 %v3042_v36  ;;  %3018 = vmatprep.mubr.msk.f32.mxu1 %vm382_vm0, %v4319_v25  ;;  %v1116_v3 = vpop.permute.xlu1 %1115 }
 0x220   : >> { %1491 = vmatprep.subr.mxu1 %v3253_v47  ;;  %v4331_v4 = vsel %vm382_vm0, %v4185_v50, %v1116_v3  ;;  %v1156_v50 = vrot.slane %v4228_v49, 2 }
 0x221   : >> { %1492 = vmatpush1.msra.mxu1 %v3041_v62 }
 0x222   : >> { %1493 = vmatprep.subr.mxu1 %v3253_v47  ;;  %1322 = vmatmul.mubr.f32.gmra.mxu1 %v4331_v4  ;;  %v4359_v49 = vsel %vm548_vm3, %v1155_v5, %v1156_v50 }
 0x223   : >> { %1494 = vmatpush1.msra.mxu1 %v3040_v24  ;;  %3019 = vmatprep.mubr.msk.f32.mxu1 %vm382_vm0, %v4339_v58  ;;  %v1118_v6 = vpop.permute.xlu0 %1117 }
 0x224   : >> { %1495 = vmatprep.subr.mxu1 %v3253_v47  ;;  %v4351_v35 = vsel %vm382_vm0, %v4205_v60, %v1118_v6  ;;  %v1159_v60 = vrot.slane %v4243_v23, 2 }
 0x225   : >> { %1496 = vmatpush1.msra.mxu1 %v3039_v53 }
 0x226   : >> { %1497 = vmatprep.subr.mxu1 %v3253_v47  ;;  %1327 = vmatmul.mubr.f32.gmra.mxu1 %v4351_v35  ;;  %v4379_v23 = vsel %vm548_vm3, %v1158_v10, %v1159_v60 }
 0x227   : >> { %1498 = vmatpush1.msra.mxu1 %v3038_v8  ;;  %3020 = vmatprep.mubr.msk.f32.mxu1 %vm382_vm0, %v4359_v49  ;;  %v1120_v43 = vpop.permute.xlu1 %1119 }
 0x228   : >> { %1499 = vmatprep.subr.mxu1 %v3253_v47  ;;  %v4371_v17 = vsel %vm382_vm0, %v4226_v7, %v1120_v43  ;;  %v1162_v7 = vrot.slane %v4256_v38, 2 }
 0x229   : >> { %1500 = vmatpush1.msra.mxu1 %v3037_v9 }
 0x22a   : >> { %1501 = vmatprep.subr.mxu1 %v3253_v47  ;;  %1332 = vmatmul.mubr.f32.gmra.mxu1 %v4371_v17  ;;  %v4399_v38 = vsel %vm548_vm3, %v1161_v30, %v1162_v7 }
 0x22b   : >> { %1502 = vmatpush1.msra.mxu1 %v3036_v27  ;;  %3021 = vmatprep.mubr.msk.f32.mxu1 %vm382_vm0, %v4379_v23  ;;  %v1122_v16 = vpop.permute.xlu0 %1121 }
 0x22c   : >> { %1503 = vmatprep.subr.mxu1 %v3253_v47  ;;  %v4391_v33 = vsel %vm382_vm0, %v4241_v21, %v1122_v16 }
 0x22d   : >> { %1504 = vmatpush1.msra.mxu1 %v3035_v29 }
 0x22e   : >> { %1505 = vmatprep.subr.mxu1 %v3253_v47  ;;  %1337 = vmatmul.mubr.f32.gmra.mxu1 %v4391_v33 }
 0x22f   : >> { %1506 = vmatpush1.msra.mxu1 %v3034_v39  ;;  %3022 = vmatprep.mubr.msk.f32.mxu1 %vm382_vm0, %v4399_v38  ;;  %v1124_v21 = vpop.permute.xlu1 %1123  ;;  %v1108_v41 = vpop.permute.xlu0 %1107 }
 0x230   : >> { %1507 = vmatprep.subr.mxu1 %v3253_v47  ;;  %v4409_v13 = vsel %vm382_vm0, %v4254_v34, %v1124_v21  ;;  %v1167_v32 = vsel %vm382_vm0, %v4217_v42, %v1108_v41  ;;  %v3054_v42 = vld [vmem:[%s5631_s4 + $0x238] sm:$0xff]  ;;  %v3052_v34 = vld [vmem:[%s5631_s4 + $0x228] sm:$0xff] }
 0x231   : >> { %1508 = vmatpush1.msra.mxu1 %v3033_v40  ;;  %1414 = vmatmul.mubr.f32.vlgmr.msra.gmra.mxu0 %v1167_v32 }
 0x232   : >> { %1509 = vmatprep.subr.mxu1 %v3253_v47  ;;  %1342 = vmatmul.mubr.f32.gmra.mxu1 %v4409_v13 }
 0x233   : >> { %1510 = vmatpush1.msra.mxu1 %v3032_v44  ;;  %3024 = vmatprep.mubr.msk.f32.mxu0 %vm382_vm0, %v4139_v22  ;;  %v3053_v22 = vld [vmem:[%s5631_s4 + $0x230] sm:$0xff]  ;;  %v1126_v12 = vpop.permute.xlu1 %1125 }
 0x234   : >> { %1511 = vmatprep.subr.mxu1 %v3253_v47  ;;  %3055 = vmatprep.mubr.msk.f32.mxu1 %vm382_vm0, %v4279_v52  ;;  %v1176_v31 = vsel %vm382_vm0, %v4248_v26, %v1126_v12 }
 0x235   : >> { %1512 = vmatpush1.msra.mxu1 %v3031_v45  ;;  %1419 = vmatmul.mubr.f32.gmra.mxu0 %v4275_v20  ;;  %v3047_v20 = vld [vmem:[%s5631_s4 + $0x200] sm:$0xff] }
 0x236   : >> { %1529 = vmatprep.subr.mxu1 %v3253_v47  ;;  %3025 = vmatprep.mubr.msk.f32.mxu0 %vm382_vm0, %v4279_v52  ;;  %v1165_v52 = vrot.slane %v4250_v48, 2 }
 0x237   : >> { %1530 = vmatpush2.msra.mxu1 %v3054_v42 }
 0x238   : >> { %1531 = vmatprep.subr.mxu1 %v3253_v47 }
 0x239   : >> { %1532 = vmatpush2.msra.mxu1 %v3053_v22  ;;  %1424 = vmatmul.mubr.f32.gmra.mxu0 %v4291_v18  ;;  %v1610_v22 = vld [vmem:[#allocation2 + $0x31] sm:$0xff] }
 0x23a   : >> { %1533 = vmatprep.subr.mxu1 %v3253_v47  ;;  %3026 = vmatprep.mubr.msk.f32.mxu0 %vm382_vm0, %v4299_v37 }
 0x23b   : >> { %1534 = vmatpush2.msra.mxu1 %v3052_v34 }
 0x23c   : >> { %1535 = vmatprep.subr.mxu1 %v3253_v47 }
 0x23d   : >> { %1536 = vmatpush2.msra.mxu1 %v3051_v46  ;;  %1429 = vmatmul.mubr.f32.gmra.mxu0 %v4311_v59 }
 0x23e   : >> { %1537 = vmatprep.subr.mxu1 %v3253_v47  ;;  %3027 = vmatprep.mubr.msk.f32.mxu0 %vm382_vm0, %v4319_v25 }
 0x23f   : >> { %1538 = vmatpush2.msra.mxu1 %v3050_v19 }
 0x240   : >> { %1539 = vmatprep.subr.mxu1 %v3253_v47 }
 0x241   : >> { %1540 = vmatpush2.msra.mxu1 %v3049_v61  ;;  %1434 = vmatmul.mubr.f32.gmra.mxu0 %v4331_v4 }
 0x242   : >> { %1541 = vmatprep.subr.mxu1 %v3253_v47  ;;  %3028 = vmatprep.mubr.msk.f32.mxu0 %vm382_vm0, %v4339_v58 }
 0x243   : >> { %1542 = vmatpush2.msra.mxu1 %v3048_v51 }
 0x244   : >> { %1543 = vmatprep.subr.mxu1 %v3253_v47  ;;  %v1164_v47 = vrot.slane %v4248_v26, 2 }
 0x245   : >> { %1544 = vmatpush2.msra.mxu1 %v3047_v20  ;;  %1439 = vmatmul.mubr.f32.gmra.mxu0 %v4351_v35 }
 0x246   : >> { %1546 = vmatmul.mubr.f32.vlgmr.msra.gmra.mxu1 %v4291_v18  ;;  %3029 = vmatprep.mubr.msk.f32.mxu0 %vm382_vm0, %v4359_v49  ;;  %v1166_v15 = vsel %vm548_vm3, %v1164_v47, %v1165_v52  ;;  %v1611_v47 = vld [vmem:[#allocation2 + $0x41] sm:$0xff] }
 0x247   : >> { %3056 = vmatprep.mubr.msk.f32.mxu1 %vm382_vm0, %v4299_v37  ;;  %1947 = vmatprep.subr.mxu1 (%p443_p4), %v3251_v1 }
 0x249   : >> { %1444 = vmatmul.mubr.f32.gmra.mxu0 %v4371_v17 }
 0x24a   : >> { %1551 = vmatmul.mubr.f32.gmra.mxu1 %v4311_v59  ;;  %3030 = vmatprep.mubr.msk.f32.mxu0 %vm382_vm0, %v4379_v23 }
 0x24b   : >> { %3057 = vmatprep.mubr.msk.f32.mxu1 %vm382_vm0, %v4319_v25 }
 0x24d   : >> { %1449 = vmatmul.mubr.f32.gmra.mxu0 %v4391_v33 }
 0x24e   : >> { %1556 = vmatmul.mubr.f32.gmra.mxu1 %v4331_v4 }
 0x24f   : >> { %3058 = vmatprep.mubr.msk.f32.mxu1 %vm382_vm0, %v4339_v58 }
 0x252   : >> { %1561 = vmatmul.mubr.f32.gmra.mxu1 %v4351_v35 }
 0x253   : >> { %3059 = vmatprep.mubr.msk.f32.mxu1 %vm382_vm0, %v4359_v49 }
 0x256   : >> { %1566 = vmatmul.mubr.f32.gmra.mxu1 %v4371_v17  ;;  %v1608_v17 = vld [vmem:[#allocation2 + $0x11] sm:$0xff] }
 0x257   : >> { %3060 = vmatprep.mubr.msk.f32.mxu1 %vm382_vm0, %v4379_v23 }
 0x25a   : >> { %1571 = vmatmul.mubr.f32.gmra.mxu1 %v4391_v33 }
 0x25b   : >> { %3061 = vmatprep.mubr.msk.f32.mxu1 %vm382_vm0, %v4399_v38  ;;  %v1609_v38 = vld [vmem:[#allocation2 + $0x21] sm:$0xff] }
 0x25e   : >> { %1576 = vmatmul.mubr.f32.gmra.mxu1 %v4409_v13 }
 0x25f   : >> { %3062 = vmatprep.mubr.msk.f32.mxu1 %vm382_vm0, %v1166_v15 }
 0x262   : >> { %1581 = vmatmul.mubr.f32.gmra.mxu1 %v1176_v31 }
 0x2d6   : >> { %v1308_v54 = vpop.f32.mrf.mxu1 }
 0x2d8   : >> { %v1310_v18 = vpop.f32.mrf.mxu1 }
 0x2da   : >> { %v1313_v55 = vpop.f32.mrf.mxu1 }
 0x2dc   : >> { %v1315_v48 = vpop.f32.mrf.mxu1 }
 0x2de   : >> { %v1318_v37 = vpop.f32.mrf.mxu1 }
 0x2e0   : >> { %v1320_v56 = vpop.f32.mrf.mxu1 }
 0x2e2   : >> { %v1323_v57 = vpop.f32.mrf.mxu1 }
 0x2e4   : >> { %v1325_v14 = vpop.f32.mrf.mxu1 }
 0x2e6   : >> { %v1328_v28 = vpop.f32.mrf.mxu1 }
 0x2e8   : >> { %v1330_v59 = vpop.f32.mrf.mxu1 }
 0x2ea   : >> { %v1333_v36 = vpop.f32.mrf.mxu1 }
 0x2ec   : >> { %v1335_v25 = vpop.f32.mrf.mxu1 }
 0x2ed   : >> { %v1613_v25 = vld [vmem:[#allocation2 + $0x61] sm:$0xff] }
 0x2ee   : >> { %v4502_v62 = vpop.f32.mrf.mxu1 }
 0x2f0   : >> { %v1340_v63 = vpop.f32.mrf.mxu1 }
 0x2f1   : >> { %v1415_v11 = vpop.f32.mrf.mxu0 }
 0x2f2   : >> { %v4504_v26 = vpop.f32.mrf.mxu1  ;;  %v1416_v49 = vadd.f32 %v1415_v11, %v1308_v54 }
 0x2f3   : >> { %v1417_v3 = vpop.f32.mrf.mxu0 }
 0x2f4   : >> { %v1345_v4 = vpop.f32.mrf.mxu1 }
 0x2f5   : >> { %v1420_v24 = vpop.f32.mrf.mxu0 }
 0x2f6   : >> { %v1421_v23 = vadd.f32 %v1420_v24, %v1313_v55  ;;  %v1612_v55 = vld [vmem:[#allocation2 + $0x51] sm:$0xff] }
 0x2f7   : >> { %v1422_v58 = vpop.f32.mrf.mxu0 }
 0x2f8   : >> { %v1614_v58 = vld [vmem:[#allocation2 + $0x71] sm:$0xff] }
 0x2f9   : >> { %v1425_v53 = vpop.f32.mrf.mxu0 }
 0x2fa   : >> { %v1426_v21 = vadd.f32 %v1425_v53, %v1318_v37 }
 0x2fb   : >> { %v1427_v5 = vpop.f32.mrf.mxu0 }
 0x2fd   : >> { %v1430_v50 = vpop.f32.mrf.mxu0 }
 0x2fe   : >> { %v1431_v46 = vadd.f32 %v1430_v50, %v1323_v57 }
 0x2ff   : >> { %v1432_v6 = vpop.f32.mrf.mxu0 }
 0x301   : >> { %v1435_v35 = vpop.f32.mrf.mxu0 }
 0x302   : >> { %v1436_v12 = vadd.f32 %v1435_v35, %v1328_v28 }
 0x303   : >> { %v1437_v8 = vpop.f32.mrf.mxu0 }
 0x304   : >> { %v1615_v8 = vld [vmem:[#allocation2 + $0x81] sm:$0xff] }
 0x305   : >> { %v1440_v9 = vpop.f32.mrf.mxu0 }
 0x306   : >> { %v1547_v10 = vpop.f32.mrf.mxu1  ;;  %v1441_v37 = vadd.f32 %v1440_v9, %v1333_v36 }
 0x307   : >> { %v1586_v60 = vadd.f32 %v1547_v10, %v1416_v49  ;;  %v1442_v43 = vpop.f32.mrf.mxu0 }
 0x308   : >> { %v1549_v27 = vpop.f32.mrf.mxu1 }
 0x309   : >> { %v1600_v29 = vadd.f32 %v3412_v2, %v1586_v60  ;;  %v1445_v30 = vpop.f32.mrf.mxu0 }
 0x30a   : >> { %v1552_v7 = vpop.f32.mrf.mxu1  ;;  %v1446_v28 = vadd.f32 %v1445_v30, %v4502_v62 }
 0x30b   : >> { %v1616_v16 = vadd.f32 %v1608_v17, %v1600_v29  ;;  %v1587_v33 = vadd.f32 %v1552_v7, %v1421_v23  ;;  %v1447_v39 = vpop.f32.mrf.mxu0 }
 0x30c   : >> { %v1554_v40 = vpop.f32.mrf.mxu1 }
 0x30d   : >> { %1624 = vst.msk [vmem:[#allocation2 + $0x11] sm:$0xff] %vm382_vm0, %v1616_v16  ;;  %v1601_v41 = vadd.f32 %v3412_v2, %v1587_v33  ;;  %v1450_v13 = vpop.f32.mrf.mxu0 }
 0x30e   : >> { %v1557_v32 = vpop.f32.mrf.mxu1  ;;  %v1451_v53 = vadd.f32 %v1450_v13, %v4504_v26 }
 0x30f   : >> { %v1617_v44 = vadd.f32 %v1609_v38, %v1601_v41  ;;  %v1588_v45 = vadd.f32 %v1557_v32, %v1426_v21  ;;  %v1452_v42 = vpop.f32.mrf.mxu0 }
 0x310   : >> { %v1559_v34 = vpop.f32.mrf.mxu1 }
 0x311   : >> { %1625 = vst.msk [vmem:[#allocation2 + $0x21] sm:$0xff] %vm382_vm0, %v1617_v44  ;;  %v1602_v19 = vadd.f32 %v3412_v2, %v1588_v45 }
 0x312   : >> { %v1562_v61 = vpop.f32.mrf.mxu1 }
 0x313   : >> { %v1618_v51 = vadd.f32 %v1610_v22, %v1602_v19  ;;  %v1589_v20 = vadd.f32 %v1562_v61, %v1431_v46  ;;  %v3079_v46 = vld [vmem:[%s5633_s6 + $0x138] sm:$0xff] (%p443_p4)  ;;  %v3078_v61 = vld [vmem:[%s5633_s6 + $0x130] sm:$0xff] (%p443_p4) }
 0x314   : >> { %v1564_v52 = vpop.f32.mrf.mxu1  ;;  %v4527_v26 = vld [vmem:[#allocation2 + $0x10] sm:$0xff] (%p443_p4)  ;;  %v1636_v10 = vld [vmem:[#allocation2 + $0x18] sm:$0x3] (%p443_p4)  ;;  %1841 = vmatpush1.msra.mxu0 (%p443_p4), %v3079_v46  ;;  %v1780_v46 = vld [vmem:[%s5633_s6 + $0x28] sm:$0xff] (%p443_p4) }
 0x315   : >> { %1626 = vst.msk [vmem:[#allocation2 + $0x31] sm:$0xff] %vm382_vm0, %v1618_v51  ;;  %v1603_v15 = vadd.f32 %v3412_v2, %v1589_v20  ;;  %v1677_v43 = vrot.slane (%p443_p4), %v4527_v26, 1  ;;  %v1678_v17 = vrot.slane (%p443_p4), %v1636_v10, 1  ;;  %v1739_v52 = vrot.slane (%p443_p4), %v1636_v10, 2  ;;  %1842 = vmatprep.subr.mxu0 (%p443_p4), %v3251_v1  ;;  %v1786_v10 = vld [vmem:[%s5633_s6 + $0x58] sm:$0xff] (%p443_p4) }
 0x316   : >> { %v1567_v31 = vpop.f32.mrf.mxu1  ;;  %1843 = vmatpush1.msra.mxu0 (%p443_p4), %v3078_v61  ;;  %v1779_v61 = vld [vmem:[%s5633_s6 + $0x20] sm:$0xff] (%p443_p4) }
 0x317   : >> { %v1619_v54 = vadd.f32 %v1611_v47, %v1603_v15  ;;  %v1590_v18 = vadd.f32 %v1567_v31, %v1436_v12  ;;  %v1738_v47 = vrot.slane (%p443_p4), %v4527_v26, 2  ;;  %v4580_v15 = vld [vmem:[#allocation2] sm:$0xff] (%p443_p4)  ;;  %v4582_v31 = vld [vmem:[#allocation2 + $0x8] sm:$0x3] (%p443_p4)  ;;  %1844 = vmatprep.subr.mxu0 (%p443_p4), %v3251_v1 }
 0x318   : >> { %v1569_v48 = vpop.f32.mrf.mxu1  ;;  %v4529_v60 = vld [vmem:[#allocation2 + $0x20] sm:$0xff] (%p443_p4)  ;;  %v4534_v27 = vld [vmem:[#allocation2 + $0x28] sm:$0x3] (%p443_p4) }
 0x319   : >> { %1627 = vst.msk [vmem:[#allocation2 + $0x41] sm:$0xff] %vm382_vm0, %v1619_v54  ;;  %v1604_v56 = vadd.f32 %v3412_v2, %v1590_v18  ;;  %v1680_v23 = vrot.slane (%p443_p4), %v4529_v60, 1  ;;  %v1681_v30 = vrot.slane (%p443_p4), %v4534_v27, 1 }
 0x31a   : >> { %v1572_v57 = vpop.f32.mrf.mxu1 }
 0x31b   : >> { %v1620_v14 = vadd.f32 %v1612_v55, %v1604_v56  ;;  %v1591_v59 = vadd.f32 %v1572_v57, %v1441_v37  ;;  %v1682_v40 = vsel (%p443_p4), %vm487_vm2, %v1680_v23, %v1681_v30  ;;  %v3077_v56 = vld [vmem:[%s5633_s6 + $0x128] sm:$0xff] (%p443_p4)  ;;  %v4596_v57 = vsel (%p443_p4), %vm548_vm3, %v1738_v47, %v1739_v52  ;;  %v1785_v23 = vld [vmem:[%s5633_s6 + $0x50] sm:$0xff] (%p443_p4)  ;;  %v3071_v30 = vld [vmem:[%s5633_s6 + $0xf8] sm:$0xff] (%p443_p4) }
 0x31c   : >> { %v1574_v63 = vpop.f32.mrf.mxu1  ;;  %v4549_v39 = vld [vmem:[#allocation2 + $0x30] sm:$0xff] (%p443_p4)  ;;  %v4551_v38 = vld [vmem:[#allocation2 + $0x38] sm:$0x3] (%p443_p4)  ;;  %3088 = vmatprep.mubr.msk.f32.mxu0 (%p443_p4), %vm382_vm0, %v4596_v57  ;;  %1845 = vmatpush1.msra.mxu0 (%p443_p4), %v3077_v56  ;;  %v3064_v47 = vld [vmem:[%s5633_s6 + $0xc0] sm:$0xff] (%p443_p4) }
 0x31d   : >> { %1628 = vst.msk [vmem:[#allocation2 + $0x51] sm:$0xff] %vm382_vm0, %v1620_v14  ;;  %v1605_v11 = vadd.f32 %v3412_v2, %v1591_v59  ;;  %v1683_v41 = vrot.slane (%p443_p4), %v4549_v39, 1  ;;  %v1684_v13 = vrot.slane (%p443_p4), %v4551_v38, 1  ;;  %v1790_v14 = vld [vmem:[%s5633_s6 + $0x78] sm:$0xff] (%p443_p4)  ;;  %v1674_v59 = vrot.slane (%p443_p4), %v4580_v15, 1  ;;  %v3076_v63 = vld [vmem:[%s5633_s6 + $0x120] sm:$0xff] (%p443_p4)  ;;  %1846 = vmatprep.subr.mxu0 (%p443_p4), %v3251_v1 }
 0x31e   : >> { %v1577_v3 = vpop.f32.mrf.mxu1  ;;  %1948 = vmatpush1.msra.mxu1 (%p443_p4), %v1790_v14  ;;  %1847 = vmatpush1.msra.mxu0 (%p443_p4), %v3076_v63  ;;  %v1777_v52 = vld [vmem:[%s5633_s6 + $0x10] sm:$0xff] (%p443_p4)  ;;  %v3085_v56 = vld [vmem:[%s5633_s6 + $0x168] sm:$0xff] (%p443_p4)  ;;  %v1798_v14 = vld [vmem:[%s5633_s6 + $0xb8] sm:$0xff] (%p443_p4) }
 0x31f   : >> { %v1621_v4 = vadd.f32 %v1613_v25, %v1605_v11  ;;  %v1592_v24 = vadd.f32 %v1577_v3, %v1446_v28  ;;  %v1685_v19 = vsel (%p443_p4), %vm487_vm2, %v1683_v41, %v1684_v13  ;;  %v1675_v25 = vrot.slane (%p443_p4), %v4582_v31, 1  ;;  %v1789_v28 = vld [vmem:[%s5633_s6 + $0x70] sm:$0xff] (%p443_p4)  ;;  %1949 = vmatprep.subr.mxu1 (%p443_p4), %v3251_v1  ;;  %1848 = vmatprep.subr.mxu0 (%p443_p4), %v3251_v1  ;;  %v1782_v41 = vld [vmem:[%s5633_s6 + $0x38] sm:$0xff] (%p443_p4)  ;;  %v3068_v13 = vld [vmem:[%s5633_s6 + $0xe0] sm:$0xff] (%p443_p4) }
 0x320   : >> { %v1579_v36 = vpop.f32.mrf.mxu1  ;;  %v4557_v32 = vld [vmem:[#allocation2 + $0x40] sm:$0xff] (%p443_p4)  ;;  %v4559_v44 = vld [vmem:[#allocation2 + $0x48] sm:$0x3] (%p443_p4)  ;;  %1710 = vrot.lane.b32.xlu1 (%p443_p4), %v1685_v19, %s3254_s30  ;;  %1950 = vmatpush1.msra.mxu1 (%p443_p4), %v1789_v28  ;;  %v3066_v19 = vld [vmem:[%s5633_s6 + $0xd0] sm:$0xff] (%p443_p4) }
 0x321   : >> { %1629 = vst.msk [vmem:[#allocation2 + $0x61] sm:$0xff] %vm382_vm0, %v1621_v4  ;;  %v1606_v5 = vadd.f32 %v3412_v2, %v1592_v24  ;;  %v1686_v45 = vrot.slane (%p443_p4), %v4557_v32, 1  ;;  %v1687_v42 = vrot.slane (%p443_p4), %v4559_v44, 1  ;;  %v4621_v36 = vld [vmem:[#allocation2 + $0x98] sm:$0x3] (%p443_p4)  ;;  %1951 = vmatprep.subr.mxu1 (%p443_p4), %v3251_v1  ;;  %v1796_v28 = vld [vmem:[%s5633_s6 + $0xa8] sm:$0xff] (%p443_p4) }
 0x322   : >> { %v1582_v50 = vpop.f32.mrf.mxu1  ;;  %v3083_v63 = vld [vmem:[%s5633_s6 + $0x158] sm:$0xff] (%p443_p4) }
 0x323   : >> { %v1622_v6 = vadd.f32 %v1614_v58, %v1606_v5  ;;  %v1593_v35 = vadd.f32 %v1582_v50, %v1451_v53  ;;  %v1688_v54 = vsel (%p443_p4), %vm487_vm2, %v1686_v45, %v1687_v42  ;;  %v4619_v58 = vld [vmem:[#allocation2 + $0x90] sm:$0xff] (%p443_p4)  ;;  %v3075_v53 = vld [vmem:[%s5633_s6 + $0x118] sm:$0xff] (%p443_p4)  ;;  %v1788_v5 = vld [vmem:[%s5633_s6 + $0x68] sm:$0xff] (%p443_p4)  ;;  %v1676_v50 = vsel (%p443_p4), %vm487_vm2, %v1674_v59, %v1675_v25 }
 0x324   : >> { %v1584_v62 = vpop.f32.mrf.mxu1  ;;  %v4537_v29 = vld [vmem:[#allocation2 + $0x50] sm:$0xff] (%p443_p4)  ;;  %v4540_v0 = vld [vmem:[#allocation2 + $0x58] sm:$0x3] (%p443_p4)  ;;  %1712 = vrot.lane.b32.xlu1 (%p443_p4), %v1688_v54, %s3254_s30  ;;  %1849 = vmatpush1.msra.mxu0 (%p443_p4), %v3075_v53  ;;  %v1776_v54 = vld [vmem:[%s5633_s6 + $0x8] sm:$0xff] (%p443_p4)  ;;  %v1736_v53 = vrot.slane (%p443_p4), %v4582_v31, 2 }
 0x325   : >> { %1630 = vst.msk [vmem:[#allocation2 + $0x71] sm:$0xff] %vm382_vm0, %v1622_v6  ;;  %v1607_v49 = vadd.f32 %v3412_v2, %v1593_v35  ;;  %445 = sbr.rel (!%p443_p4) target bundleno = 36 (0x24), region = 111  ;;  %v1679_v2 = vsel (%p443_p4), %vm487_vm2, %v1677_v43, %v1678_v17  ;;  %v1689_v16 = vrot.slane (%p443_p4), %v4537_v29, 1  ;;  %v1690_v21 = vrot.slane (%p443_p4), %v4540_v0, 1  ;;  %v3074_v62 = vld [vmem:[%s5633_s6 + $0x110] sm:$0xff] (%p443_p4)  ;;  %1952 = vmatpush1.msra.mxu1 (%p443_p4), %v1788_v5  ;;  %1850 = vmatprep.subr.mxu0 (%p443_p4), %v3251_v1  ;;  %v3072_v17 = vld [vmem:[%s5633_s6 + $0x100] sm:$0xff] (%p443_p4) }
 0x326   : > { %1706 = vrot.lane.b32.xlu0 (%p443_p4), %v1679_v2, %s3254_s30  ;;  %v1701_v35 = vrot.slane (%p443_p4), %v4619_v58, 1  ;;  %1953 = vmatprep.subr.mxu1 (%p443_p4), %v3251_v1  ;;  %v1784_v2 = vld [vmem:[%s5633_s6 + $0x48] sm:$0xff] (%p443_p4)  ;;  %v1781_v45 = vld [vmem:[%s5633_s6 + $0x30] sm:$0xff] (%p443_p4)  ;;  %v3067_v42 = vld [vmem:[%s5633_s6 + $0xd8] sm:$0xff] (%p443_p4) }
 0x327   : >> { %v1623_v9 = vadd.f32 %v1615_v8, %v1607_v49  ;;  %v1691_v12 = vsel (%p443_p4), %vm487_vm2, %v1689_v16, %v1690_v21  ;;  %v1702_v8 = vrot.slane (%p443_p4), %v4621_v36, 1  ;;  %v1787_v49 = vld [vmem:[%s5633_s6 + $0x60] sm:$0xff] (%p443_p4)  ;;  %1851 = vmatpush1.msra.mxu0 (%p443_p4), %v3074_v62  ;;  %v3070_v16 = vld [vmem:[%s5633_s6 + $0xf0] sm:$0xff] (%p443_p4)  ;;  %v3069_v21 = vld [vmem:[%s5633_s6 + $0xe8] sm:$0xff] (%p443_p4)  ;;  %v1741_v62 = vrot.slane (%p443_p4), %v4529_v60, 2 }
 0x328   : > { %v4563_v22 = vld [vmem:[#allocation2 + $0x60] sm:$0xff] (%p443_p4)  ;;  %v4565_v34 = vld [vmem:[#allocation2 + $0x68] sm:$0x3] (%p443_p4)  ;;  %1954 = vmatpush1.msra.mxu1 (%p443_p4), %v1787_v49  ;;  %1852 = vmatprep.subr.mxu0 (%p443_p4), %v3251_v1  ;;  %v1797_v25 = vld [vmem:[%s5633_s6 + $0xb0] sm:$0xff] (%p443_p4)  ;;  %v1742_v49 = vrot.slane (%p443_p4), %v4534_v27, 2 }
 0x329   : >> { %1631 = vst.msk [vmem:[#allocation2 + $0x81] sm:$0xff] %vm382_vm0, %v1623_v9  ;;  %v1692_v18 = vrot.slane (%p443_p4), %v4563_v22, 1  ;;  %v1693_v55 = vrot.slane (%p443_p4), %v4565_v34, 1  ;;  %v3073_v9 = vld [vmem:[%s5633_s6 + $0x108] sm:$0xff] (%p443_p4)  ;;  %v1703_v43 = vsel (%p443_p4), %vm487_vm2, %v1701_v35, %v1702_v8  ;;  %1955 = vmatprep.subr.mxu1 (%p443_p4), %v3251_v1  ;;  %v3084_v59 = vld [vmem:[%s5633_s6 + $0x160] sm:$0xff] (%p443_p4)  ;;  %v1794_v5 = vld [vmem:[%s5633_s6 + $0x98] sm:$0xff] (%p443_p4) }
 0x32a   : > { %1708 = vrot.lane.b32.xlu0 %v1682_v40, %s3254_s30  ;;  %1853 = vmatpush1.msra.mxu0 %v3073_v9  ;;  %v1783_v40 = vld [vmem:[%s5633_s6 + $0x40] sm:$0xff]  ;;  %v1793_v31 = vld [vmem:[%s5633_s6 + $0x90] sm:$0xff]  ;;  %v1792_v35 = vld [vmem:[%s5633_s6 + $0x88] sm:$0xff] }
 0x32b   : > { %v1694_v3 = vsel %vm487_vm2, %v1692_v18, %v1693_v55  ;;  %1956 = vmatpush1.msra.mxu1 %v1786_v10  ;;  %1854 = vmatprep.subr.mxu0 %v3251_v1  ;;  %v3086_v18 = vld [vmem:[%s5633_s6 + $0x170] sm:$0xff]  ;;  %v1775_v55 = vld [vmem:[%s5633_s6] sm:$0xff]  ;;  %v3119_v10 = vld [vmem:[%s5633_s6 + $0x1f8] sm:$0xff] }
 0x32c   : > { %v4543_v7 = vld [vmem:[#allocation2 + $0x70] sm:$0xff]  ;;  %v4547_v33 = vld [vmem:[#allocation2 + $0x78] sm:$0x3]  ;;  %1716 = vrot.lane.b32.xlu1 %v1694_v3, %s3254_s30  ;;  %1855 = vmatpush1.msra.mxu0 %v3072_v17  ;;  %v1795_v3 = vld [vmem:[%s5633_s6 + $0xa0] sm:$0xff]  ;;  %v1744_v17 = vrot.slane %v4549_v39, 2 }
 0x32d   : > { %v1695_v51 = vrot.slane %v4543_v7, 1  ;;  %v1696_v20 = vrot.slane %v4547_v33, 1  ;;  %1957 = vmatprep.subr.mxu1 %v3251_v1  ;;  %1856 = vmatprep.subr.mxu0 %v3251_v1  ;;  %v1791_v8 = vld [vmem:[%s5633_s6 + $0x80] sm:$0xff]  ;;  %v3118_v27 = vld [vmem:[%s5633_s6 + $0x1f0] sm:$0xff] }
 0x32e   : > { %1714 = vrot.lane.b32.xlu0 %v1691_v12, %s3254_s30  ;;  %1958 = vmatpush1.msra.mxu1 %v1785_v23  ;;  %v3087_v12 = vld [vmem:[%s5633_s6 + $0x178] sm:$0xff]  ;;  %v1745_v23 = vrot.slane %v4551_v38, 2  ;;  %v3117_v38 = vld [vmem:[%s5633_s6 + $0x1e8] sm:$0xff] }
 0x32f   : > { %v1697_v11 = vsel %vm487_vm2, %v1695_v51, %v1696_v20  ;;  %1857 = vmatpush1.msra.mxu0 %v3071_v30  ;;  %1959 = vmatprep.subr.mxu1 %v3251_v1  ;;  %v3065_v51 = vld [vmem:[%s5633_s6 + $0xc8] sm:$0xff]  ;;  %v1778_v20 = vld [vmem:[%s5633_s6 + $0x18] sm:$0xff] }
 0x330   : > { %v4588_v48 = vld [vmem:[#allocation2 + $0x80] sm:$0xff]  ;;  %v4590_v37 = vld [vmem:[#allocation2 + $0x88] sm:$0x3]  ;;  %1858 = vmatprep.subr.mxu0 %v3251_v1  ;;  %1960 = vmatpush1.msra.mxu1 %v1784_v2 }
 0x331   : > { %v1698_v4 = vrot.slane %v4588_v48, 1  ;;  %v1699_v24 = vrot.slane %v4590_v37, 1  ;;  %1859 = vmatpush1.msra.mxu0 %v3070_v16  ;;  %1961 = vmatprep.subr.mxu1 %v3251_v1 }
 0x332   : > { %1718 = vrot.lane.b32.xlu0 %v1697_v11, %s3254_s30  ;;  %1860 = vmatprep.subr.mxu0 %v3251_v1  ;;  %v3082_v11 = vld [vmem:[%s5633_s6 + $0x150] sm:$0xff] }
 0x333   : > { %v1700_v6 = vsel %vm487_vm2, %v1698_v4, %v1699_v24  ;;  %1962 = vmatpush1.msra.mxu1 %v1783_v40  ;;  %1861 = vmatpush1.msra.mxu0 %v3069_v21  ;;  %v3081_v4 = vld [vmem:[%s5633_s6 + $0x148] sm:$0xff]  ;;  %v1735_v24 = vrot.slane %v4580_v15, 2  ;;  %v1747_v40 = vrot.slane %v4557_v32, 2  ;;  %v1748_v21 = vrot.slane %v4559_v44, 2  ;;  %v3115_v44 = vld [vmem:[%s5633_s6 + $0x1d8] sm:$0xff] }
 0x334   : > { %1720 = vrot.lane.b32.xlu1 %v1700_v6, %s3254_s30  ;;  %1963 = vmatprep.subr.mxu1 %v3251_v1 }
 0x335   : > { %1862 = vmatprep.subr.mxu0 %v3251_v1  ;;  %1964 = vmatpush1.msra.mxu1 %v1782_v41  ;;  %v1737_v6 = vsel %vm548_vm3, %v1735_v24, %v1736_v53 }
 0x336   : > { %1704 = vrot.lane.b32.xlu0 %v1676_v50, %s3254_s30  ;;  %1863 = vmatpush1.msra.mxu0 %v3068_v13  ;;  %v3080_v50 = vld [vmem:[%s5633_s6 + $0x140] sm:$0xff] }
 0x337   : > { %1965 = vmatprep.subr.mxu1 %v3251_v1  ;;  %1864 = vmatprep.subr.mxu0 %v3251_v1  ;;  %v3116_v13 = vld [vmem:[%s5633_s6 + $0x1e0] sm:$0xff] }
 0x338   : > { %1722 = vrot.lane.b32.xlu1 %v1703_v43, %s3254_s30  ;;  %1966 = vmatpush1.msra.mxu1 %v1781_v45  ;;  %v4814_v43 = vsel %vm548_vm3, %v1741_v62, %v1742_v49  ;;  %v3121_v62 = vld [vmem:[%s5633_s6 + $0x208] sm:$0xff]  ;;  %v3120_v49 = vld [vmem:[%s5633_s6 + $0x200] sm:$0xff] }
 0x339   : > { %1865 = vmatpush1.msra.mxu0 %v3067_v42  ;;  %1967 = vmatprep.subr.mxu1 %v3251_v1 }
 0x33a   : > { %1866 = vmatprep.subr.mxu0 %v3251_v1  ;;  %1968 = vmatpush1.msra.mxu1 %v1780_v46  ;;  %v4857_v46 = vsel %vm548_vm3, %v1747_v40, %v1748_v21  ;;  %v2393_v40 = vld [vmem:[%s5635_s8 + $0x68] sm:$0xff] }
 0x33b   : > { %1867 = vmatpush1.msra.mxu0 %v3066_v19  ;;  %1969 = vmatprep.subr.mxu1 %v3251_v1  ;;  %v1750_v19 = vrot.slane %v4537_v29, 2  ;;  %v3146_v21 = vld [vmem:[%s5635_s8 + $0x108] sm:$0xff] }
 0x33c   : > { %1868 = vmatprep.subr.mxu0 %v3251_v1  ;;  %1970 = vmatpush1.msra.mxu1 %v1779_v61  ;;  %v1751_v61 = vrot.slane %v4540_v0, 2 }
 0x33d   : > { %1869 = vmatpush1.msra.mxu0 %v3065_v51  ;;  %1971 = vmatprep.subr.mxu1 %v3251_v1 }
 0x33e   : > { %1870 = vmatprep.subr.mxu0 %v3251_v1  ;;  %1972 = vmatpush1.msra.mxu1 %v1778_v20  ;;  %v3113_v20 = vld [vmem:[%s5633_s6 + $0x1c8] sm:$0xff] }
 0x33f   : > { %1871 = vmatpush1.msra.mxu0 %v3064_v47  ;;  %1973 = vmatprep.subr.mxu1 %v3251_v1  ;;  %v4877_v47 = vsel %vm548_vm3, %v1750_v19, %v1751_v61  ;;  %v3142_v19 = vld [vmem:[%s5635_s8 + $0xe8] sm:$0xff]  ;;  %v2388_v61 = vld [vmem:[%s5635_s8 + $0x40] sm:$0xff] }
 0x340   : > { %1888 = vmatprep.subr.mxu0 %v3251_v1  ;;  %1974 = vmatpush1.msra.mxu1 %v1777_v52  ;;  %v1753_v52 = vrot.slane %v4563_v22, 2 }
 0x341   : > { %1889 = vmatpush2.msra.mxu0 %v3087_v12  ;;  %1975 = vmatprep.subr.mxu1 %v3251_v1  ;;  %v1754_v12 = vrot.slane %v4565_v34, 2  ;;  %v3110_v34 = vld [vmem:[%s5633_s6 + $0x1b0] sm:$0xff] }
 0x342   : > { %1890 = vmatprep.subr.mxu0 %v3251_v1  ;;  %1976 = vmatpush1.msra.mxu1 %v1776_v54 }
 0x343   : > { %1891 = vmatpush2.msra.mxu0 %v3086_v18  ;;  %1977 = vmatprep.subr.mxu1 %v3251_v1  ;;  %v3111_v18 = vld [vmem:[%s5633_s6 + $0x1b8] sm:$0xff] }
 0x344   : > { %1892 = vmatprep.subr.mxu0 %v3251_v1  ;;  %1978 = vmatpush1.msra.mxu1 %v1775_v55 }
 0x345   : > { %1893 = vmatpush2.msra.mxu0 %v3085_v56  ;;  %1995 = vmatprep.subr.mxu1 %v3251_v1 }
 0x346   : > { %1894 = vmatprep.subr.mxu0 %v3251_v1  ;;  %1996 = vmatpush2.msra.mxu1 %v1798_v14 }
 0x347   : > { %1895 = vmatpush2.msra.mxu0 %v3084_v59  ;;  %1997 = vmatprep.subr.mxu1 %v3251_v1  ;;  %v4903_v59 = vsel %vm548_vm3, %v1753_v52, %v1754_v12  ;;  %v3160_v52 = vld [vmem:[%s5635_s8 + $0x178] sm:$0xff]  ;;  %v3159_v12 = vld [vmem:[%s5635_s8 + $0x170] sm:$0xff] }
 0x348   : > { %1896 = vmatprep.subr.mxu0 %v3251_v1  ;;  %1998 = vmatpush2.msra.mxu1 %v1797_v25  ;;  %v1756_v25 = vrot.slane %v4543_v7, 2 }
 0x349   : > { %1897 = vmatpush2.msra.mxu0 %v3083_v63  ;;  %1999 = vmatprep.subr.mxu1 %v3251_v1 }
 0x34a   : > { %1898 = vmatprep.subr.mxu0 %v3251_v1  ;;  %2000 = vmatpush2.msra.mxu1 %v1796_v28  ;;  %v1759_v28 = vrot.slane %v4588_v48, 2 }
 0x34b   : > { %1899 = vmatpush2.msra.mxu0 %v3082_v11  ;;  %2001 = vmatprep.subr.mxu1 %v3251_v1  ;;  %v1760_v11 = vrot.slane %v4590_v37, 2  ;;  %v3106_v37 = vld [vmem:[%s5633_s6 + $0x190] sm:$0xff] }
 0x34c   : > { %1900 = vmatprep.subr.mxu0 %v3251_v1  ;;  %2002 = vmatpush2.msra.mxu1 %v1795_v3 }
 0x34d   : > { %1901 = vmatpush2.msra.mxu0 %v3081_v4  ;;  %2003 = vmatprep.subr.mxu1 %v3251_v1  ;;  %v4949_v24 = vsel %vm548_vm3, %v1759_v28, %v1760_v11 }
 0x34e   : > { %1902 = vmatprep.subr.mxu0 %v3251_v1  ;;  %2004 = vmatpush2.msra.mxu1 %v1794_v5  ;;  %v3104_v5 = vld [vmem:[%s5633_s6 + $0x180] sm:$0xff] }
 0x34f   : > { %1903 = vmatpush2.msra.mxu0 %v3080_v50  ;;  %2005 = vmatprep.subr.mxu1 %v3251_v1  ;;  %v3126_v50 = vld [vmem:[%s5633_s6 + $0x230] sm:$0xff] }
 0x350   : > { %2079 = vmatprep.subr.mxu0 %v3251_v1  ;;  %2006 = vmatpush2.msra.mxu1 %v1793_v31  ;;  %v3125_v31 = vld [vmem:[%s5633_s6 + $0x228] sm:$0xff] }
 0x351   : > { %2007 = vmatprep.subr.mxu1 %v3251_v1  ;;  %3096 = vmatprep.mubr.msk.f32.mxu1 %vm382_vm0, %v1737_v6  ;;  %v3124_v6 = vld [vmem:[%s5633_s6 + $0x220] sm:$0xff] }
 0x352   : > { %2008 = vmatpush2.msra.mxu1 %v1792_v35  ;;  %v3123_v35 = vld [vmem:[%s5633_s6 + $0x218] sm:$0xff] }
 0x353   : > { %2009 = vmatprep.subr.mxu1 %v3251_v1 }
 0x354   : > { %2010 = vmatpush2.msra.mxu1 %v1791_v8  ;;  %v3122_v8 = vld [vmem:[%s5633_s6 + $0x210] sm:$0xff] }
 0x355   : > { %2445 = vmatprep.subr.mxu1 %v3251_v1 }
 0x392   : > { %v1711_v16 = vpop.permute.xlu1 %1710 }
 0x393   : > { %v4848_v45 = vsel %vm382_vm0, %v4549_v39, %v1711_v16  ;;  %v3114_v39 = vld [vmem:[%s5633_s6 + $0x1d0] sm:$0xff] }
 0x394   : > { %v3147_v16 = vld [vmem:[%s5635_s8 + $0x110] sm:$0xff] }
 0x396   : > { %v1713_v42 = vpop.permute.xlu1 %1712 }
 0x397   : > { %v4868_v51 = vsel %vm382_vm0, %v4557_v32, %v1713_v42  ;;  %v3112_v32 = vld [vmem:[%s5633_s6 + $0x1c0] sm:$0xff]  ;;  %v3143_v42 = vld [vmem:[%s5635_s8 + $0xf0] sm:$0xff] }
 0x398   : > { %v1707_v9 = vpop.permute.xlu0 %1706 }
 0x399   : > { %v4820_v30 = vsel %vm382_vm0, %v4527_v26, %v1707_v9  ;;  %v4833_v26 = vsel %vm548_vm3, %v1744_v17, %v1745_v23  ;;  %v1762_v9 = vrot.slane %v4619_v58, 2 }
 0x39a   : > { %1905 = vmatmul.mubr.f32.vlgmr.msra.gmra.mxu0 %v4820_v30 }
 0x39b   : > { %2080 = vmatpush1.msra.mxu0 %v3119_v10  ;;  %3089 = vmatprep.mubr.msk.f32.mxu0 %vm382_vm0, %v4814_v43  ;;  %v1763_v10 = vrot.slane %v4621_v36, 2  ;;  %v3151_v36 = vld [vmem:[%s5635_s8 + $0x130] sm:$0xff] }
 0x39c   : > { %2081 = vmatprep.subr.mxu0 %v3251_v1  ;;  %v1709_v2 = vpop.permute.xlu0 %1708 }
 0x39d   : > { %2082 = vmatpush1.msra.mxu0 %v3118_v27  ;;  %v4839_v41 = vsel %vm382_vm0, %v4529_v60, %v1709_v2  ;;  %v1764_v17 = vsel %vm548_vm3, %v1762_v9, %v1763_v10  ;;  %v3150_v27 = vld [vmem:[%s5635_s8 + $0x128] sm:$0xff]  ;;  %v3148_v2 = vld [vmem:[%s5635_s8 + $0x118] sm:$0xff] }
 0x39e   : > { %2083 = vmatprep.subr.mxu0 %v3251_v1  ;;  %1910 = vmatmul.mubr.f32.gmra.mxu0 %v4839_v41  ;;  %v1717_v14 = vpop.permute.xlu1 %1716 }
 0x39f   : > { %2084 = vmatpush1.msra.mxu0 %v3117_v38  ;;  %3090 = vmatprep.mubr.msk.f32.mxu0 %vm382_vm0, %v4833_v26  ;;  %v4916_v63 = vsel %vm382_vm0, %v4563_v22, %v1717_v14  ;;  %v3107_v22 = vld [vmem:[%s5633_s6 + $0x198] sm:$0xff] }
 0x3a0   : > { %2085 = vmatprep.subr.mxu0 %v3251_v1  ;;  %v1715_v60 = vpop.permute.xlu0 %1714  ;;  %v2395_v38 = vld [vmem:[%s5635_s8 + $0x78] sm:$0xff] }
 0x3a1   : > { %2086 = vmatpush1.msra.mxu0 %v3116_v13  ;;  %v4894_v55 = vsel %vm382_vm0, %v4537_v29, %v1715_v60  ;;  %v1757_v29 = vrot.slane %v4547_v33, 2  ;;  %v3108_v33 = vld [vmem:[%s5633_s6 + $0x1a0] sm:$0xff]  ;;  %v3144_v60 = vld [vmem:[%s5635_s8 + $0xf8] sm:$0xff] }
 0x3a2   : > { %2087 = vmatprep.subr.mxu0 %v3251_v1  ;;  %1915 = vmatmul.mubr.f32.gmra.mxu0 %v4848_v45  ;;  %v3145_v13 = vld [vmem:[%s5635_s8 + $0x100] sm:$0xff]  ;;  %v3156_v14 = vld [vmem:[%s5635_s8 + $0x158] sm:$0xff] }
 0x3a3   : > { %2088 = vmatpush1.msra.mxu0 %v3115_v44  ;;  %3091 = vmatprep.mubr.msk.f32.mxu0 %vm382_vm0, %v4857_v46  ;;  %v2390_v44 = vld [vmem:[%s5635_s8 + $0x50] sm:$0xff] }
 0x3a4   : > { %2089 = vmatprep.subr.mxu0 %v3251_v1  ;;  %v1719_v0 = vpop.permute.xlu0 %1718 }
 0x3a5   : > { %2090 = vmatpush1.msra.mxu0 %v3114_v39  ;;  %v4939_v3 = vsel %vm382_vm0, %v4543_v7, %v1719_v0  ;;  %v3105_v7 = vld [vmem:[%s5633_s6 + $0x188] sm:$0xff]  ;;  %v3141_v39 = vld [vmem:[%s5635_s8 + $0xe0] sm:$0xff]  ;;  %v3140_v0 = vld [vmem:[%s5635_s8 + $0xd8] sm:$0xff] }
 0x3a6   : > { %2091 = vmatprep.subr.mxu0 %v3251_v1  ;;  %1920 = vmatmul.mubr.f32.gmra.mxu0 %v4868_v51  ;;  %v1721_v4 = vpop.permute.xlu1 %1720 }
 0x3a7   : > { %2092 = vmatpush1.msra.mxu0 %v3113_v20  ;;  %3092 = vmatprep.mubr.msk.f32.mxu0 %vm382_vm0, %v4877_v47  ;;  %v1773_v53 = vsel %vm382_vm0, %v4588_v48, %v1721_v4  ;;  %v3127_v48 = vld [vmem:[%s5633_s6 + $0x238] sm:$0xff]  ;;  %v3139_v20 = vld [vmem:[%s5635_s8 + $0xd0] sm:$0xff] }
 0x3a8   : > { %2093 = vmatprep.subr.mxu0 %v3251_v1  ;;  %v1705_v54 = vpop.permute.xlu0 %1704 }
 0x3a9   : > { %2094 = vmatpush1.msra.mxu0 %v3112_v32  ;;  %v1765_v56 = vsel %vm382_vm0, %v4580_v15, %v1705_v54  ;;  %v3109_v15 = vld [vmem:[%s5633_s6 + $0x1a8] sm:$0xff]  ;;  %v3137_v32 = vld [vmem:[%s5635_s8 + $0xc0] sm:$0xff] }
 0x3aa   : > { %2095 = vmatprep.subr.mxu0 %v3251_v1  ;;  %2012 = vmatmul.mubr.f32.vlgmr.msra.gmra.mxu1 %v1765_v56  ;;  %v3157_v56 = vld [vmem:[%s5635_s8 + $0x160] sm:$0xff] }
 0x3ab   : > { %2096 = vmatpush1.msra.mxu0 %v3111_v18  ;;  %3097 = vmatprep.mubr.msk.f32.mxu1 %vm382_vm0, %v4596_v57  ;;  %v4926_v57 = vsel %vm548_vm3, %v1756_v25, %v1757_v29  ;;  %v3158_v18 = vld [vmem:[%s5635_s8 + $0x168] sm:$0xff]  ;;  %v3155_v25 = vld [vmem:[%s5635_s8 + $0x150] sm:$0xff] }
 0x3ac   : > { %2097 = vmatprep.subr.mxu0 %v3251_v1  ;;  %1925 = vmatmul.mubr.f32.gmra.mxu0 %v4894_v55 }
 0x3ad   : > { %2098 = vmatpush1.msra.mxu0 %v3110_v34  ;;  %3093 = vmatprep.mubr.msk.f32.mxu0 %vm382_vm0, %v4903_v59 }
 0x3ae   : > { %2099 = vmatprep.subr.mxu0 %v3251_v1  ;;  %2017 = vmatmul.mubr.f32.gmra.mxu1 %v4820_v30  ;;  %v3152_v30 = vld [vmem:[%s5635_s8 + $0x138] sm:$0xff] }
 0x3af   : > { %2100 = vmatpush1.msra.mxu0 %v3109_v15  ;;  %3098 = vmatprep.mubr.msk.f32.mxu1 %vm382_vm0, %v4814_v43  ;;  %v3154_v15 = vld [vmem:[%s5635_s8 + $0x148] sm:$0xff] }
 0x3b0   : > { %2101 = vmatprep.subr.mxu0 %v3251_v1  ;;  %1930 = vmatmul.mubr.f32.gmra.mxu0 %v4916_v63 }
 0x3b1   : > { %2102 = vmatpush1.msra.mxu0 %v3108_v33  ;;  %3094 = vmatprep.mubr.msk.f32.mxu0 %vm382_vm0, %v4926_v57  ;;  %v3153_v33 = vld [vmem:[%s5635_s8 + $0x140] sm:$0xff] }
 0x3b2   : > { %2103 = vmatprep.subr.mxu0 %v3251_v1  ;;  %2022 = vmatmul.mubr.f32.gmra.mxu1 %v4839_v41 }
 0x3b3   : > { %2104 = vmatpush1.msra.mxu0 %v3107_v22  ;;  %3099 = vmatprep.mubr.msk.f32.mxu1 %vm382_vm0, %v4833_v26 }
 0x3b4   : > { %2105 = vmatprep.subr.mxu0 %v3251_v1  ;;  %1935 = vmatmul.mubr.f32.gmra.mxu0 %v4939_v3 }
 0x3b5   : > { %2106 = vmatpush1.msra.mxu0 %v3106_v37  ;;  %3095 = vmatprep.mubr.msk.f32.mxu0 %vm382_vm0, %v4949_v24 }
 0x3b6   : > { %2107 = vmatprep.subr.mxu0 %v3251_v1  ;;  %2027 = vmatmul.mubr.f32.gmra.mxu1 %v4848_v45 }
 0x3b7   : > { %2108 = vmatpush1.msra.mxu0 %v3105_v7  ;;  %3100 = vmatprep.mubr.msk.f32.mxu1 %vm382_vm0, %v4857_v46 }
 0x3b8   : > { %2109 = vmatprep.subr.mxu0 %v3251_v1  ;;  %1940 = vmatmul.mubr.f32.gmra.mxu0 %v1773_v53 }
 0x3b9   : > { %2110 = vmatpush1.msra.mxu0 %v3104_v5  ;;  %3128 = vmatprep.mubr.msk.f32.mxu0 %vm382_vm0, %v4814_v43  ;;  %v1723_v43 = vpop.permute.xlu1 %1722 }
 0x3ba   : > { %2127 = vmatprep.subr.mxu0 %v3251_v1  ;;  %2032 = vmatmul.mubr.f32.gmra.mxu1 %v4868_v51  ;;  %v1774_v23 = vsel %vm382_vm0, %v4619_v58, %v1723_v43  ;;  %v3149_v58 = vld [vmem:[%s5635_s8 + $0x120] sm:$0xff] }
 0x3bb   : > { %2128 = vmatpush2.msra.mxu0 %v3127_v48  ;;  %3101 = vmatprep.mubr.msk.f32.mxu1 %vm382_vm0, %v4877_v47 }
 0x3bc   : > { %2129 = vmatprep.subr.mxu0 %v3251_v1  ;;  %2446 = vmatpush1.msra.mxu1 %v3152_v30 }
 0x3bd   : > { %2130 = vmatpush2.msra.mxu0 %v3126_v50  ;;  %2447 = vmatprep.subr.mxu1 %v3251_v1 }
 0x3be   : > { %2131 = vmatprep.subr.mxu0 %v3251_v1  ;;  %2037 = vmatmul.mubr.f32.gmra.mxu1 %v4894_v55 }
 0x3bf   : > { %2132 = vmatpush2.msra.mxu0 %v3125_v31  ;;  %3102 = vmatprep.mubr.msk.f32.mxu1 %vm382_vm0, %v4903_v59 }
 0x3c0   : > { %2133 = vmatprep.subr.mxu0 %v3251_v1  ;;  %2448 = vmatpush1.msra.mxu1 %v3151_v36 }
 0x3c1   : > { %2134 = vmatpush2.msra.mxu0 %v3124_v6  ;;  %2449 = vmatprep.subr.mxu1 %v3251_v1 }
 0x3c2   : > { %2135 = vmatprep.subr.mxu0 %v3251_v1  ;;  %2042 = vmatmul.mubr.f32.gmra.mxu1 %v4916_v63 }
 0x3c3   : > { %2136 = vmatpush2.msra.mxu0 %v3123_v35  ;;  %3103 = vmatprep.mubr.msk.f32.mxu1 %vm382_vm0, %v4926_v57 }
 0x3c4   : > { %2137 = vmatprep.subr.mxu0 %v3251_v1  ;;  %2450 = vmatpush1.msra.mxu1 %v3150_v27 }
 0x3c5   : > { %2138 = vmatpush2.msra.mxu0 %v3122_v8  ;;  %2451 = vmatprep.subr.mxu1 %v3251_v1 }
 0x3c6   : > { %2139 = vmatprep.subr.mxu0 %v3251_v1  ;;  %2047 = vmatmul.mubr.f32.gmra.mxu1 %v4939_v3 }
 0x3c7   : > { %2140 = vmatpush2.msra.mxu0 %v3121_v62  ;;  %2452 = vmatpush1.msra.mxu1 %v3149_v58  ;;  %v5188_v58 = vld [vmem:[%s5634_s7] ss:$0 sm:$0xff] }
 0x3c8   : > { %2141 = vmatprep.subr.mxu0 %v3251_v1  ;;  %2453 = vmatprep.subr.mxu1 %v3251_v1 }
 0x3c9   : > { %2142 = vmatpush2.msra.mxu0 %v3120_v49  ;;  %2454 = vmatpush1.msra.mxu1 %v3148_v2 }
 0x3ca   : > { %2144 = vmatmul.mubr.f32.vlgmr.msra.gmra.mxu0 %v4839_v41  ;;  %2552 = vmatprep.subr.mxu0 %v3251_v1  ;;  %v2392_v41 = vld [vmem:[%s5635_s8 + $0x60] sm:$0xff] }
 0x3cb   : > { %3129 = vmatprep.mubr.msk.f32.mxu0 %vm382_vm0, %v4833_v26  ;;  %2553 = vmatpush1.msra.mxu0 %v2395_v38  ;;  %v2394_v26 = vld [vmem:[%s5635_s8 + $0x70] sm:$0xff] }
 0x3cc   : > { %2554 = vmatprep.subr.mxu0 %v3251_v1  ;;  %2455 = vmatprep.subr.mxu1 %v3251_v1 }
 0x3cd   : > { %2555 = vmatpush1.msra.mxu0 %v2394_v26  ;;  %2456 = vmatpush1.msra.mxu1 %v3147_v16 }
 0x3ce   : > { %2149 = vmatmul.mubr.f32.gmra.mxu0 %v4848_v45  ;;  %2556 = vmatprep.subr.mxu0 %v3251_v1  ;;  %v2391_v45 = vld [vmem:[%s5635_s8 + $0x58] sm:$0xff] }
 0x3cf   : > { %3130 = vmatprep.mubr.msk.f32.mxu0 %vm382_vm0, %v4857_v46  ;;  %2457 = vmatprep.subr.mxu1 %v3251_v1  ;;  %v2389_v46 = vld [vmem:[%s5635_s8 + $0x48] sm:$0xff] }
 0x3d0   : > { %2557 = vmatpush1.msra.mxu0 %v2393_v40  ;;  %2458 = vmatpush1.msra.mxu1 %v3146_v21 }
 0x3d1   : > { %2558 = vmatprep.subr.mxu0 %v3251_v1  ;;  %2459 = vmatprep.subr.mxu1 %v3251_v1 }
 0x3d2   : > { %2154 = vmatmul.mubr.f32.gmra.mxu0 %v4868_v51  ;;  %2460 = vmatpush1.msra.mxu1 %v3145_v13  ;;  %v2387_v51 = vld [vmem:[%s5635_s8 + $0x38] sm:$0xff] }
 0x3d3   : > { %3131 = vmatprep.mubr.msk.f32.mxu0 %vm382_vm0, %v4877_v47  ;;  %2559 = vmatpush1.msra.mxu0 %v2392_v41  ;;  %v3138_v47 = vld [vmem:[%s5635_s8 + $0xc8] sm:$0xff] }
 0x3d4   : > { %2560 = vmatprep.subr.mxu0 %v3251_v1  ;;  %2461 = vmatprep.subr.mxu1 %v3251_v1 }
 0x3d5   : > { %2561 = vmatpush1.msra.mxu0 %v2391_v45  ;;  %2462 = vmatpush1.msra.mxu1 %v3144_v60  ;;  %v2386_v45 = vld [vmem:[%s5635_s8 + $0x30] sm:$0xff] }
 0x3d6   : > { %2159 = vmatmul.mubr.f32.gmra.mxu0 %v4894_v55  ;;  %2562 = vmatprep.subr.mxu0 %v3251_v1 }
 0x3d7   : > { %3132 = vmatprep.mubr.msk.f32.mxu0 %vm382_vm0, %v4903_v59  ;;  %2463 = vmatprep.subr.mxu1 %v3251_v1 }
 0x3d8   : > { %2563 = vmatpush1.msra.mxu0 %v2390_v44  ;;  %2464 = vmatpush1.msra.mxu1 %v3143_v42 }
 0x3d9   : > { %2564 = vmatprep.subr.mxu0 %v3251_v1  ;;  %2465 = vmatprep.subr.mxu1 %v3251_v1 }
 0x3da   : > { %2164 = vmatmul.mubr.f32.gmra.mxu0 %v4916_v63  ;;  %2466 = vmatpush1.msra.mxu1 %v3142_v19 }
 0x3db   : > { %3133 = vmatprep.mubr.msk.f32.mxu0 %vm382_vm0, %v4926_v57  ;;  %2565 = vmatpush1.msra.mxu0 %v2389_v46 }
 0x3dc   : > { %2566 = vmatprep.subr.mxu0 %v3251_v1  ;;  %2467 = vmatprep.subr.mxu1 %v3251_v1 }
 0x3dd   : > { %2567 = vmatpush1.msra.mxu0 %v2388_v61  ;;  %2468 = vmatpush1.msra.mxu1 %v3141_v39  ;;  %v2385_v61 = vld [vmem:[%s5635_s8 + $0x28] sm:$0xff] }
 0x3de   : > { %2169 = vmatmul.mubr.f32.gmra.mxu0 %v4939_v3  ;;  %2568 = vmatprep.subr.mxu0 %v3251_v1 }
 0x3df   : > { %3134 = vmatprep.mubr.msk.f32.mxu0 %vm382_vm0, %v4949_v24  ;;  %2469 = vmatprep.subr.mxu1 %v3251_v1 }
 0x3e0   : > { %2569 = vmatpush1.msra.mxu0 %v2387_v51  ;;  %2470 = vmatpush1.msra.mxu1 %v3140_v0 }
 0x3e1   : > { %2570 = vmatprep.subr.mxu0 %v3251_v1  ;;  %2471 = vmatprep.subr.mxu1 %v3251_v1 }
 0x3e2   : > { %2174 = vmatmul.mubr.f32.gmra.mxu0 %v1773_v53  ;;  %2472 = vmatpush1.msra.mxu1 %v3139_v20  ;;  %v2384_v20 = vld [vmem:[%s5635_s8 + $0x20] sm:$0xff] }
 0x3e3   : > { %3135 = vmatprep.mubr.msk.f32.mxu0 %vm382_vm0, %v1764_v17  ;;  %2473 = vmatprep.subr.mxu1 %v3251_v1 }
 0x3e4   : > { %2474 = vmatpush1.msra.mxu1 %v3138_v47  ;;  %2571 = vmatpush1.msra.mxu0 %v2386_v45 }
 0x3e5   : > { %2475 = vmatprep.subr.mxu1 %v3251_v1  ;;  %2572 = vmatprep.subr.mxu0 %v3251_v1 }
 0x3e6   : > { %2179 = vmatmul.mubr.f32.gmra.mxu0 %v1774_v23  ;;  %2476 = vmatpush1.msra.mxu1 %v3137_v32 }
 0x3e7   : > { %2493 = vmatprep.subr.mxu1 %v3251_v1  ;;  %2573 = vmatpush1.msra.mxu0 %v2385_v61 }
 0x3e8   : > { %2494 = vmatpush2.msra.mxu1 %v3160_v52  ;;  %2574 = vmatprep.subr.mxu0 %v3251_v1 }
 0x3e9   : > { %2495 = vmatprep.subr.mxu1 %v3251_v1  ;;  %2575 = vmatpush1.msra.mxu0 %v2384_v20 }
 0x3ea   : > { %2496 = vmatpush2.msra.mxu1 %v3159_v12  ;;  %2576 = vmatprep.subr.mxu0 %v3251_v1 }
 0x3eb   : > { %2497 = vmatprep.subr.mxu1 %v3251_v1 }
 0x3ec   : > { %2498 = vmatpush2.msra.mxu1 %v3158_v18 }
 0x3ed   : > { %2499 = vmatprep.subr.mxu1 %v3251_v1 }
 0x3ee   : > { %2500 = vmatpush2.msra.mxu1 %v3157_v56 }
 0x3ef   : > { %2501 = vmatprep.subr.mxu1 %v3251_v1 }
 0x3f0   : > { %2502 = vmatpush2.msra.mxu1 %v3156_v14 }
 0x3f1   : > { %2503 = vmatprep.subr.mxu1 %v3251_v1 }
 0x3f2   : > { %2504 = vmatpush2.msra.mxu1 %v3155_v25 }
 0x3f3   : > { %2505 = vmatprep.subr.mxu1 %v3251_v1 }
 0x3f4   : > { %2506 = vmatpush2.msra.mxu1 %v3154_v15 }
 0x3f5   : > { %2507 = vmatprep.subr.mxu1 %v3251_v1 }
 0x3f6   : > { %2508 = vmatpush2.msra.mxu1 %v3153_v33 }
 0x3f7   : > { %2684 = vmatprep.subr.mxu1 %v3251_v1 }
 0x45a   : > { %v1906_v54 = vpop.f32.mrf.mxu0 }
 0x45c   : > { %v1908_v55 = vpop.f32.mrf.mxu0 }
 0x45e   : > { %v1911_v34 = vpop.f32.mrf.mxu0 }
 0x460   : > { %v1913_v59 = vpop.f32.mrf.mxu0 }
 0x462   : > { %v1916_v29 = vpop.f32.mrf.mxu0 }
 0x464   : > { %v1918_v63 = vpop.f32.mrf.mxu0 }
 0x466   : > { %v1921_v57 = vpop.f32.mrf.mxu0 }
 0x468   : > { %v1923_v28 = vpop.f32.mrf.mxu0 }
 0x46a   : > { %v2013_v11 = vpop.f32.mrf.mxu1 }
 0x46b   : > { %v2014_v27 = vadd.f32 %v2013_v11, %v1906_v54  ;;  %v2383_v54 = vld [vmem:[%s5635_s8 + $0x18] sm:$0xff] }
 0x46c   : > { %v2015_v22 = vpop.f32.mrf.mxu1  ;;  %v5171_v3 = vpop.f32.mrf.mxu0  ;;  %2577 = vmatpush1.msra.mxu0 %v2383_v54 }
 0x46d   : > { %2578 = vmatprep.subr.mxu0 %v3251_v1  ;;  %v2381_v22 = vld [vmem:[%s5635_s8 + $0x8] sm:$0xff] }
 0x46e   : > { %v2018_v37 = vpop.f32.mrf.mxu1  ;;  %v1928_v4 = vpop.f32.mrf.mxu0 }
 0x46f   : > { %v2019_v26 = vadd.f32 %v2018_v37, %v1911_v34  ;;  %v2382_v34 = vld [vmem:[%s5635_s8 + $0x10] sm:$0xff] }
 0x470   : > { %v2020_v24 = vpop.f32.mrf.mxu1  ;;  %v5173_v7 = vpop.f32.mrf.mxu0  ;;  %2579 = vmatpush1.msra.mxu0 %v2382_v34 }
 0x471   : > { %2580 = vmatprep.subr.mxu0 %v3251_v1 }
 0x472   : > { %v2023_v53 = vpop.f32.mrf.mxu1  ;;  %v1933_v5 = vpop.f32.mrf.mxu0  ;;  %2581 = vmatpush1.msra.mxu0 %v2381_v22  ;;  %v2396_v22 = vld [vmem:[%s5635_s8 + $0x80] sm:$0xff] }
 0x473   : > { %v2024_v44 = vadd.f32 %v2023_v53, %v1916_v29  ;;  %2582 = vmatprep.subr.mxu0 %v3251_v1  ;;  %v2380_v5 = vld [vmem:[%s5635_s8] sm:$0xff] }
 0x474   : > { %v2025_v48 = vpop.f32.mrf.mxu1  ;;  %v5175_v50 = vpop.f32.mrf.mxu0  ;;  %2583 = vmatpush1.msra.mxu0 %v2380_v5 }
 0x475   : > { %2600 = vmatprep.subr.mxu0 %v3251_v1 }
 0x476   : > { %v2028_v31 = vpop.f32.mrf.mxu1  ;;  %v1938_v6 = vpop.f32.mrf.mxu0 }
 0x477   : > { %v2029_v47 = vadd.f32 %v2028_v31, %v1921_v57 }
 0x478   : > { %v2030_v35 = vpop.f32.mrf.mxu1  ;;  %v5177_v8 = vpop.f32.mrf.mxu0 }
 0x47a   : > { %v2033_v62 = vpop.f32.mrf.mxu1  ;;  %v1943_v49 = vpop.f32.mrf.mxu0 }
 0x47b   : > { %v2034_v14 = vadd.f32 %v2033_v62, %v5171_v3 }
 0x47c   : > { %v2035_v9 = vpop.f32.mrf.mxu1 }
 0x47e   : > { %v5179_v10 = vpop.f32.mrf.mxu1 }
 0x47f   : > { %v2039_v48 = vadd.f32 %v5179_v10, %v5173_v7  ;;  %v2403_v7 = vld [vmem:[%s5635_s8 + $0xb8] sm:$0xff] }
 0x480   : > { %v2040_v43 = vpop.f32.mrf.mxu1  ;;  %2601 = vmatpush2.msra.mxu0 %v2403_v7 }
 0x481   : > { %2602 = vmatprep.subr.mxu0 %v3251_v1 }
 0x482   : > { %v5181_v17 = vpop.f32.mrf.mxu1 }
 0x484   : > { %v2045_v23 = vpop.f32.mrf.mxu1 }
 0x486   : > { %v5183_v30 = vpop.f32.mrf.mxu1 }
 0x488   : > { %v2050_v36 = vpop.f32.mrf.mxu1 }
 0x48a   : > { %v2145_v2 = vpop.f32.mrf.mxu0 }
 0x48b   : > { %v2184_v38 = vadd.f32 %v2145_v2, %v2014_v27  ;;  %v2402_v2 = vld [vmem:[%s5635_s8 + $0xb0] sm:$0xff] }
 0x48c   : > { %v2147_v16 = vpop.f32.mrf.mxu0  ;;  %2603 = vmatpush2.msra.mxu0 %v2402_v2 }
 0x48d   : > { %v2198_v40 = vadd.f32 %v5188_v58, %v2184_v38  ;;  %v2044_v38 = vadd.f32 %v5181_v17, %v5175_v50  ;;  %v2401_v50 = vld [vmem:[%s5635_s8 + $0xa8] sm:$0xff]  ;;  %2604 = vmatprep.subr.mxu0 %v3251_v1 }
 0x48e   : > { %v2150_v21 = vpop.f32.mrf.mxu0  ;;  %2605 = vmatpush2.msra.mxu0 %v2401_v50 }
 0x48f   : > { %vm2206_vm4 = vcmp.gt.f32.partialorder %v2198_v40, 0.0  ;;  %v2214_v41 = vmul.f32 0.1, %v2198_v40  ;;  %v2185_v13 = vadd.f32 %v2150_v21, %v2019_v26  ;;  %2606 = vmatprep.subr.mxu0 %v3251_v1 }
 0x490   : > { %v2152_v60 = vpop.f32.mrf.mxu0 }
 0x491   : > { %v2222_v42 = vsel %vm2206_vm4, %v2198_v40, %v2214_v41  ;;  %v2199_v46 = vadd.f32 %v5188_v58, %v2185_v13 }
 0x492   : > { %2231 = vst.msk [vmem:[#allocation3 + $0x11] sm:$0xff] %vm382_vm0, %v2222_v42  ;;  %v2155_v19 = vpop.f32.mrf.mxu0 }
 0x493   : > { %vm2207_vm5 = vcmp.gt.f32.partialorder %v2199_v46, 0.0  ;;  %v2215_v39 = vmul.f32 0.1, %v2199_v46  ;;  %v2186_v51 = vadd.f32 %v2155_v19, %v2024_v44  ;;  %v2049_v19 = vadd.f32 %v5183_v30, %v5177_v8  ;;  %v2399_v8 = vld [vmem:[%s5635_s8 + $0x98] sm:$0xff] }
 0x494   : > { %v2157_v0 = vpop.f32.mrf.mxu0 }
 0x495   : > { %v2223_v32 = vsel %vm2207_vm5, %v2199_v46, %v2215_v39  ;;  %v2200_v52 = vadd.f32 %v5188_v58, %v2186_v51  ;;  %v2400_v46 = vld [vmem:[%s5635_s8 + $0xa0] sm:$0xff] }
 0x496   : > { %2232 = vst.msk [vmem:[#allocation3 + $0x21] sm:$0xff] %vm382_vm0, %v2223_v32  ;;  %v2160_v12 = vpop.f32.mrf.mxu0  ;;  %2607 = vmatpush2.msra.mxu0 %v2400_v46  ;;  %v3192_v46 = vld [vmem:[%s5635_s8 + $0x1f8] sm:$0xff] }
 0x497   : > { %vm2208_vm6 = vcmp.gt.f32.partialorder %v2200_v52, 0.0  ;;  %v2216_v18 = vmul.f32 0.1, %v2200_v52  ;;  %v2187_v55 = vadd.f32 %v2160_v12, %v2029_v47  ;;  %2608 = vmatprep.subr.mxu0 %v3251_v1 }
 0x498   : > { %v2162_v56 = vpop.f32.mrf.mxu0  ;;  %2609 = vmatpush2.msra.mxu0 %v2399_v8  ;;  %v3189_v8 = vld [vmem:[%s5635_s8 + $0x1e0] sm:$0xff] }
 0x499   : > { %v2224_v59 = vsel %vm2208_vm6, %v2200_v52, %v2216_v18  ;;  %v2201_v25 = vadd.f32 %v5188_v58, %v2187_v55  ;;  %v5216_v29 = vld [vmem:[#allocation3 + $0x10] sm:$0xff]  ;;  %v2243_v15 = vld [vmem:[#allocation3 + $0x18] sm:$0x3]  ;;  %2610 = vmatprep.subr.mxu0 %v3251_v1 }
 0x49a   : > { %2233 = vst.msk [vmem:[#allocation3 + $0x31] sm:$0xff] %vm382_vm0, %v2224_v59  ;;  %v2165_v63 = vpop.f32.mrf.mxu0  ;;  %v2343_v33 = vrot.slane %v5216_v29, 2  ;;  %v2344_v57 = vrot.slane %v2243_v15, 2  ;;  %v2283_v28 = vrot.slane %v5216_v29, 1  ;;  %v2284_v11 = vrot.slane %v2243_v15, 1  ;;  %v2398_v18 = vld [vmem:[%s5635_s8 + $0x90] sm:$0xff] }
 0x49b   : > { %vm2209_vm7 = vcmp.gt.f32.partialorder %v2201_v25, 0.0  ;;  %v2217_v3 = vmul.f32 0.1, %v2201_v25  ;;  %v2188_v37 = vadd.f32 %v2165_v63, %v2034_v14  ;;  %v5304_v15 = vld [vmem:[#allocation3] sm:$0xff]  ;;  %v2241_v63 = vld [vmem:[#allocation3 + $0x8] sm:$0x3]  ;;  %2611 = vmatpush2.msra.mxu0 %v2398_v18 }
 0x49c   : > { %v2167_v4 = vpop.f32.mrf.mxu0  ;;  %v5226_v24 = vsel %vm548_vm3, %v2343_v33, %v2344_v57  ;;  %v2285_v53 = vsel %vm487_vm2, %v2283_v28, %v2284_v11  ;;  %2612 = vmatprep.subr.mxu0 %v3251_v1  ;;  %v2340_v57 = vrot.slane %v5304_v15, 2  ;;  %v2341_v28 = vrot.slane %v2241_v63, 2  ;;  %v3187_v18 = vld [vmem:[%s5635_s8 + $0x1d0] sm:$0xff] }
 0x49d   : > { %v2225_v31 = vsel %vm2209_vm7, %v2201_v25, %v2217_v3  ;;  %v2202_v6 = vadd.f32 %v5188_v58, %v2188_v37  ;;  %3161 = vmatprep.mubr.msk.f32.mxu1 %vm382_vm0, %v5226_v24  ;;  %2312 = vrot.lane.b32.xlu0 %v2285_v53, %s3254_s30  ;;  %v5239_v35 = vld [vmem:[#allocation3 + $0x20] sm:$0xff]  ;;  %v5241_v62 = vld [vmem:[#allocation3 + $0x28] sm:$0x3] }
 0x49e   : > { %2234 = vst.msk [vmem:[#allocation3 + $0x41] sm:$0xff] %vm382_vm0, %v2225_v31  ;;  %v2170_v49 = vpop.f32.mrf.mxu0  ;;  %v2286_v9 = vrot.slane %v5239_v35, 1  ;;  %v2287_v43 = vrot.slane %v5241_v62, 1  ;;  %v2342_v53 = vsel %vm548_vm3, %v2340_v57, %v2341_v28  ;;  %v3184_v57 = vld [vmem:[%s5635_s8 + $0x1b8] sm:$0xff] }
 0x49f   : > { %vm2210_vm8 = vcmp.gt.f32.partialorder %v2202_v6, 0.0  ;;  %v2218_v10 = vmul.f32 0.1, %v2202_v6  ;;  %v2189_v23 = vadd.f32 %v2170_v49, %v2039_v48  ;;  %3169 = vmatprep.mubr.msk.f32.mxu0 %vm382_vm0, %v2342_v53  ;;  %v3182_v53 = vld [vmem:[%s5635_s8 + $0x1a8] sm:$0xff] }
 0x4a0   : > { %v2172_v36 = vpop.f32.mrf.mxu0  ;;  %v2288_v27 = vsel %vm487_vm2, %v2286_v9, %v2287_v43  ;;  %v2280_v9 = vrot.slane %v5304_v15, 1  ;;  %v2281_v43 = vrot.slane %v2241_v63, 1  ;;  %v3185_v63 = vld [vmem:[%s5635_s8 + $0x1c0] sm:$0xff] }
 0x4a1   : > { %v2226_v16 = vsel %vm2210_vm8, %v2202_v6, %v2218_v10  ;;  %v2203_v26 = vadd.f32 %v5188_v58, %v2189_v23  ;;  %2314 = vrot.lane.b32.xlu1 %v2288_v27, %s3254_s30  ;;  %v5258_v40 = vld [vmem:[#allocation3 + $0x30] sm:$0xff]  ;;  %v5260_v21 = vld [vmem:[#allocation3 + $0x38] sm:$0x3] }
 0x4a2   : > { %2235 = vst.msk [vmem:[#allocation3 + $0x51] sm:$0xff] %vm382_vm0, %v2226_v16  ;;  %v2175_v41 = vpop.f32.mrf.mxu0  ;;  %v2289_v13 = vrot.slane %v5258_v40, 1  ;;  %v2290_v45 = vrot.slane %v5260_v21, 1  ;;  %v5335_v23 = vld [vmem:[#allocation3 + $0x90] sm:$0xff]  ;;  %v5337_v36 = vld [vmem:[#allocation3 + $0x98] sm:$0x3]  ;;  %v2282_v16 = vsel %vm487_vm2, %v2280_v9, %v2281_v43 }
 0x4a3   : > { %vm2211_vm9 = vcmp.gt.f32.partialorder %v2203_v26, 0.0  ;;  %v2219_v17 = vmul.f32 0.1, %v2203_v26  ;;  %v2190_v60 = vadd.f32 %v2175_v41, %v2044_v38  ;;  %v3180_v43 = vld [vmem:[%s5635_s8 + $0x198] sm:$0xff] }
 0x4a4   : > { %v2177_v44 = vpop.f32.mrf.mxu0  ;;  %v2291_v42 = vsel %vm487_vm2, %v2289_v13, %v2290_v45  ;;  %v2307_v13 = vrot.slane %v5335_v23, 1  ;;  %v2308_v45 = vrot.slane %v5337_v36, 1 }
 0x4a5   : > { %v2227_v61 = vsel %vm2211_vm9, %v2203_v26, %v2219_v17  ;;  %v2204_v39 = vadd.f32 %v5188_v58, %v2190_v60  ;;  %2316 = vrot.lane.b32.xlu0 %v2291_v42, %s3254_s30  ;;  %v5278_v51 = vld [vmem:[#allocation3 + $0x40] sm:$0xff]  ;;  %v5280_v0 = vld [vmem:[#allocation3 + $0x48] sm:$0x3]  ;;  %v2346_v60 = vrot.slane %v5239_v35, 2  ;;  %v2347_v44 = vrot.slane %v5241_v62, 2 }
 0x4a6   : > { %2236 = vst.msk [vmem:[#allocation3 + $0x61] sm:$0xff] %vm382_vm0, %v2227_v61  ;;  %v2180_v20 = vpop.f32.mrf.mxu0  ;;  %v2292_v47 = vrot.slane %v5278_v51, 1  ;;  %v2293_v32 = vrot.slane %v5280_v0, 1  ;;  %v2309_v17 = vsel %vm487_vm2, %v2307_v13, %v2308_v45  ;;  %v2349_v62 = vrot.slane %v5258_v40, 2  ;;  %v3177_v13 = vld [vmem:[%s5635_s8 + $0x180] sm:$0xff] }
 0x4a7   : > { %vm2212_vm10 = vcmp.gt.f32.partialorder %v2204_v39, 0.0  ;;  %v2220_v30 = vmul.f32 0.1, %v2204_v39  ;;  %v2191_v52 = vadd.f32 %v2180_v20, %v2049_v19  ;;  %v5366_v61 = vsel %vm548_vm3, %v2346_v60, %v2347_v44  ;;  %v3197_v45 = vld [vmem:[%s5635_s8 + $0x220] sm:$0xff]  ;;  %v3194_v60 = vld [vmem:[%s5635_s8 + $0x208] sm:$0xff] }
 0x4a8   : > { %v2294_v12 = vsel %vm487_vm2, %v2292_v47, %v2293_v32  ;;  %v2182_v54 = vpop.f32.mrf.mxu0  ;;  %v2350_v20 = vrot.slane %v5260_v21, 2  ;;  %v3190_v47 = vld [vmem:[%s5635_s8 + $0x1e8] sm:$0xff]  ;;  %v3193_v44 = vld [vmem:[%s5635_s8 + $0x200] sm:$0xff] }
 0x4a9   : > { %v2228_v55 = vsel %vm2212_vm10, %v2204_v39, %v2220_v30  ;;  %v2205_v56 = vadd.f32 %v5188_v58, %v2191_v52  ;;  %2318 = vrot.lane.b32.xlu1 %v2294_v12, %s3254_s30  ;;  %v5296_v34 = vld [vmem:[#allocation3 + $0x50] sm:$0xff]  ;;  %v5298_v14 = vld [vmem:[#allocation3 + $0x58] sm:$0x3]  ;;  %v2397_v58 = vld [vmem:[%s5635_s8 + $0x88] sm:$0xff]  ;;  %v2352_v30 = vrot.slane %v5278_v51, 2  ;;  %v2353_v52 = vrot.slane %v5280_v0, 2 }
 0x4aa   : > { %2237 = vst.msk [vmem:[#allocation3 + $0x71] sm:$0xff] %vm382_vm0, %v2228_v55  ;;  %v2295_v59 = vrot.slane %v5296_v34, 1  ;;  %v2296_v25 = vrot.slane %v5298_v14, 1  ;;  %2613 = vmatpush2.msra.mxu0 %v2397_v58  ;;  %v3191_v39 = vld [vmem:[%s5635_s8 + $0x1f0] sm:$0xff]  ;;  %v5386_v21 = vsel %vm548_vm3, %v2349_v62, %v2350_v20  ;;  %v3188_v12 = vld [vmem:[%s5635_s8 + $0x1d8] sm:$0xff]  ;;  %v2355_v55 = vrot.slane %v5296_v34, 2 }
 0x4ab   : > { %vm2213_vm11 = vcmp.gt.f32.partialorder %v2205_v56, 0.0  ;;  %v2221_v33 = vmul.f32 0.1, %v2205_v56  ;;  %2614 = vmatprep.subr.mxu0 %v3251_v1  ;;  %v5406_v0 = vsel %vm548_vm3, %v2352_v30, %v2353_v52 }
 0x4ac   : > { %v2297_v11 = vsel %vm487_vm2, %v2295_v59, %v2296_v25  ;;  %2615 = vmatpush2.msra.mxu0 %v2396_v22  ;;  %v3186_v59 = vld [vmem:[%s5635_s8 + $0x1c8] sm:$0xff]  ;;  %v3183_v22 = vld [vmem:[%s5635_s8 + $0x1b0] sm:$0xff] }
 0x4ad   : > { %v2229_v3 = vsel %vm2213_vm11, %v2205_v56, %v2221_v33  ;;  %2320 = vrot.lane.b32.xlu0 %v2297_v11, %s3254_s30  ;;  %v5316_v37 = vld [vmem:[#allocation3 + $0x60] sm:$0xff]  ;;  %v5318_v4 = vld [vmem:[#allocation3 + $0x68] sm:$0x3]  ;;  %v2356_v56 = vrot.slane %v5298_v14, 2 }
 0x4ae   : > { %2238 = vst.msk [vmem:[#allocation3 + $0x81] sm:$0xff] %vm382_vm0, %v2229_v3  ;;  %v2298_v5 = vrot.slane %v5316_v37, 1  ;;  %v2299_v48 = vrot.slane %v5318_v4, 1  ;;  %v2358_v58 = vrot.slane %v5316_v37, 2  ;;  %v2359_v33 = vrot.slane %v5318_v4, 2 }
 0x4af   : > { %v5426_v14 = vsel %vm548_vm3, %v2355_v55, %v2356_v56 }
 0x4b0   : > { %v2300_v31 = vsel %vm487_vm2, %v2298_v5, %v2299_v48  ;;  %v5446_v11 = vsel %vm548_vm3, %v2358_v58, %v2359_v33 }
 0x4b1   : > { %2322 = vrot.lane.b32.xlu1 %v2300_v31, %s3254_s30  ;;  %v5328_v6 = vld [vmem:[#allocation3 + $0x70] sm:$0xff]  ;;  %v5330_v49 = vld [vmem:[#allocation3 + $0x78] sm:$0x3]  ;;  %v3181_v31 = vld [vmem:[%s5635_s8 + $0x1a0] sm:$0xff] }
 0x4b2   : > { %v2301_v7 = vrot.slane %v5328_v6, 1  ;;  %v2302_v10 = vrot.slane %v5330_v49, 1  ;;  %v2361_v3 = vrot.slane %v5328_v6, 2  ;;  %v2362_v4 = vrot.slane %v5330_v49, 2 }
 0x4b4   : > { %v2303_v27 = vsel %vm487_vm2, %v2301_v7, %v2302_v10  ;;  %v5466_v48 = vsel %vm548_vm3, %v2361_v3, %v2362_v4  ;;  %v2811_v3 = vld [vmem:[%s3424_s26] sm:$0xff] }
 0x4b5   : > { %2324 = vrot.lane.b32.xlu0 %v2303_v27, %s3254_s30  ;;  %v5341_v2 = vld [vmem:[#allocation3 + $0x80] sm:$0xff]  ;;  %v5343_v38 = vld [vmem:[#allocation3 + $0x88] sm:$0x3]  ;;  %v3179_v27 = vld [vmem:[%s5635_s8 + $0x190] sm:$0xff] }
 0x4b6   : > { %v2304_v26 = vrot.slane %v5341_v2, 1  ;;  %v2305_v41 = vrot.slane %v5343_v38, 1  ;;  %v2364_v49 = vrot.slane %v5341_v2, 2  ;;  %v2365_v9 = vrot.slane %v5343_v38, 2 }
 0x4b8   : > { %v2306_v50 = vsel %vm487_vm2, %v2304_v26, %v2305_v41  ;;  %v5486_v10 = vsel %vm548_vm3, %v2364_v49, %v2365_v9 }
 0x4b9   : > { %2326 = vrot.lane.b32.xlu1 %v2306_v50, %s3254_s30  ;;  %2310 = vrot.lane.b32.xlu0 %v2282_v16, %s3254_s30  ;;  %v3178_v16 = vld [vmem:[%s5635_s8 + $0x188] sm:$0xff]  ;;  %v3196_v50 = vld [vmem:[%s5635_s8 + $0x218] sm:$0xff] }
 0x4bd   : > { %2328 = vrot.lane.b32.xlu1 %v2309_v17, %s3254_s30  ;;  %v3195_v17 = vld [vmem:[%s5635_s8 + $0x210] sm:$0xff] }
 0x50f   : > { %v2313_v42 = vpop.permute.xlu0 %2312 }
 0x510   : > { %v5362_v19 = vsel %vm382_vm0, %v5216_v29, %v2313_v42  ;;  %v2368_v42 = vrot.slane %v5337_v36, 2 }
 0x511   : > { %2510 = vmatmul.mubr.f32.vlgmr.msra.gmra.mxu1 %v5362_v19 }
 0x512   : > { %2685 = vmatpush1.msra.mxu1 %v3192_v46  ;;  %3162 = vmatprep.mubr.msk.f32.mxu1 %vm382_vm0, %v5366_v61 }
 0x513   : > { %2686 = vmatprep.subr.mxu1 %v3251_v1  ;;  %v2315_v29 = vpop.permute.xlu1 %2314 }
 0x514   : > { %v5381_v32 = vsel %vm382_vm0, %v5239_v35, %v2315_v29  ;;  %2687 = vmatpush1.msra.mxu1 %v3191_v39 }
 0x515   : > { %2688 = vmatprep.subr.mxu1 %v3251_v1  ;;  %2515 = vmatmul.mubr.f32.gmra.mxu1 %v5381_v32 }
 0x516   : > { %2689 = vmatpush1.msra.mxu1 %v3190_v47  ;;  %3163 = vmatprep.mubr.msk.f32.mxu1 %vm382_vm0, %v5386_v21 }
 0x517   : > { %2690 = vmatprep.subr.mxu1 %v3251_v1  ;;  %v2317_v35 = vpop.permute.xlu0 %2316 }
 0x518   : > { %2691 = vmatpush1.msra.mxu1 %v3189_v8  ;;  %v5401_v54 = vsel %vm382_vm0, %v5258_v40, %v2317_v35 }
 0x519   : > { %2692 = vmatprep.subr.mxu1 %v3251_v1  ;;  %2520 = vmatmul.mubr.f32.gmra.mxu1 %v5401_v54 }
 0x51a   : > { %2693 = vmatpush1.msra.mxu1 %v3188_v12  ;;  %3164 = vmatprep.mubr.msk.f32.mxu1 %vm382_vm0, %v5406_v0 }
 0x51b   : > { %2694 = vmatprep.subr.mxu1 %v3251_v1  ;;  %v2319_v40 = vpop.permute.xlu1 %2318 }
 0x51c   : > { %v5421_v25 = vsel %vm382_vm0, %v5278_v51, %v2319_v40  ;;  %2695 = vmatpush1.msra.mxu1 %v3187_v18 }
 0x51d   : > { %2696 = vmatprep.subr.mxu1 %v3251_v1  ;;  %2525 = vmatmul.mubr.f32.gmra.mxu1 %v5421_v25 }
 0x51e   : > { %2697 = vmatpush1.msra.mxu1 %v3186_v59  ;;  %3165 = vmatprep.mubr.msk.f32.mxu1 %vm382_vm0, %v5426_v14 }
 0x51f   : > { %2698 = vmatprep.subr.mxu1 %v3251_v1  ;;  %v2321_v51 = vpop.permute.xlu0 %2320 }
 0x520   : > { %2699 = vmatpush1.msra.mxu1 %v3185_v63  ;;  %v5441_v28 = vsel %vm382_vm0, %v5296_v34, %v2321_v51 }
 0x521   : > { %2700 = vmatprep.subr.mxu1 %v3251_v1  ;;  %2530 = vmatmul.mubr.f32.gmra.mxu1 %v5441_v28 }
 0x522   : > { %2701 = vmatpush1.msra.mxu1 %v3184_v57  ;;  %3166 = vmatprep.mubr.msk.f32.mxu1 %vm382_vm0, %v5446_v11  ;;  %v5596_v57 = vld [vmem:[%s5636_s9] ss:$0 sm:$0xff] }
 0x523   : > { %2702 = vmatprep.subr.mxu1 %v3251_v1  ;;  %v2323_v34 = vpop.permute.xlu1 %2322 }
 0x524   : > { %v5461_v5 = vsel %vm382_vm0, %v5316_v37, %v2323_v34  ;;  %2703 = vmatpush1.msra.mxu1 %v3183_v22 }
 0x525   : > { %2704 = vmatprep.subr.mxu1 %v3251_v1  ;;  %2535 = vmatmul.mubr.f32.gmra.mxu1 %v5461_v5 }
 0x526   : > { %2705 = vmatpush1.msra.mxu1 %v3182_v53  ;;  %3167 = vmatprep.mubr.msk.f32.mxu1 %vm382_vm0, %v5466_v48 }
 0x527   : > { %2706 = vmatprep.subr.mxu1 %v3251_v1  ;;  %v2325_v37 = vpop.permute.xlu0 %2324 }
 0x528   : > { %2707 = vmatpush1.msra.mxu1 %v3181_v31  ;;  %v5481_v7 = vsel %vm382_vm0, %v5328_v6, %v2325_v37  ;;  %v2812_v37 = vld [vmem:[%s3424_s26 + $0x8] sm:$0xff] }
 0x529   : > { %2708 = vmatprep.subr.mxu1 %v3251_v1  ;;  %2540 = vmatmul.mubr.f32.gmra.mxu1 %v5481_v7 }
 0x52a   : > { %2709 = vmatpush1.msra.mxu1 %v3180_v43  ;;  %3168 = vmatprep.mubr.msk.f32.mxu1 %vm382_vm0, %v5486_v10 }
 0x52b   : > { %2710 = vmatprep.subr.mxu1 %v3251_v1  ;;  %v2327_v38 = vpop.permute.xlu1 %2326  ;;  %v2311_v6 = vpop.permute.xlu0 %2310 }
 0x52c   : > { %v5499_v26 = vsel %vm382_vm0, %v5341_v2, %v2327_v38  ;;  %2711 = vmatpush1.msra.mxu1 %v3179_v27  ;;  %v2370_v41 = vsel %vm382_vm0, %v5304_v15, %v2311_v6  ;;  %v3200_v2 = vld [vmem:[%s5635_s8 + $0x238] sm:$0xff]  ;;  %v3199_v15 = vld [vmem:[%s5635_s8 + $0x230] sm:$0xff] }
 0x52d   : > { %2712 = vmatprep.subr.mxu1 %v3251_v1  ;;  %2545 = vmatmul.mubr.f32.gmra.mxu1 %v5499_v26 }
 0x52e   : > { %2617 = vmatmul.mubr.f32.vlgmr.msra.gmra.mxu0 %v2370_v41  ;;  %2713 = vmatpush1.msra.mxu1 %v3178_v16  ;;  %v2813_v41 = vld [vmem:[%s3424_s26 + $0x10] sm:$0xff] }
 0x52f   : > { %3170 = vmatprep.mubr.msk.f32.mxu0 %vm382_vm0, %v5226_v24  ;;  %2714 = vmatprep.subr.mxu1 %v3251_v1  ;;  %v3198_v24 = vld [vmem:[%s5635_s8 + $0x228] sm:$0xff]  ;;  %v2329_v46 = vpop.permute.xlu1 %2328 }
 0x530   : > { %3201 = vmatprep.mubr.msk.f32.mxu1 %vm382_vm0, %v5366_v61  ;;  %2715 = vmatpush1.msra.mxu1 %v3177_v13 }
 0x531   : > { %2732 = vmatprep.subr.mxu1 %v3251_v1 }
 0x532   : > { %2622 = vmatmul.mubr.f32.gmra.mxu0 %v5362_v19  ;;  %2733 = vmatpush2.msra.mxu1 %v3200_v2 }
 0x533   : > { %3171 = vmatprep.mubr.msk.f32.mxu0 %vm382_vm0, %v5366_v61  ;;  %2734 = vmatprep.subr.mxu1 %v3251_v1  ;;  %v2379_v61 = vsel %vm382_vm0, %v5335_v23, %v2329_v46 }
 0x534   : > { %2735 = vmatpush2.msra.mxu1 %v3199_v15 }
 0x535   : > { %2736 = vmatprep.subr.mxu1 %v3251_v1 }
 0x536   : > { %2627 = vmatmul.mubr.f32.gmra.mxu0 %v5381_v32  ;;  %2737 = vmatpush2.msra.mxu1 %v3198_v24 }
 0x537   : > { %3172 = vmatprep.mubr.msk.f32.mxu0 %vm382_vm0, %v5386_v21  ;;  %2738 = vmatprep.subr.mxu1 %v3251_v1 }
 0x538   : > { %2739 = vmatpush2.msra.mxu1 %v3197_v45 }
 0x539   : > { %2740 = vmatprep.subr.mxu1 %v3251_v1 }
 0x53a   : > { %2632 = vmatmul.mubr.f32.gmra.mxu0 %v5401_v54  ;;  %2741 = vmatpush2.msra.mxu1 %v3196_v50 }
 0x53b   : > { %3173 = vmatprep.mubr.msk.f32.mxu0 %vm382_vm0, %v5406_v0  ;;  %2742 = vmatprep.subr.mxu1 %v3251_v1 }
 0x53c   : > { %2743 = vmatpush2.msra.mxu1 %v3195_v17 }
 0x53d   : > { %2744 = vmatprep.subr.mxu1 %v3251_v1 }
 0x53e   : > { %2637 = vmatmul.mubr.f32.gmra.mxu0 %v5421_v25  ;;  %2745 = vmatpush2.msra.mxu1 %v3194_v60  ;;  %v2814_v60 = vld [vmem:[%s3424_s26 + $0x18] sm:$0xff] }
 0x53f   : > { %3174 = vmatprep.mubr.msk.f32.mxu0 %vm382_vm0, %v5426_v14  ;;  %2746 = vmatprep.subr.mxu1 %v3251_v1  ;;  %v2367_v1 = vrot.slane %v5335_v23, 2 }
 0x540   : > { %2747 = vmatpush2.msra.mxu1 %v3193_v44 }
 0x541   : > { %2749 = vmatmul.mubr.f32.vlgmr.msra.gmra.mxu1 %v5381_v32  ;;  %v2369_v19 = vsel %vm548_vm3, %v2367_v1, %v2368_v42 }
 0x542   : > { %2642 = vmatmul.mubr.f32.gmra.mxu0 %v5441_v28  ;;  %3202 = vmatprep.mubr.msk.f32.mxu1 %vm382_vm0, %v5386_v21 }
 0x543   : > { %3175 = vmatprep.mubr.msk.f32.mxu0 %vm382_vm0, %v5446_v11 }
 0x545   : > { %2754 = vmatmul.mubr.f32.gmra.mxu1 %v5401_v54 }
 0x546   : > { %2647 = vmatmul.mubr.f32.gmra.mxu0 %v5461_v5  ;;  %3203 = vmatprep.mubr.msk.f32.mxu1 %vm382_vm0, %v5406_v0 }
 0x547   : > { %3176 = vmatprep.mubr.msk.f32.mxu0 %vm382_vm0, %v5466_v48 }
 0x549   : > { %2759 = vmatmul.mubr.f32.gmra.mxu1 %v5421_v25 }
 0x54a   : > { %2652 = vmatmul.mubr.f32.gmra.mxu0 %v5481_v7  ;;  %3204 = vmatprep.mubr.msk.f32.mxu1 %vm382_vm0, %v5426_v14 }
 0x54d   : > { %2764 = vmatmul.mubr.f32.gmra.mxu1 %v5441_v28 }
 0x54e   : > { %3205 = vmatprep.mubr.msk.f32.mxu1 %vm382_vm0, %v5446_v11 }
 0x551   : > { %2769 = vmatmul.mubr.f32.gmra.mxu1 %v5461_v5 }
 0x552   : > { %3206 = vmatprep.mubr.msk.f32.mxu1 %vm382_vm0, %v5466_v48 }
 0x555   : > { %2774 = vmatmul.mubr.f32.gmra.mxu1 %v5481_v7 }
 0x556   : > { %3207 = vmatprep.mubr.msk.f32.mxu1 %vm382_vm0, %v5486_v10 }
 0x559   : > { %2779 = vmatmul.mubr.f32.gmra.mxu1 %v5499_v26 }
 0x55a   : > { %3208 = vmatprep.mubr.msk.f32.mxu1 %vm382_vm0, %v2369_v19 }
 0x55d   : > { %2784 = vmatmul.mubr.f32.gmra.mxu1 %v2379_v61 }
 0x5d1   : > { %v2511_v39 = vpop.f32.mrf.mxu1 }
 0x5d3   : > { %v2513_v62 = vpop.f32.mrf.mxu1 }
 0x5d5   : > { %v2516_v20 = vpop.f32.mrf.mxu1 }
 0x5d7   : > { %v2518_v36 = vpop.f32.mrf.mxu1 }
 0x5d9   : > { %v2521_v29 = vpop.f32.mrf.mxu1 }
 0x5db   : > { %v2523_v47 = vpop.f32.mrf.mxu1 }
 0x5dd   : > { %v2526_v32 = vpop.f32.mrf.mxu1 }
 0x5df   : > { %v2528_v21 = vpop.f32.mrf.mxu1 }
 0x5e0   : > { %v2816_v21 = vld [vmem:[%s3424_s26 + $0x28] sm:$0xff] }
 0x5e1   : > { %v2531_v8 = vpop.f32.mrf.mxu1 }
 0x5e3   : > { %v2533_v30 = vpop.f32.mrf.mxu1 }
 0x5e5   : > { %v2536_v52 = vpop.f32.mrf.mxu1 }
 0x5e7   : > { %v2538_v35 = vpop.f32.mrf.mxu1 }
 0x5e9   : > { %v5589_v12 = vpop.f32.mrf.mxu1 }
 0x5eb   : > { %v2543_v54 = vpop.f32.mrf.mxu1 }
 0x5ed   : > { %v5591_v0 = vpop.f32.mrf.mxu1 }
 0x5ee   : > { %v2618_v23 = vpop.f32.mrf.mxu0 }
 0x5ef   : > { %v2548_v18 = vpop.f32.mrf.mxu1  ;;  %v2619_v33 = vadd.f32 %v2618_v23, %v2511_v39  ;;  %v2815_v39 = vld [vmem:[%s3424_s26 + $0x20] sm:$0xff] }
 0x5f0   : > { %v2620_v55 = vpop.f32.mrf.mxu0  ;;  %v2817_v18 = vld [vmem:[%s3424_s26 + $0x30] sm:$0xff] }
 0x5f2   : > { %v2623_v56 = vpop.f32.mrf.mxu0 }
 0x5f3   : > { %v2624_v34 = vadd.f32 %v2623_v56, %v2516_v20 }
 0x5f4   : > { %v2625_v40 = vpop.f32.mrf.mxu0 }
 0x5f6   : > { %v2628_v59 = vpop.f32.mrf.mxu0 }
 0x5f7   : > { %v2629_v7 = vadd.f32 %v2628_v59, %v2521_v29 }
 0x5f8   : > { %v2630_v25 = vpop.f32.mrf.mxu0 }
 0x5fa   : > { %v2633_v14 = vpop.f32.mrf.mxu0 }
 0x5fb   : > { %v2634_v2 = vadd.f32 %v2633_v14, %v2526_v32 }
 0x5fc   : > { %v2635_v63 = vpop.f32.mrf.mxu0 }
 0x5fd   : > { %v2818_v63 = vld [vmem:[%s3424_s26 + $0x38] sm:$0xff] }
 0x5fe   : > { %v2638_v58 = vpop.f32.mrf.mxu0 }
 0x5ff   : > { %v2639_v1 = vadd.f32 %v2638_v58, %v2531_v8 }
 0x600   : > { %v2640_v51 = vpop.f32.mrf.mxu0 }
 0x601   : > { %v2750_v28 = vpop.f32.mrf.mxu1 }
 0x602   : > { %v2789_v11 = vadd.f32 %v2750_v28, %v2619_v33  ;;  %v2643_v22 = vpop.f32.mrf.mxu0 }
 0x603   : > { %v2752_v4 = vpop.f32.mrf.mxu1  ;;  %v2644_v20 = vadd.f32 %v2643_v22, %v2536_v52 }
 0x604   : > { %v2803_v53 = vadd.f32 %v5596_v57, %v2789_v11  ;;  %v2645_v5 = vpop.f32.mrf.mxu0 }
 0x605   : > { %v2755_v48 = vpop.f32.mrf.mxu1 }
 0x606   : > { %v2819_v31 = vadd.f32 %v2811_v3, %v2803_v53  ;;  %v2790_v49 = vadd.f32 %v2755_v48, %v2624_v34  ;;  %v2648_v9 = vpop.f32.mrf.mxu0 }
 0x607   : > { %v2757_v43 = vpop.f32.mrf.mxu1  ;;  %v2649_v30 = vadd.f32 %v2648_v9, %v5589_v12 }
 0x608   : > { %2827 = vst [vmem:[%s3429_s29] sm:$0xff] %v2819_v31  ;;  %v2804_v10 = vadd.f32 %v5596_v57, %v2790_v49  ;;  %v2650_v27 = vpop.f32.mrf.mxu0 }
 0x609   : > { %v2760_v38 = vpop.f32.mrf.mxu1 }
 0x60a   : > { %v2820_v6 = vadd.f32 %v2812_v37, %v2804_v10  ;;  %v2791_v16 = vadd.f32 %v2760_v38, %v2629_v7  ;;  %v2653_v26 = vpop.f32.mrf.mxu0 }
 0x60b   : > { %v2762_v13 = vpop.f32.mrf.mxu1  ;;  %v2654_v56 = vadd.f32 %v2653_v26, %v5591_v0 }
 0x60c   : > { %2828 = vst [vmem:[%s3429_s29 + $0x8] sm:$0xff] %v2820_v6  ;;  %v2805_v15 = vadd.f32 %v5596_v57, %v2791_v16  ;;  %v2655_v24 = vpop.f32.mrf.mxu0 }
 0x60d   : > { %v2765_v45 = vpop.f32.mrf.mxu1 }
 0x60e   : > { %v2821_v50 = vadd.f32 %v2813_v41, %v2805_v15  ;;  %v2792_v17 = vadd.f32 %v2765_v45, %v2634_v2 }
 0x60f   : > { %v2767_v44 = vpop.f32.mrf.mxu1 }
 0x610   : > { %2829 = vst [vmem:[%s3429_s29 + $0x10] sm:$0xff] %v2821_v50  ;;  %v2806_v42 = vadd.f32 %v5596_v57, %v2792_v17 }
 0x611   : > { %v2770_v46 = vpop.f32.mrf.mxu1 }
 0x612   : > { %v2822_v19 = vadd.f32 %v2814_v60, %v2806_v42  ;;  %v2793_v61 = vadd.f32 %v2770_v46, %v2639_v1 }
 0x613   : > { %v2772_v62 = vpop.f32.mrf.mxu1 }
 0x614   : > { %2830 = vst [vmem:[%s3429_s29 + $0x18] sm:$0xff] %v2822_v19  ;;  %v2807_v36 = vadd.f32 %v5596_v57, %v2793_v61 }
 0x615   : > { %v2775_v29 = vpop.f32.mrf.mxu1 }
 0x616   : > { %v2823_v47 = vadd.f32 %v2815_v39, %v2807_v36  ;;  %v2794_v32 = vadd.f32 %v2775_v29, %v2644_v20 }
 0x617   : > { %v2777_v8 = vpop.f32.mrf.mxu1 }
 0x618   : > { %2831 = vst [vmem:[%s3429_s29 + $0x20] sm:$0xff] %v2823_v47  ;;  %v2808_v35 = vadd.f32 %v5596_v57, %v2794_v32 }
 0x619   : > { %v2780_v54 = vpop.f32.mrf.mxu1 }
 0x61a   : > { %v2824_v23 = vadd.f32 %v2816_v21, %v2808_v35  ;;  %v2795_v52 = vadd.f32 %v2780_v54, %v2649_v30 }
 0x61b   : > { %v2782_v55 = vpop.f32.mrf.mxu1 }
 0x61c   : > { %2832 = vst [vmem:[%s3429_s29 + $0x28] sm:$0xff] %v2824_v23  ;;  %v2809_v40 = vadd.f32 %v5596_v57, %v2795_v52 }
 0x61d   : > { %v2785_v59 = vpop.f32.mrf.mxu1 }
 0x61e   : > { %v2825_v25 = vadd.f32 %v2817_v18, %v2809_v40  ;;  %v2796_v14 = vadd.f32 %v2785_v59, %v2654_v56 }
 0x61f   : > { %v2787_v12 = vpop.f32.mrf.mxu1 }
 0x620   : > { %2833 = vst [vmem:[%s3429_s29 + $0x30] sm:$0xff] %v2825_v25  ;;  %v2810_v58 = vadd.f32 %v5596_v57, %v2796_v14 }
 0x622   : > { %v2826_v33 = vadd.f32 %v2818_v63, %v2810_v58 }
 0x624   : > { %2834 = vst [vmem:[%s3429_s29 + $0x38] sm:$0xff] %v2826_v33 }
 0x625 PF: > { %s20_s13 = sadd.s32 1, %s3245_s13  }
 0x626   : > { %p17_p5 = scmp.ge.s32.totalorder %s20_s13, 4  }
 0x628   :  { %19 = sbr.rel (!%p17_p5) target bundleno = 1 (0x1), region = 122 }

</bundles_post_ra>
